<compile_context>
chip_gen: v5e
topology: v5e:2x2
jax: 0.10.0
libtpu: 0.0.40
codegen_flags: <defaults>
</compile_context>

<pallas_src>
import jax
import jax.numpy as jnp
from jax.experimental import pallas as pl
from jax.experimental.pallas import tpu as pltpu

LANE = 128


def _round_up(x, m):
    return ((x + m - 1) // m) * m


# -----------------------------------------------------------------------------
# Kernel
# -----------------------------------------------------------------------------
def gru_decoder_kernel(ids_ref,    # SMEM (B,)             int32 token ids
                       emb_ref,    # ANY  (V, LP)          f32 embedding table (DMA gather src)
                       h0_ref,     # VMEM (NL, B, LP)      f32 initial hidden (lane-padded)
                       w_ref,      # VMEM (NL, 2LP, 4LP)   fused GRU weights
                       b_ref,      # VMEM (NL, 1, 4LP)     fused GRU biases
                       wfc_ref,    # VMEM (LP, VP)         fc_2 weight (pre-transposed, padded)
                       bfc_ref,    # VMEM (1, VP)          fc_2 bias (padded)
                       xrec_ref,   # out VMEM (B, VP)
                       hout_ref,   # out VMEM (NL, B, LP)
                       x_vmem,     # scratch VMEM (B, LP)  gathered embedding rows
                       sems):      # scratch DMA semaphores (B,)
    NL, B, LP = h0_ref.shape

    # ---- Embedding lookup: per-row async DMA gather keyed by SMEM scalars ----
    # Issue all B row-copies first, then wait — copies overlap each other.
    copies = []
    for b in range(B):
        cp = pltpu.make_async_copy(emb_ref.at[ids_ref[b]], x_vmem.at[b], sems.at[b])
        cp.start()
        copies.append(cp)
    for cp in copies:
        cp.wait()
    x = x_vmem[...]                                             # (B, LP)

    # ---- Stacked single-time-step GRU: ONE fused matmul per layer ----
    # g = [x|h] @ W_fused + b_fused
    #   = [ x@Wi_r + h@Wh_r | x@Wi_z + h@Wh_z | x@Wi_n | h@Wh_n ]  (+ biases)
    for l in range(NL):
        h = h0_ref[l]                                           # (B, LP)
        xh = jnp.concatenate([x, h], axis=1)                    # (B, 2LP), lane-aligned halves
        g = jnp.dot(xh, w_ref[l], preferred_element_type=jnp.float32) + b_ref[l]
        rz = jax.nn.sigmoid(g[:, :2 * LP])                      # 128-aligned slices
        r = rz[:, :LP]
        zg = rz[:, LP:2 * LP]
        n = jnp.tanh(g[:, 2 * LP:3 * LP] + r * g[:, 3 * LP:])
        h_new = n + zg * (h - n)                                # == (1-z)*n + z*h
        hout_ref[l] = h_new                                     # full-lane unmasked store
        x = h_new

    # ---- fc_2 projection into a lane-dense padded-vocab slab ----
    xrec_ref[...] = (jnp.dot(x, wfc_ref[...], preferred_element_type=jnp.float32)
                     + bfc_ref[...])


# -----------------------------------------------------------------------------
# Wrapper
# -----------------------------------------------------------------------------
def gru_decoder_forward(z, hidden, params, vocab_size):
    B = z.shape[0]
    NL, _, L = hidden.shape
    LP = params["w_fused"].shape[1] // 2
    VP = params["w_fc2_t"].shape[1]

    # glue: matches torch.clamp(z, 0, V-1).long()
    ids = jnp.clip(z, 0, vocab_size - 1).astype(jnp.int32)      # (B,)
    # lane-pad the hidden state; padded lanes stay exactly zero through the GRU
    h0 = jnp.pad(hidden, ((0, 0), (0, 0), (0, LP - L)))         # (NL, B, LP)

    args = (ids, params["embedding"], h0,
            params["w_fused"], params["b_fused"],
            params["w_fc2_t"], params["b_fc2"])

    in_specs = [
        pl.BlockSpec(memory_space=pltpu.MemorySpace.SMEM),      # ids (scalars)
        pl.BlockSpec(memory_space=pl.ANY),                      # embedding (DMA gathered)
        pl.BlockSpec(memory_space=pltpu.MemorySpace.VMEM),      # h0
        pl.BlockSpec(memory_space=pltpu.MemorySpace.VMEM),      # fused GRU weights
        pl.BlockSpec(memory_space=pltpu.MemorySpace.VMEM),      # fused GRU biases
        pl.BlockSpec(memory_space=pltpu.MemorySpace.VMEM),      # fc2 weight
        pl.BlockSpec(memory_space=pltpu.MemorySpace.VMEM),      # fc2 bias
    ]
    out_specs = (pl.BlockSpec(memory_space=pltpu.MemorySpace.VMEM),
                 pl.BlockSpec(memory_space=pltpu.MemorySpace.VMEM))

    xrec_pad, hout_pad = pl.pallas_call(
        gru_decoder_kernel,
        out_shape=(jax.ShapeDtypeStruct((B, VP), jnp.float32),
                   jax.ShapeDtypeStruct((NL, B, LP), jnp.float32)),
        in_specs=in_specs,
        out_specs=out_specs,
        scratch_shapes=[pltpu.VMEM((B, LP), jnp.float32),
                        pltpu.SemaphoreType.DMA((B,))],
        compiler_params=pltpu.CompilerParams(vmem_limit_bytes=32 * 1024 * 1024),
    )(*args)

    # strip lane padding (vocab_pad -> vocab, latent_pad -> latent)
    return xrec_pad[:, :vocab_size], hout_pad[:, :, :L]


# -----------------------------------------------------------------------------
# Parameter construction (torch layout) + host-side packing for the kernel
# -----------------------------------------------------------------------------
def init_raw_params(key, vocab_size, latent_dim, num_layers):
    """Deterministic synthetic params in torch layout (weight_ih_l: (3L, L), ...)."""
    ks = jax.random.split(key, 7)
    L = latent_dim
    bound = 1.0 / jnp.sqrt(L)
    return dict(
        embedding=jax.random.normal(ks[0], (vocab_size, L), jnp.float32),
        w_ih=jax.random.uniform(ks[1], (num_layers, 3 * L, L), jnp.float32, -bound, bound),
        w_hh=jax.random.uniform(ks[2], (num_layers, 3 * L, L), jnp.float32, -bound, bound),
        b_ih=jax.random.uniform(ks[3], (num_layers, 3 * L), jnp.float32, -bound, bound),
        b_hh=jax.random.uniform(ks[4], (num_layers, 3 * L), jnp.float32, -bound, bound),
        w_fc2=jax.random.uniform(ks[5], (vocab_size, L), jnp.float32, -bound, bound),
        b_fc2=jax.random.uniform(ks[6], (vocab_size,), jnp.float32, -bound, bound),
    )


def pack_params(raw, vocab_size, latent_dim, num_layers):
    """One-time host-side prep: fuse per-gate weights, fold r/z biases, pad to lanes."""
    L = latent_dim
    LP = _round_up(L, LANE)
    VP = _round_up(vocab_size, LANE)
    NL = num_layers

    emb = jnp.zeros((vocab_size, LP), jnp.float32).at[:, :L].set(raw["embedding"])

    w_fused = jnp.zeros((NL, 2 * LP, 4 * LP), jnp.float32)
    b_fused = jnp.zeros((NL, 1, 4 * LP), jnp.float32)
    for l in range(NL):
        wih, whh = raw["w_ih"][l], raw["w_hh"][l]               # (3L, L) torch layout
        bih, bhh = raw["b_ih"][l], raw["b_hh"][l]               # (3L,)
        wir, wiz, win = wih[0:L].T, wih[L:2 * L].T, wih[2 * L:3 * L].T
        whr, whz, whn = whh[0:L].T, whh[L:2 * L].T, whh[2 * L:3 * L].T
        w_fused = w_fused.at[l, 0:L, 0:L].set(wir)
        w_fused = w_fused.at[l, 0:L, LP:LP + L].set(wiz)
        w_fused = w_fused.at[l, 0:L, 2 * LP:2 * LP + L].set(win)
        w_fused = w_fused.at[l, LP:LP + L, 0:L].set(whr)
        w_fused = w_fused.at[l, LP:LP + L, LP:LP + L].set(whz)
        w_fused = w_fused.at[l, LP:LP + L, 3 * LP:3 * LP + L].set(whn)
        b_fused = b_fused.at[l, 0, 0:L].set(bih[0:L] + bhh[0:L])                 # b_r folded
        b_fused = b_fused.at[l, 0, LP:LP + L].set(bih[L:2 * L] + bhh[L:2 * L])   # b_z folded
        b_fused = b_fused.at[l, 0, 2 * LP:2 * LP + L].set(bih[2 * L:3 * L])      # b_in
        b_fused = b_fused.at[l, 0, 3 * LP:3 * LP + L].set(bhh[2 * L:3 * L])      # b_hn

    w_fc2_t = jnp.zeros((LP, VP), jnp.float32).at[:L, :vocab_size].set(raw["w_fc2"].T)
    b_fc2 = jnp.zeros((1, VP), jnp.float32).at[0, :vocab_size].set(raw["b_fc2"])

    return dict(embedding=emb, w_fused=w_fused, b_fused=b_fused,
                w_fc2_t=w_fc2_t, b_fc2=b_fc2)


# -----------------------------------------------------------------------------
# Pure-JAX reference (torch semantics) for correctness check
# -----------------------------------------------------------------------------
def reference_forward(z, hidden, raw, vocab_size):
    ids = jnp.clip(z, 0, vocab_size - 1).astype(jnp.int32)
    x = raw["embedding"][ids]                                   # (B, L)
    NL = hidden.shape[0]
    L = x.shape[1]
    hs = []
    for l in range(NL):
        h = hidden[l]
        gi = x @ raw["w_ih"][l].T + raw["b_ih"][l]
        gh = h @ raw["w_hh"][l].T + raw["b_hh"][l]
        r = jax.nn.sigmoid(gi[:, :L] + gh[:, :L])
        zg = jax.nn.sigmoid(gi[:, L:2 * L] + gh[:, L:2 * L])
        n = jnp.tanh(gi[:, 2 * L:] + r * gh[:, 2 * L:])
        h_new = (1.0 - zg) * n + zg * h
        hs.append(h_new)
        x = h_new
    x_recon = x @ raw["w_fc2"].T + raw["b_fc2"]
    return x_recon, jnp.stack(hs, axis=0)


if __name__ == "__main__":
    vocab_size = 20
    latent_dim = 32
    num_layers = 5
    batch = 8

    key = jax.random.PRNGKey(0)
    k_p, k_z, k_h = jax.random.split(key, 3)

    raw = init_raw_params(k_p, vocab_size, latent_dim, num_layers)
    params = pack_params(raw, vocab_size, latent_dim, num_layers)

    # z: float "codes" that get clamped + cast to token ids (exercises clamp)
    z = jax.random.uniform(k_z, (batch,), jnp.float32, -3.0, float(vocab_size + 3))
    hidden = jax.random.normal(k_h, (num_layers, batch, latent_dim), jnp.float32)

    x_recon, h_out = gru_decoder_forward(z, hidden, params, vocab_size)
    x_recon = jax.block_until_ready(x_recon)
    h_out = jax.block_until_ready(h_out)

    x_ref, h_ref = reference_forward(z, hidden, raw, vocab_size)
    assert x_recon.shape == (batch, vocab_size)
    assert h_out.shape == (num_layers, batch, latent_dim)
    assert jnp.max(jnp.abs(x_recon - x_ref)) < 1e-4
    assert jnp.max(jnp.abs(h_out - h_ref)) < 1e-4

    print("KERNEL_OK")
</pallas_src>

<mosaic_0001>
module attributes {stable_mosaic.version = 11 : i64} {
  func.func @gru_decoder_kernel(%arg0: memref<8xi32, #tpu.memory_space<smem>>, %arg1: memref<20x128xf32, #tpu.memory_space<any>>, %arg2: memref<5x8x128xf32, #tpu.memory_space<vmem>>, %arg3: memref<5x256x512xf32, #tpu.memory_space<vmem>>, %arg4: memref<5x1x512xf32, #tpu.memory_space<vmem>>, %arg5: memref<128x128xf32, #tpu.memory_space<vmem>>, %arg6: memref<1x128xf32, #tpu.memory_space<vmem>>, %arg7: memref<8x128xf32, #tpu.memory_space<vmem>>, %arg8: memref<5x8x128xf32, #tpu.memory_space<vmem>>, %arg9: memref<8x128xf32, #tpu.memory_space<vmem>>, %arg10: memref<8x!tpu.dma_semaphore, #tpu.memory_space<semaphore_mem>>) attributes {dimension_semantics = [], scalar_prefetch = 0 : i64, scratch_operands = 2 : i64, tpu.core_type = #tpu.core_type<tc>} {
    %c0 = arith.constant 0 : index
    %0 = memref.load %arg0[%c0] : memref<8xi32, #tpu.memory_space<smem>>
    %c0_i32 = arith.constant 0 : i32
    %c0_i32_0 = arith.constant 0 : i32
    %c0_i32_1 = arith.constant 0 : i32
    %1 = tpu.memref_slice %arg1[%0, %c0_i32_1] : memref<20x128xf32, #tpu.memory_space<any>> -> memref<1x128xf32, #tpu.memory_space<any>>
    %2 = tpu.memref_squeeze %1 : memref<1x128xf32, #tpu.memory_space<any>> -> memref<128xf32, #tpu.memory_space<any>>
    %c0_i32_2 = arith.constant 0 : i32
    %3 = tpu.memref_slice %arg9[%c0_i32, %c0_i32_2] : memref<8x128xf32, #tpu.memory_space<vmem>> -> memref<1x128xf32, #tpu.memory_space<vmem>>
    %4 = tpu.memref_squeeze %3 : memref<1x128xf32, #tpu.memory_space<vmem>> -> memref<128xf32, #tpu.memory_space<vmem>>
    %5 = tpu.memref_slice %arg10[%c0_i32_0] : memref<8x!tpu.dma_semaphore, #tpu.memory_space<semaphore_mem>> -> memref<1x!tpu.dma_semaphore, #tpu.memory_space<semaphore_mem>>
    %6 = tpu.memref_squeeze %5 : memref<1x!tpu.dma_semaphore, #tpu.memory_space<semaphore_mem>> -> memref<!tpu.dma_semaphore, #tpu.memory_space<semaphore_mem>>
    tpu.enqueue_dma source(%2 : memref<128xf32, #tpu.memory_space<any>>) target(%4 : memref<128xf32, #tpu.memory_space<vmem>>) target_semaphore(%6 : memref<!tpu.dma_semaphore, #tpu.memory_space<semaphore_mem>>)
    %c1 = arith.constant 1 : index
    %7 = memref.load %arg0[%c1] : memref<8xi32, #tpu.memory_space<smem>>
    %c1_i32 = arith.constant 1 : i32
    %c1_i32_3 = arith.constant 1 : i32
    %c0_i32_4 = arith.constant 0 : i32
    %8 = tpu.memref_slice %arg1[%7, %c0_i32_4] : memref<20x128xf32, #tpu.memory_space<any>> -> memref<1x128xf32, #tpu.memory_space<any>>
    %9 = tpu.memref_squeeze %8 : memref<1x128xf32, #tpu.memory_space<any>> -> memref<128xf32, #tpu.memory_space<any>>
    %c0_i32_5 = arith.constant 0 : i32
    %10 = tpu.memref_slice %arg9[%c1_i32, %c0_i32_5] : memref<8x128xf32, #tpu.memory_space<vmem>> -> memref<1x128xf32, #tpu.memory_space<vmem>>
    %11 = tpu.memref_squeeze %10 : memref<1x128xf32, #tpu.memory_space<vmem>> -> memref<128xf32, #tpu.memory_space<vmem>>
    %12 = tpu.memref_slice %arg10[%c1_i32_3] : memref<8x!tpu.dma_semaphore, #tpu.memory_space<semaphore_mem>> -> memref<1x!tpu.dma_semaphore, #tpu.memory_space<semaphore_mem>>
    %13 = tpu.memref_squeeze %12 : memref<1x!tpu.dma_semaphore, #tpu.memory_space<semaphore_mem>> -> memref<!tpu.dma_semaphore, #tpu.memory_space<semaphore_mem>>
    tpu.enqueue_dma source(%9 : memref<128xf32, #tpu.memory_space<any>>) target(%11 : memref<128xf32, #tpu.memory_space<vmem>>) target_semaphore(%13 : memref<!tpu.dma_semaphore, #tpu.memory_space<semaphore_mem>>)
    %c2 = arith.constant 2 : index
    %14 = memref.load %arg0[%c2] : memref<8xi32, #tpu.memory_space<smem>>
    %c2_i32 = arith.constant 2 : i32
    %c2_i32_6 = arith.constant 2 : i32
    %c0_i32_7 = arith.constant 0 : i32
    %15 = tpu.memref_slice %arg1[%14, %c0_i32_7] : memref<20x128xf32, #tpu.memory_space<any>> -> memref<1x128xf32, #tpu.memory_space<any>>
    %16 = tpu.memref_squeeze %15 : memref<1x128xf32, #tpu.memory_space<any>> -> memref<128xf32, #tpu.memory_space<any>>
    %c0_i32_8 = arith.constant 0 : i32
    %17 = tpu.memref_slice %arg9[%c2_i32, %c0_i32_8] : memref<8x128xf32, #tpu.memory_space<vmem>> -> memref<1x128xf32, #tpu.memory_space<vmem>>
    %18 = tpu.memref_squeeze %17 : memref<1x128xf32, #tpu.memory_space<vmem>> -> memref<128xf32, #tpu.memory_space<vmem>>
    %19 = tpu.memref_slice %arg10[%c2_i32_6] : memref<8x!tpu.dma_semaphore, #tpu.memory_space<semaphore_mem>> -> memref<1x!tpu.dma_semaphore, #tpu.memory_space<semaphore_mem>>
    %20 = tpu.memref_squeeze %19 : memref<1x!tpu.dma_semaphore, #tpu.memory_space<semaphore_mem>> -> memref<!tpu.dma_semaphore, #tpu.memory_space<semaphore_mem>>
    tpu.enqueue_dma source(%16 : memref<128xf32, #tpu.memory_space<any>>) target(%18 : memref<128xf32, #tpu.memory_space<vmem>>) target_semaphore(%20 : memref<!tpu.dma_semaphore, #tpu.memory_space<semaphore_mem>>)
    %c3 = arith.constant 3 : index
    %21 = memref.load %arg0[%c3] : memref<8xi32, #tpu.memory_space<smem>>
    %c3_i32 = arith.constant 3 : i32
    %c3_i32_9 = arith.constant 3 : i32
    %c0_i32_10 = arith.constant 0 : i32
    %22 = tpu.memref_slice %arg1[%21, %c0_i32_10] : memref<20x128xf32, #tpu.memory_space<any>> -> memref<1x128xf32, #tpu.memory_space<any>>
    %23 = tpu.memref_squeeze %22 : memref<1x128xf32, #tpu.memory_space<any>> -> memref<128xf32, #tpu.memory_space<any>>
    %c0_i32_11 = arith.constant 0 : i32
    %24 = tpu.memref_slice %arg9[%c3_i32, %c0_i32_11] : memref<8x128xf32, #tpu.memory_space<vmem>> -> memref<1x128xf32, #tpu.memory_space<vmem>>
    %25 = tpu.memref_squeeze %24 : memref<1x128xf32, #tpu.memory_space<vmem>> -> memref<128xf32, #tpu.memory_space<vmem>>
    %26 = tpu.memref_slice %arg10[%c3_i32_9] : memref<8x!tpu.dma_semaphore, #tpu.memory_space<semaphore_mem>> -> memref<1x!tpu.dma_semaphore, #tpu.memory_space<semaphore_mem>>
    %27 = tpu.memref_squeeze %26 : memref<1x!tpu.dma_semaphore, #tpu.memory_space<semaphore_mem>> -> memref<!tpu.dma_semaphore, #tpu.memory_space<semaphore_mem>>
    tpu.enqueue_dma source(%23 : memref<128xf32, #tpu.memory_space<any>>) target(%25 : memref<128xf32, #tpu.memory_space<vmem>>) target_semaphore(%27 : memref<!tpu.dma_semaphore, #tpu.memory_space<semaphore_mem>>)
    %c4 = arith.constant 4 : index
    %28 = memref.load %arg0[%c4] : memref<8xi32, #tpu.memory_space<smem>>
    %c4_i32 = arith.constant 4 : i32
    %c4_i32_12 = arith.constant 4 : i32
    %c0_i32_13 = arith.constant 0 : i32
    %29 = tpu.memref_slice %arg1[%28, %c0_i32_13] : memref<20x128xf32, #tpu.memory_space<any>> -> memref<1x128xf32, #tpu.memory_space<any>>
    %30 = tpu.memref_squeeze %29 : memref<1x128xf32, #tpu.memory_space<any>> -> memref<128xf32, #tpu.memory_space<any>>
    %c0_i32_14 = arith.constant 0 : i32
    %31 = tpu.memref_slice %arg9[%c4_i32, %c0_i32_14] : memref<8x128xf32, #tpu.memory_space<vmem>> -> memref<1x128xf32, #tpu.memory_space<vmem>>
    %32 = tpu.memref_squeeze %31 : memref<1x128xf32, #tpu.memory_space<vmem>> -> memref<128xf32, #tpu.memory_space<vmem>>
    %33 = tpu.memref_slice %arg10[%c4_i32_12] : memref<8x!tpu.dma_semaphore, #tpu.memory_space<semaphore_mem>> -> memref<1x!tpu.dma_semaphore, #tpu.memory_space<semaphore_mem>>
    %34 = tpu.memref_squeeze %33 : memref<1x!tpu.dma_semaphore, #tpu.memory_space<semaphore_mem>> -> memref<!tpu.dma_semaphore, #tpu.memory_space<semaphore_mem>>
    tpu.enqueue_dma source(%30 : memref<128xf32, #tpu.memory_space<any>>) target(%32 : memref<128xf32, #tpu.memory_space<vmem>>) target_semaphore(%34 : memref<!tpu.dma_semaphore, #tpu.memory_space<semaphore_mem>>)
    %c5 = arith.constant 5 : index
    %35 = memref.load %arg0[%c5] : memref<8xi32, #tpu.memory_space<smem>>
    %c5_i32 = arith.constant 5 : i32
    %c5_i32_15 = arith.constant 5 : i32
    %c0_i32_16 = arith.constant 0 : i32
    %36 = tpu.memref_slice %arg1[%35, %c0_i32_16] : memref<20x128xf32, #tpu.memory_space<any>> -> memref<1x128xf32, #tpu.memory_space<any>>
    %37 = tpu.memref_squeeze %36 : memref<1x128xf32, #tpu.memory_space<any>> -> memref<128xf32, #tpu.memory_space<any>>
    %c0_i32_17 = arith.constant 0 : i32
    %38 = tpu.memref_slice %arg9[%c5_i32, %c0_i32_17] : memref<8x128xf32, #tpu.memory_space<vmem>> -> memref<1x128xf32, #tpu.memory_space<vmem>>
    %39 = tpu.memref_squeeze %38 : memref<1x128xf32, #tpu.memory_space<vmem>> -> memref<128xf32, #tpu.memory_space<vmem>>
    %40 = tpu.memref_slice %arg10[%c5_i32_15] : memref<8x!tpu.dma_semaphore, #tpu.memory_space<semaphore_mem>> -> memref<1x!tpu.dma_semaphore, #tpu.memory_space<semaphore_mem>>
    %41 = tpu.memref_squeeze %40 : memref<1x!tpu.dma_semaphore, #tpu.memory_space<semaphore_mem>> -> memref<!tpu.dma_semaphore, #tpu.memory_space<semaphore_mem>>
    tpu.enqueue_dma source(%37 : memref<128xf32, #tpu.memory_space<any>>) target(%39 : memref<128xf32, #tpu.memory_space<vmem>>) target_semaphore(%41 : memref<!tpu.dma_semaphore, #tpu.memory_space<semaphore_mem>>)
    %c6 = arith.constant 6 : index
    %42 = memref.load %arg0[%c6] : memref<8xi32, #tpu.memory_space<smem>>
    %c6_i32 = arith.constant 6 : i32
    %c6_i32_18 = arith.constant 6 : i32
    %c0_i32_19 = arith.constant 0 : i32
    %43 = tpu.memref_slice %arg1[%42, %c0_i32_19] : memref<20x128xf32, #tpu.memory_space<any>> -> memref<1x128xf32, #tpu.memory_space<any>>
    %44 = tpu.memref_squeeze %43 : memref<1x128xf32, #tpu.memory_space<any>> -> memref<128xf32, #tpu.memory_space<any>>
    %c0_i32_20 = arith.constant 0 : i32
    %45 = tpu.memref_slice %arg9[%c6_i32, %c0_i32_20] : memref<8x128xf32, #tpu.memory_space<vmem>> -> memref<1x128xf32, #tpu.memory_space<vmem>>
    %46 = tpu.memref_squeeze %45 : memref<1x128xf32, #tpu.memory_space<vmem>> -> memref<128xf32, #tpu.memory_space<vmem>>
    %47 = tpu.memref_slice %arg10[%c6_i32_18] : memref<8x!tpu.dma_semaphore, #tpu.memory_space<semaphore_mem>> -> memref<1x!tpu.dma_semaphore, #tpu.memory_space<semaphore_mem>>
    %48 = tpu.memref_squeeze %47 : memref<1x!tpu.dma_semaphore, #tpu.memory_space<semaphore_mem>> -> memref<!tpu.dma_semaphore, #tpu.memory_space<semaphore_mem>>
    tpu.enqueue_dma source(%44 : memref<128xf32, #tpu.memory_space<any>>) target(%46 : memref<128xf32, #tpu.memory_space<vmem>>) target_semaphore(%48 : memref<!tpu.dma_semaphore, #tpu.memory_space<semaphore_mem>>)
    %c7 = arith.constant 7 : index
    %49 = memref.load %arg0[%c7] : memref<8xi32, #tpu.memory_space<smem>>
    %c7_i32 = arith.constant 7 : i32
    %c7_i32_21 = arith.constant 7 : i32
    %c0_i32_22 = arith.constant 0 : i32
    %50 = tpu.memref_slice %arg1[%49, %c0_i32_22] : memref<20x128xf32, #tpu.memory_space<any>> -> memref<1x128xf32, #tpu.memory_space<any>>
    %51 = tpu.memref_squeeze %50 : memref<1x128xf32, #tpu.memory_space<any>> -> memref<128xf32, #tpu.memory_space<any>>
    %c0_i32_23 = arith.constant 0 : i32
    %52 = tpu.memref_slice %arg9[%c7_i32, %c0_i32_23] : memref<8x128xf32, #tpu.memory_space<vmem>> -> memref<1x128xf32, #tpu.memory_space<vmem>>
    %53 = tpu.memref_squeeze %52 : memref<1x128xf32, #tpu.memory_space<vmem>> -> memref<128xf32, #tpu.memory_space<vmem>>
    %54 = tpu.memref_slice %arg10[%c7_i32_21] : memref<8x!tpu.dma_semaphore, #tpu.memory_space<semaphore_mem>> -> memref<1x!tpu.dma_semaphore, #tpu.memory_space<semaphore_mem>>
    %55 = tpu.memref_squeeze %54 : memref<1x!tpu.dma_semaphore, #tpu.memory_space<semaphore_mem>> -> memref<!tpu.dma_semaphore, #tpu.memory_space<semaphore_mem>>
    tpu.enqueue_dma source(%51 : memref<128xf32, #tpu.memory_space<any>>) target(%53 : memref<128xf32, #tpu.memory_space<vmem>>) target_semaphore(%55 : memref<!tpu.dma_semaphore, #tpu.memory_space<semaphore_mem>>)
    %c0_i32_24 = arith.constant 0 : i32
    %c0_i32_25 = arith.constant 0 : i32
    %c0_i32_26 = arith.constant 0 : i32
    %56 = tpu.memref_slice %arg1[%0, %c0_i32_26] : memref<20x128xf32, #tpu.memory_space<any>> -> memref<1x128xf32, #tpu.memory_space<any>>
    %57 = tpu.memref_squeeze %56 : memref<1x128xf32, #tpu.memory_space<any>> -> memref<128xf32, #tpu.memory_space<any>>
    %c0_i32_27 = arith.constant 0 : i32
    %58 = tpu.memref_slice %arg9[%c0_i32_24, %c0_i32_27] : memref<8x128xf32, #tpu.memory_space<vmem>> -> memref<1x128xf32, #tpu.memory_space<vmem>>
    %59 = tpu.memref_squeeze %58 : memref<1x128xf32, #tpu.memory_space<vmem>> -> memref<128xf32, #tpu.memory_space<vmem>>
    %60 = tpu.memref_slice %arg10[%c0_i32_25] : memref<8x!tpu.dma_semaphore, #tpu.memory_space<semaphore_mem>> -> memref<1x!tpu.dma_semaphore, #tpu.memory_space<semaphore_mem>>
    %61 = tpu.memref_squeeze %60 : memref<1x!tpu.dma_semaphore, #tpu.memory_space<semaphore_mem>> -> memref<!tpu.dma_semaphore, #tpu.memory_space<semaphore_mem>>
    tpu.wait_dma2 semaphore(%61 : memref<!tpu.dma_semaphore, #tpu.memory_space<semaphore_mem>>) src(%57 : memref<128xf32, #tpu.memory_space<any>>) dst(%59 : memref<128xf32, #tpu.memory_space<vmem>>)
    %c1_i32_28 = arith.constant 1 : i32
    %c1_i32_29 = arith.constant 1 : i32
    %c0_i32_30 = arith.constant 0 : i32
    %62 = tpu.memref_slice %arg1[%7, %c0_i32_30] : memref<20x128xf32, #tpu.memory_space<any>> -> memref<1x128xf32, #tpu.memory_space<any>>
    %63 = tpu.memref_squeeze %62 : memref<1x128xf32, #tpu.memory_space<any>> -> memref<128xf32, #tpu.memory_space<any>>
    %c0_i32_31 = arith.constant 0 : i32
    %64 = tpu.memref_slice %arg9[%c1_i32_28, %c0_i32_31] : memref<8x128xf32, #tpu.memory_space<vmem>> -> memref<1x128xf32, #tpu.memory_space<vmem>>
    %65 = tpu.memref_squeeze %64 : memref<1x128xf32, #tpu.memory_space<vmem>> -> memref<128xf32, #tpu.memory_space<vmem>>
    %66 = tpu.memref_slice %arg10[%c1_i32_29] : memref<8x!tpu.dma_semaphore, #tpu.memory_space<semaphore_mem>> -> memref<1x!tpu.dma_semaphore, #tpu.memory_space<semaphore_mem>>
    %67 = tpu.memref_squeeze %66 : memref<1x!tpu.dma_semaphore, #tpu.memory_space<semaphore_mem>> -> memref<!tpu.dma_semaphore, #tpu.memory_space<semaphore_mem>>
    tpu.wait_dma2 semaphore(%67 : memref<!tpu.dma_semaphore, #tpu.memory_space<semaphore_mem>>) src(%63 : memref<128xf32, #tpu.memory_space<any>>) dst(%65 : memref<128xf32, #tpu.memory_space<vmem>>)
    %c2_i32_32 = arith.constant 2 : i32
    %c2_i32_33 = arith.constant 2 : i32
    %c0_i32_34 = arith.constant 0 : i32
    %68 = tpu.memref_slice %arg1[%14, %c0_i32_34] : memref<20x128xf32, #tpu.memory_space<any>> -> memref<1x128xf32, #tpu.memory_space<any>>
    %69 = tpu.memref_squeeze %68 : memref<1x128xf32, #tpu.memory_space<any>> -> memref<128xf32, #tpu.memory_space<any>>
    %c0_i32_35 = arith.constant 0 : i32
    %70 = tpu.memref_slice %arg9[%c2_i32_32, %c0_i32_35] : memref<8x128xf32, #tpu.memory_space<vmem>> -> memref<1x128xf32, #tpu.memory_space<vmem>>
    %71 = tpu.memref_squeeze %70 : memref<1x128xf32, #tpu.memory_space<vmem>> -> memref<128xf32, #tpu.memory_space<vmem>>
    %72 = tpu.memref_slice %arg10[%c2_i32_33] : memref<8x!tpu.dma_semaphore, #tpu.memory_space<semaphore_mem>> -> memref<1x!tpu.dma_semaphore, #tpu.memory_space<semaphore_mem>>
    %73 = tpu.memref_squeeze %72 : memref<1x!tpu.dma_semaphore, #tpu.memory_space<semaphore_mem>> -> memref<!tpu.dma_semaphore, #tpu.memory_space<semaphore_mem>>
    tpu.wait_dma2 semaphore(%73 : memref<!tpu.dma_semaphore, #tpu.memory_space<semaphore_mem>>) src(%69 : memref<128xf32, #tpu.memory_space<any>>) dst(%71 : memref<128xf32, #tpu.memory_space<vmem>>)
    %c3_i32_36 = arith.constant 3 : i32
    %c3_i32_37 = arith.constant 3 : i32
    %c0_i32_38 = arith.constant 0 : i32
    %74 = tpu.memref_slice %arg1[%21, %c0_i32_38] : memref<20x128xf32, #tpu.memory_space<any>> -> memref<1x128xf32, #tpu.memory_space<any>>
    %75 = tpu.memref_squeeze %74 : memref<1x128xf32, #tpu.memory_space<any>> -> memref<128xf32, #tpu.memory_space<any>>
    %c0_i32_39 = arith.constant 0 : i32
    %76 = tpu.memref_slice %arg9[%c3_i32_36, %c0_i32_39] : memref<8x128xf32, #tpu.memory_space<vmem>> -> memref<1x128xf32, #tpu.memory_space<vmem>>
    %77 = tpu.memref_squeeze %76 : memref<1x128xf32, #tpu.memory_space<vmem>> -> memref<128xf32, #tpu.memory_space<vmem>>
    %78 = tpu.memref_slice %arg10[%c3_i32_37] : memref<8x!tpu.dma_semaphore, #tpu.memory_space<semaphore_mem>> -> memref<1x!tpu.dma_semaphore, #tpu.memory_space<semaphore_mem>>
    %79 = tpu.memref_squeeze %78 : memref<1x!tpu.dma_semaphore, #tpu.memory_space<semaphore_mem>> -> memref<!tpu.dma_semaphore, #tpu.memory_space<semaphore_mem>>
    tpu.wait_dma2 semaphore(%79 : memref<!tpu.dma_semaphore, #tpu.memory_space<semaphore_mem>>) src(%75 : memref<128xf32, #tpu.memory_space<any>>) dst(%77 : memref<128xf32, #tpu.memory_space<vmem>>)
    %c4_i32_40 = arith.constant 4 : i32
    %c4_i32_41 = arith.constant 4 : i32
    %c0_i32_42 = arith.constant 0 : i32
    %80 = tpu.memref_slice %arg1[%28, %c0_i32_42] : memref<20x128xf32, #tpu.memory_space<any>> -> memref<1x128xf32, #tpu.memory_space<any>>
    %81 = tpu.memref_squeeze %80 : memref<1x128xf32, #tpu.memory_space<any>> -> memref<128xf32, #tpu.memory_space<any>>
    %c0_i32_43 = arith.constant 0 : i32
    %82 = tpu.memref_slice %arg9[%c4_i32_40, %c0_i32_43] : memref<8x128xf32, #tpu.memory_space<vmem>> -> memref<1x128xf32, #tpu.memory_space<vmem>>
    %83 = tpu.memref_squeeze %82 : memref<1x128xf32, #tpu.memory_space<vmem>> -> memref<128xf32, #tpu.memory_space<vmem>>
    %84 = tpu.memref_slice %arg10[%c4_i32_41] : memref<8x!tpu.dma_semaphore, #tpu.memory_space<semaphore_mem>> -> memref<1x!tpu.dma_semaphore, #tpu.memory_space<semaphore_mem>>
    %85 = tpu.memref_squeeze %84 : memref<1x!tpu.dma_semaphore, #tpu.memory_space<semaphore_mem>> -> memref<!tpu.dma_semaphore, #tpu.memory_space<semaphore_mem>>
    tpu.wait_dma2 semaphore(%85 : memref<!tpu.dma_semaphore, #tpu.memory_space<semaphore_mem>>) src(%81 : memref<128xf32, #tpu.memory_space<any>>) dst(%83 : memref<128xf32, #tpu.memory_space<vmem>>)
    %c5_i32_44 = arith.constant 5 : i32
    %c5_i32_45 = arith.constant 5 : i32
    %c0_i32_46 = arith.constant 0 : i32
    %86 = tpu.memref_slice %arg1[%35, %c0_i32_46] : memref<20x128xf32, #tpu.memory_space<any>> -> memref<1x128xf32, #tpu.memory_space<any>>
    %87 = tpu.memref_squeeze %86 : memref<1x128xf32, #tpu.memory_space<any>> -> memref<128xf32, #tpu.memory_space<any>>
    %c0_i32_47 = arith.constant 0 : i32
    %88 = tpu.memref_slice %arg9[%c5_i32_44, %c0_i32_47] : memref<8x128xf32, #tpu.memory_space<vmem>> -> memref<1x128xf32, #tpu.memory_space<vmem>>
    %89 = tpu.memref_squeeze %88 : memref<1x128xf32, #tpu.memory_space<vmem>> -> memref<128xf32, #tpu.memory_space<vmem>>
    %90 = tpu.memref_slice %arg10[%c5_i32_45] : memref<8x!tpu.dma_semaphore, #tpu.memory_space<semaphore_mem>> -> memref<1x!tpu.dma_semaphore, #tpu.memory_space<semaphore_mem>>
    %91 = tpu.memref_squeeze %90 : memref<1x!tpu.dma_semaphore, #tpu.memory_space<semaphore_mem>> -> memref<!tpu.dma_semaphore, #tpu.memory_space<semaphore_mem>>
    tpu.wait_dma2 semaphore(%91 : memref<!tpu.dma_semaphore, #tpu.memory_space<semaphore_mem>>) src(%87 : memref<128xf32, #tpu.memory_space<any>>) dst(%89 : memref<128xf32, #tpu.memory_space<vmem>>)
    %c6_i32_48 = arith.constant 6 : i32
    %c6_i32_49 = arith.constant 6 : i32
    %c0_i32_50 = arith.constant 0 : i32
    %92 = tpu.memref_slice %arg1[%42, %c0_i32_50] : memref<20x128xf32, #tpu.memory_space<any>> -> memref<1x128xf32, #tpu.memory_space<any>>
    %93 = tpu.memref_squeeze %92 : memref<1x128xf32, #tpu.memory_space<any>> -> memref<128xf32, #tpu.memory_space<any>>
    %c0_i32_51 = arith.constant 0 : i32
    %94 = tpu.memref_slice %arg9[%c6_i32_48, %c0_i32_51] : memref<8x128xf32, #tpu.memory_space<vmem>> -> memref<1x128xf32, #tpu.memory_space<vmem>>
    %95 = tpu.memref_squeeze %94 : memref<1x128xf32, #tpu.memory_space<vmem>> -> memref<128xf32, #tpu.memory_space<vmem>>
    %96 = tpu.memref_slice %arg10[%c6_i32_49] : memref<8x!tpu.dma_semaphore, #tpu.memory_space<semaphore_mem>> -> memref<1x!tpu.dma_semaphore, #tpu.memory_space<semaphore_mem>>
    %97 = tpu.memref_squeeze %96 : memref<1x!tpu.dma_semaphore, #tpu.memory_space<semaphore_mem>> -> memref<!tpu.dma_semaphore, #tpu.memory_space<semaphore_mem>>
    tpu.wait_dma2 semaphore(%97 : memref<!tpu.dma_semaphore, #tpu.memory_space<semaphore_mem>>) src(%93 : memref<128xf32, #tpu.memory_space<any>>) dst(%95 : memref<128xf32, #tpu.memory_space<vmem>>)
    %c7_i32_52 = arith.constant 7 : i32
    %c7_i32_53 = arith.constant 7 : i32
    %c0_i32_54 = arith.constant 0 : i32
    %98 = tpu.memref_slice %arg1[%49, %c0_i32_54] : memref<20x128xf32, #tpu.memory_space<any>> -> memref<1x128xf32, #tpu.memory_space<any>>
    %99 = tpu.memref_squeeze %98 : memref<1x128xf32, #tpu.memory_space<any>> -> memref<128xf32, #tpu.memory_space<any>>
    %c0_i32_55 = arith.constant 0 : i32
    %100 = tpu.memref_slice %arg9[%c7_i32_52, %c0_i32_55] : memref<8x128xf32, #tpu.memory_space<vmem>> -> memref<1x128xf32, #tpu.memory_space<vmem>>
    %101 = tpu.memref_squeeze %100 : memref<1x128xf32, #tpu.memory_space<vmem>> -> memref<128xf32, #tpu.memory_space<vmem>>
    %102 = tpu.memref_slice %arg10[%c7_i32_53] : memref<8x!tpu.dma_semaphore, #tpu.memory_space<semaphore_mem>> -> memref<1x!tpu.dma_semaphore, #tpu.memory_space<semaphore_mem>>
    %103 = tpu.memref_squeeze %102 : memref<1x!tpu.dma_semaphore, #tpu.memory_space<semaphore_mem>> -> memref<!tpu.dma_semaphore, #tpu.memory_space<semaphore_mem>>
    tpu.wait_dma2 semaphore(%103 : memref<!tpu.dma_semaphore, #tpu.memory_space<semaphore_mem>>) src(%99 : memref<128xf32, #tpu.memory_space<any>>) dst(%101 : memref<128xf32, #tpu.memory_space<vmem>>)
    %c0_56 = arith.constant 0 : index
    %c0_57 = arith.constant 0 : index
    %104 = vector.load %arg9[%c0_56, %c0_57] : memref<8x128xf32, #tpu.memory_space<vmem>>, vector<8x128xf32>
    %c0_58 = arith.constant 0 : index
    %c0_59 = arith.constant 0 : index
    %c0_60 = arith.constant 0 : index
    %105 = vector.load %arg2[%c0_58, %c0_59, %c0_60] : memref<5x8x128xf32, #tpu.memory_space<vmem>>, vector<1x8x128xf32>
    %106 = vector.shape_cast %105 : vector<1x8x128xf32> to vector<8x128xf32>
    %107 = tpu.concatenate %104, %106 in 1 : vector<8x128xf32>, vector<8x128xf32> -> vector<8x256xf32>
    %c0_61 = arith.constant 0 : index
    %c0_62 = arith.constant 0 : index
    %c0_63 = arith.constant 0 : index
    %108 = vector.load %arg3[%c0_61, %c0_62, %c0_63] : memref<5x256x512xf32, #tpu.memory_space<vmem>>, vector<1x256x512xf32>
    %109 = vector.shape_cast %108 : vector<1x256x512xf32> to vector<256x512xf32>
    %cst = arith.constant dense<0.000000e+00> : vector<8x512xf32>
    %110 = tpu.matmul %107, %109, %cst {dimension_numbers = #tpu.dot_dimension_numbers<[1], [0], [0], [1], [0, 0, 1, 1], [], []>} : vector<8x256xf32>, vector<256x512xf32>, vector<8x512xf32> -> vector<8x512xf32>
    %c0_64 = arith.constant 0 : index
    %c0_65 = arith.constant 0 : index
    %c0_66 = arith.constant 0 : index
    %111 = vector.load %arg4[%c0_64, %c0_65, %c0_66] : memref<5x1x512xf32, #tpu.memory_space<vmem>>, vector<1x1x512xf32>
    %112 = vector.shape_cast %111 : vector<1x1x512xf32> to vector<1x512xf32>
    %113 = vector.broadcast %112 : vector<1x512xf32> to vector<8x512xf32>
    %114 = arith.addf %110, %113 : vector<8x512xf32>
    %115 = vector.extract_strided_slice %114 {offsets = [0, 0], sizes = [8, 256], strides = [1, 1]} : vector<8x512xf32> to vector<8x256xf32>
    %116 = arith.negf %115 : vector<8x256xf32>
    %117 = math.exp %116 : vector<8x256xf32>
    %cst_67 = arith.constant 1.000000e+00 : f32
    %118 = vector.broadcast %cst_67 : f32 to vector<8x256xf32>
    %119 = arith.addf %118, %117 : vector<8x256xf32>
    %120 = arith.divf %118, %119 : vector<8x256xf32>
    %121 = vector.extract_strided_slice %120 {offsets = [0, 0], sizes = [8, 128], strides = [1, 1]} : vector<8x256xf32> to vector<8x128xf32>
    %122 = vector.extract_strided_slice %120 {offsets = [0, 128], sizes = [8, 128], strides = [1, 1]} : vector<8x256xf32> to vector<8x128xf32>
    %123 = vector.extract_strided_slice %114 {offsets = [0, 256], sizes = [8, 128], strides = [1, 1]} : vector<8x512xf32> to vector<8x128xf32>
    %124 = vector.extract_strided_slice %114 {offsets = [0, 384], sizes = [8, 128], strides = [1, 1]} : vector<8x512xf32> to vector<8x128xf32>
    %125 = arith.mulf %121, %124 : vector<8x128xf32>
    %126 = arith.addf %123, %125 : vector<8x128xf32>
    %127 = math.tanh %126 : vector<8x128xf32>
    %128 = arith.subf %106, %127 : vector<8x128xf32>
    %129 = arith.mulf %122, %128 : vector<8x128xf32>
    %130 = arith.addf %127, %129 : vector<8x128xf32>
    %c0_68 = arith.constant 0 : index
    %c0_69 = arith.constant 0 : index
    %c0_70 = arith.constant 0 : index
    %131 = vector.load %arg8[%c0_68, %c0_69, %c0_70] : memref<5x8x128xf32, #tpu.memory_space<vmem>>, vector<1x8x128xf32>
    %132 = vector.shape_cast %131 : vector<1x8x128xf32> to vector<8x128xf32>
    %133 = vector.shape_cast %130 : vector<8x128xf32> to vector<1x8x128xf32>
    tpu.vector_store %arg8[%c0_68, %c0_69, %c0_70], %133 {strides = array<i32>} : memref<5x8x128xf32, #tpu.memory_space<vmem>>, vector<1x8x128xf32>,
    %c1_71 = arith.constant 1 : index
    %c0_72 = arith.constant 0 : index
    %c0_73 = arith.constant 0 : index
    %134 = vector.load %arg2[%c1_71, %c0_72, %c0_73] : memref<5x8x128xf32, #tpu.memory_space<vmem>>, vector<1x8x128xf32>
    %135 = vector.shape_cast %134 : vector<1x8x128xf32> to vector<8x128xf32>
    %136 = tpu.concatenate %130, %135 in 1 : vector<8x128xf32>, vector<8x128xf32> -> vector<8x256xf32>
    %c1_74 = arith.constant 1 : index
    %c0_75 = arith.constant 0 : index
    %c0_76 = arith.constant 0 : index
    %137 = vector.load %arg3[%c1_74, %c0_75, %c0_76] : memref<5x256x512xf32, #tpu.memory_space<vmem>>, vector<1x256x512xf32>
    %138 = vector.shape_cast %137 : vector<1x256x512xf32> to vector<256x512xf32>
    %cst_77 = arith.constant dense<0.000000e+00> : vector<8x512xf32>
    %139 = tpu.matmul %136, %138, %cst_77 {dimension_numbers = #tpu.dot_dimension_numbers<[1], [0], [0], [1], [0, 0, 1, 1], [], []>} : vector<8x256xf32>, vector<256x512xf32>, vector<8x512xf32> -> vector<8x512xf32>
    %c1_78 = arith.constant 1 : index
    %c0_79 = arith.constant 0 : index
    %c0_80 = arith.constant 0 : index
    %140 = vector.load %arg4[%c1_78, %c0_79, %c0_80] : memref<5x1x512xf32, #tpu.memory_space<vmem>>, vector<1x1x512xf32>
    %141 = vector.shape_cast %140 : vector<1x1x512xf32> to vector<1x512xf32>
    %142 = vector.broadcast %141 : vector<1x512xf32> to vector<8x512xf32>
    %143 = arith.addf %139, %142 : vector<8x512xf32>
    %144 = vector.extract_strided_slice %143 {offsets = [0, 0], sizes = [8, 256], strides = [1, 1]} : vector<8x512xf32> to vector<8x256xf32>
    %145 = arith.negf %144 : vector<8x256xf32>
    %146 = math.exp %145 : vector<8x256xf32>
    %cst_81 = arith.constant 1.000000e+00 : f32
    %147 = vector.broadcast %cst_81 : f32 to vector<8x256xf32>
    %148 = arith.addf %147, %146 : vector<8x256xf32>
    %149 = arith.divf %147, %148 : vector<8x256xf32>
    %150 = vector.extract_strided_slice %149 {offsets = [0, 0], sizes = [8, 128], strides = [1, 1]} : vector<8x256xf32> to vector<8x128xf32>
    %151 = vector.extract_strided_slice %149 {offsets = [0, 128], sizes = [8, 128], strides = [1, 1]} : vector<8x256xf32> to vector<8x128xf32>
    %152 = vector.extract_strided_slice %143 {offsets = [0, 256], sizes = [8, 128], strides = [1, 1]} : vector<8x512xf32> to vector<8x128xf32>
    %153 = vector.extract_strided_slice %143 {offsets = [0, 384], sizes = [8, 128], strides = [1, 1]} : vector<8x512xf32> to vector<8x128xf32>
    %154 = arith.mulf %150, %153 : vector<8x128xf32>
    %155 = arith.addf %152, %154 : vector<8x128xf32>
    %156 = math.tanh %155 : vector<8x128xf32>
    %157 = arith.subf %135, %156 : vector<8x128xf32>
    %158 = arith.mulf %151, %157 : vector<8x128xf32>
    %159 = arith.addf %156, %158 : vector<8x128xf32>
    %c1_82 = arith.constant 1 : index
    %c0_83 = arith.constant 0 : index
    %c0_84 = arith.constant 0 : index
    %160 = vector.load %arg8[%c1_82, %c0_83, %c0_84] : memref<5x8x128xf32, #tpu.memory_space<vmem>>, vector<1x8x128xf32>
    %161 = vector.shape_cast %160 : vector<1x8x128xf32> to vector<8x128xf32>
    %162 = vector.shape_cast %159 : vector<8x128xf32> to vector<1x8x128xf32>
    tpu.vector_store %arg8[%c1_82, %c0_83, %c0_84], %162 {strides = array<i32>} : memref<5x8x128xf32, #tpu.memory_space<vmem>>, vector<1x8x128xf32>,
    %c2_85 = arith.constant 2 : index
    %c0_86 = arith.constant 0 : index
    %c0_87 = arith.constant 0 : index
    %163 = vector.load %arg2[%c2_85, %c0_86, %c0_87] : memref<5x8x128xf32, #tpu.memory_space<vmem>>, vector<1x8x128xf32>
    %164 = vector.shape_cast %163 : vector<1x8x128xf32> to vector<8x128xf32>
    %165 = tpu.concatenate %159, %164 in 1 : vector<8x128xf32>, vector<8x128xf32> -> vector<8x256xf32>
    %c2_88 = arith.constant 2 : index
    %c0_89 = arith.constant 0 : index
    %c0_90 = arith.constant 0 : index
    %166 = vector.load %arg3[%c2_88, %c0_89, %c0_90] : memref<5x256x512xf32, #tpu.memory_space<vmem>>, vector<1x256x512xf32>
    %167 = vector.shape_cast %166 : vector<1x256x512xf32> to vector<256x512xf32>
    %cst_91 = arith.constant dense<0.000000e+00> : vector<8x512xf32>
    %168 = tpu.matmul %165, %167, %cst_91 {dimension_numbers = #tpu.dot_dimension_numbers<[1], [0], [0], [1], [0, 0, 1, 1], [], []>} : vector<8x256xf32>, vector<256x512xf32>, vector<8x512xf32> -> vector<8x512xf32>
    %c2_92 = arith.constant 2 : index
    %c0_93 = arith.constant 0 : index
    %c0_94 = arith.constant 0 : index
    %169 = vector.load %arg4[%c2_92, %c0_93, %c0_94] : memref<5x1x512xf32, #tpu.memory_space<vmem>>, vector<1x1x512xf32>
    %170 = vector.shape_cast %169 : vector<1x1x512xf32> to vector<1x512xf32>
    %171 = vector.broadcast %170 : vector<1x512xf32> to vector<8x512xf32>
    %172 = arith.addf %168, %171 : vector<8x512xf32>
    %173 = vector.extract_strided_slice %172 {offsets = [0, 0], sizes = [8, 256], strides = [1, 1]} : vector<8x512xf32> to vector<8x256xf32>
    %174 = arith.negf %173 : vector<8x256xf32>
    %175 = math.exp %174 : vector<8x256xf32>
    %cst_95 = arith.constant 1.000000e+00 : f32
    %176 = vector.broadcast %cst_95 : f32 to vector<8x256xf32>
    %177 = arith.addf %176, %175 : vector<8x256xf32>
    %178 = arith.divf %176, %177 : vector<8x256xf32>
    %179 = vector.extract_strided_slice %178 {offsets = [0, 0], sizes = [8, 128], strides = [1, 1]} : vector<8x256xf32> to vector<8x128xf32>
    %180 = vector.extract_strided_slice %178 {offsets = [0, 128], sizes = [8, 128], strides = [1, 1]} : vector<8x256xf32> to vector<8x128xf32>
    %181 = vector.extract_strided_slice %172 {offsets = [0, 256], sizes = [8, 128], strides = [1, 1]} : vector<8x512xf32> to vector<8x128xf32>
    %182 = vector.extract_strided_slice %172 {offsets = [0, 384], sizes = [8, 128], strides = [1, 1]} : vector<8x512xf32> to vector<8x128xf32>
    %183 = arith.mulf %179, %182 : vector<8x128xf32>
    %184 = arith.addf %181, %183 : vector<8x128xf32>
    %185 = math.tanh %184 : vector<8x128xf32>
    %186 = arith.subf %164, %185 : vector<8x128xf32>
    %187 = arith.mulf %180, %186 : vector<8x128xf32>
    %188 = arith.addf %185, %187 : vector<8x128xf32>
    %c2_96 = arith.constant 2 : index
    %c0_97 = arith.constant 0 : index
    %c0_98 = arith.constant 0 : index
    %189 = vector.load %arg8[%c2_96, %c0_97, %c0_98] : memref<5x8x128xf32, #tpu.memory_space<vmem>>, vector<1x8x128xf32>
    %190 = vector.shape_cast %189 : vector<1x8x128xf32> to vector<8x128xf32>
    %191 = vector.shape_cast %188 : vector<8x128xf32> to vector<1x8x128xf32>
    tpu.vector_store %arg8[%c2_96, %c0_97, %c0_98], %191 {strides = array<i32>} : memref<5x8x128xf32, #tpu.memory_space<vmem>>, vector<1x8x128xf32>,
    %c3_99 = arith.constant 3 : index
    %c0_100 = arith.constant 0 : index
    %c0_101 = arith.constant 0 : index
    %192 = vector.load %arg2[%c3_99, %c0_100, %c0_101] : memref<5x8x128xf32, #tpu.memory_space<vmem>>, vector<1x8x128xf32>
    %193 = vector.shape_cast %192 : vector<1x8x128xf32> to vector<8x128xf32>
    %194 = tpu.concatenate %188, %193 in 1 : vector<8x128xf32>, vector<8x128xf32> -> vector<8x256xf32>
    %c3_102 = arith.constant 3 : index
    %c0_103 = arith.constant 0 : index
    %c0_104 = arith.constant 0 : index
    %195 = vector.load %arg3[%c3_102, %c0_103, %c0_104] : memref<5x256x512xf32, #tpu.memory_space<vmem>>, vector<1x256x512xf32>
    %196 = vector.shape_cast %195 : vector<1x256x512xf32> to vector<256x512xf32>
    %cst_105 = arith.constant dense<0.000000e+00> : vector<8x512xf32>
    %197 = tpu.matmul %194, %196, %cst_105 {dimension_numbers = #tpu.dot_dimension_numbers<[1], [0], [0], [1], [0, 0, 1, 1], [], []>} : vector<8x256xf32>, vector<256x512xf32>, vector<8x512xf32> -> vector<8x512xf32>
    %c3_106 = arith.constant 3 : index
    %c0_107 = arith.constant 0 : index
    %c0_108 = arith.constant 0 : index
    %198 = vector.load %arg4[%c3_106, %c0_107, %c0_108] : memref<5x1x512xf32, #tpu.memory_space<vmem>>, vector<1x1x512xf32>
    %199 = vector.shape_cast %198 : vector<1x1x512xf32> to vector<1x512xf32>
    %200 = vector.broadcast %199 : vector<1x512xf32> to vector<8x512xf32>
    %201 = arith.addf %197, %200 : vector<8x512xf32>
    %202 = vector.extract_strided_slice %201 {offsets = [0, 0], sizes = [8, 256], strides = [1, 1]} : vector<8x512xf32> to vector<8x256xf32>
    %203 = arith.negf %202 : vector<8x256xf32>
    %204 = math.exp %203 : vector<8x256xf32>
    %cst_109 = arith.constant 1.000000e+00 : f32
    %205 = vector.broadcast %cst_109 : f32 to vector<8x256xf32>
    %206 = arith.addf %205, %204 : vector<8x256xf32>
    %207 = arith.divf %205, %206 : vector<8x256xf32>
    %208 = vector.extract_strided_slice %207 {offsets = [0, 0], sizes = [8, 128], strides = [1, 1]} : vector<8x256xf32> to vector<8x128xf32>
    %209 = vector.extract_strided_slice %207 {offsets = [0, 128], sizes = [8, 128], strides = [1, 1]} : vector<8x256xf32> to vector<8x128xf32>
    %210 = vector.extract_strided_slice %201 {offsets = [0, 256], sizes = [8, 128], strides = [1, 1]} : vector<8x512xf32> to vector<8x128xf32>
    %211 = vector.extract_strided_slice %201 {offsets = [0, 384], sizes = [8, 128], strides = [1, 1]} : vector<8x512xf32> to vector<8x128xf32>
    %212 = arith.mulf %208, %211 : vector<8x128xf32>
    %213 = arith.addf %210, %212 : vector<8x128xf32>
    %214 = math.tanh %213 : vector<8x128xf32>
    %215 = arith.subf %193, %214 : vector<8x128xf32>
    %216 = arith.mulf %209, %215 : vector<8x128xf32>
    %217 = arith.addf %214, %216 : vector<8x128xf32>
    %c3_110 = arith.constant 3 : index
    %c0_111 = arith.constant 0 : index
    %c0_112 = arith.constant 0 : index
    %218 = vector.load %arg8[%c3_110, %c0_111, %c0_112] : memref<5x8x128xf32, #tpu.memory_space<vmem>>, vector<1x8x128xf32>
    %219 = vector.shape_cast %218 : vector<1x8x128xf32> to vector<8x128xf32>
    %220 = vector.shape_cast %217 : vector<8x128xf32> to vector<1x8x128xf32>
    tpu.vector_store %arg8[%c3_110, %c0_111, %c0_112], %220 {strides = array<i32>} : memref<5x8x128xf32, #tpu.memory_space<vmem>>, vector<1x8x128xf32>,
    %c4_113 = arith.constant 4 : index
    %c0_114 = arith.constant 0 : index
    %c0_115 = arith.constant 0 : index
    %221 = vector.load %arg2[%c4_113, %c0_114, %c0_115] : memref<5x8x128xf32, #tpu.memory_space<vmem>>, vector<1x8x128xf32>
    %222 = vector.shape_cast %221 : vector<1x8x128xf32> to vector<8x128xf32>
    %223 = tpu.concatenate %217, %222 in 1 : vector<8x128xf32>, vector<8x128xf32> -> vector<8x256xf32>
    %c4_116 = arith.constant 4 : index
    %c0_117 = arith.constant 0 : index
    %c0_118 = arith.constant 0 : index
    %224 = vector.load %arg3[%c4_116, %c0_117, %c0_118] : memref<5x256x512xf32, #tpu.memory_space<vmem>>, vector<1x256x512xf32>
    %225 = vector.shape_cast %224 : vector<1x256x512xf32> to vector<256x512xf32>
    %cst_119 = arith.constant dense<0.000000e+00> : vector<8x512xf32>
    %226 = tpu.matmul %223, %225, %cst_119 {dimension_numbers = #tpu.dot_dimension_numbers<[1], [0], [0], [1], [0, 0, 1, 1], [], []>} : vector<8x256xf32>, vector<256x512xf32>, vector<8x512xf32> -> vector<8x512xf32>
    %c4_120 = arith.constant 4 : index
    %c0_121 = arith.constant 0 : index
    %c0_122 = arith.constant 0 : index
    %227 = vector.load %arg4[%c4_120, %c0_121, %c0_122] : memref<5x1x512xf32, #tpu.memory_space<vmem>>, vector<1x1x512xf32>
    %228 = vector.shape_cast %227 : vector<1x1x512xf32> to vector<1x512xf32>
    %229 = vector.broadcast %228 : vector<1x512xf32> to vector<8x512xf32>
    %230 = arith.addf %226, %229 : vector<8x512xf32>
    %231 = vector.extract_strided_slice %230 {offsets = [0, 0], sizes = [8, 256], strides = [1, 1]} : vector<8x512xf32> to vector<8x256xf32>
    %232 = arith.negf %231 : vector<8x256xf32>
    %233 = math.exp %232 : vector<8x256xf32>
    %cst_123 = arith.constant 1.000000e+00 : f32
    %234 = vector.broadcast %cst_123 : f32 to vector<8x256xf32>
    %235 = arith.addf %234, %233 : vector<8x256xf32>
    %236 = arith.divf %234, %235 : vector<8x256xf32>
    %237 = vector.extract_strided_slice %236 {offsets = [0, 0], sizes = [8, 128], strides = [1, 1]} : vector<8x256xf32> to vector<8x128xf32>
    %238 = vector.extract_strided_slice %236 {offsets = [0, 128], sizes = [8, 128], strides = [1, 1]} : vector<8x256xf32> to vector<8x128xf32>
    %239 = vector.extract_strided_slice %230 {offsets = [0, 256], sizes = [8, 128], strides = [1, 1]} : vector<8x512xf32> to vector<8x128xf32>
    %240 = vector.extract_strided_slice %230 {offsets = [0, 384], sizes = [8, 128], strides = [1, 1]} : vector<8x512xf32> to vector<8x128xf32>
    %241 = arith.mulf %237, %240 : vector<8x128xf32>
    %242 = arith.addf %239, %241 : vector<8x128xf32>
    %243 = math.tanh %242 : vector<8x128xf32>
    %244 = arith.subf %222, %243 : vector<8x128xf32>
    %245 = arith.mulf %238, %244 : vector<8x128xf32>
    %246 = arith.addf %243, %245 : vector<8x128xf32>
    %c4_124 = arith.constant 4 : index
    %c0_125 = arith.constant 0 : index
    %c0_126 = arith.constant 0 : index
    %247 = vector.load %arg8[%c4_124, %c0_125, %c0_126] : memref<5x8x128xf32, #tpu.memory_space<vmem>>, vector<1x8x128xf32>
    %248 = vector.shape_cast %247 : vector<1x8x128xf32> to vector<8x128xf32>
    %249 = vector.shape_cast %246 : vector<8x128xf32> to vector<1x8x128xf32>
    tpu.vector_store %arg8[%c4_124, %c0_125, %c0_126], %249 {strides = array<i32>} : memref<5x8x128xf32, #tpu.memory_space<vmem>>, vector<1x8x128xf32>,
    %c0_127 = arith.constant 0 : index
    %c0_128 = arith.constant 0 : index
    %250 = vector.load %arg5[%c0_127, %c0_128] : memref<128x128xf32, #tpu.memory_space<vmem>>, vector<128x128xf32>
    %cst_129 = arith.constant dense<0.000000e+00> : vector<8x128xf32>
    %251 = tpu.matmul %246, %250, %cst_129 {dimension_numbers = #tpu.dot_dimension_numbers<[1], [0], [0], [1], [0, 0, 1, 1], [], []>} : vector<8x128xf32>, vector<128x128xf32>, vector<8x128xf32> -> vector<8x128xf32>
    %c0_130 = arith.constant 0 : index
    %c0_131 = arith.constant 0 : index
    %252 = vector.load %arg6[%c0_130, %c0_131] : memref<1x128xf32, #tpu.memory_space<vmem>>, vector<1x128xf32>
    %253 = vector.broadcast %252 : vector<1x128xf32> to vector<8x128xf32>
    %254 = arith.addf %251, %253 : vector<8x128xf32>
    %c0_132 = arith.constant 0 : index
    %c0_133 = arith.constant 0 : index
    %255 = vector.load %arg7[%c0_132, %c0_133] : memref<8x128xf32, #tpu.memory_space<vmem>>, vector<8x128xf32>
    tpu.vector_store %arg7[%c0_132, %c0_133], %254 {strides = array<i32>} : memref<8x128xf32, #tpu.memory_space<vmem>>, vector<8x128xf32>,
    return
  }
}

</mosaic_0001>

<bundles_post_ra>
// kernel: tpu_custom_call.1
= control target key start
LH: loop header
LB: loop body
LE: loop exit
PB: predicated region body
PF: predicated region fallthrough
CT: control target
= control target key end

     0   :  { %14 = vsyncpa [#allocation7], 0  ;;  %s2977_s0 = inlined_call_operand.hbm [shape: s32[8], index: 0, kind: input, shape index: {}]   ;;  %s2978_s1 = inlined_call_operand.hbm [shape: f32[20,128], index: 1, kind: input, shape index: {}]   ;;  %s2979_s2 = inlined_call_operand.hbm [shape: f32[5,8,128], index: 2, kind: input, shape index: {}]   ;;  %s2980_s3 = inlined_call_operand.hbm [shape: f32[5,256,512], index: 3, kind: input, shape index: {}]   ;;  %s2981_s4 = inlined_call_operand.hbm [shape: f32[5,1,512], index: 4, kind: input, shape index: {}]   ;;  %s2982_s5 = inlined_call_operand.hbm [shape: f32[128,128], index: 5, kind: input, shape index: {}]   ;;  %s2983_s6 = inlined_call_operand.hbm [shape: f32[1,128], index: 6, kind: input, shape index: {}]   ;;  %s2984_s7 = inlined_call_operand.hbm [shape: f32[8,128], index: 7, kind: output, shape index: {0}]   ;;  %s2985_s8 = inlined_call_operand.hbm [shape: f32[5,8,128], index: 8, kind: output, shape index: {1}]  }
   0x1   :  { %15 = vsyncpa [#allocation5], 0 }
   0x2   :  { %16 = vsyncpa [#allocation10], 0 }
   0x3   :  { %17 = vsyncpa [#allocation13], 0 }
   0x4   :  { %18 = vsyncpa [#allocation6], 0  ;;  %s46_s29 = sshll.u32 %s2980_s3, 4  ;;  %s47_s29 = int_to_ptr.hbm [resolvable:$true] %s46_s29 }
   0x5   :  { %19 = vsyncpa [#allocation17], 0  ;;  %s2644_s30 = smov [#allocation9]   ;;  %s2645_s10 = smov 512  }
   0x6   :  { %s48_s9 = sshll.u32 %s2644_s30, 4  ;;  %s2646_s11 = smov 32   ;;  %s49_s9 = int_to_ptr.vmem [resolvable:$true] %s48_s9 }
   0x7   :  { %54 = dma.hbm_to_vmem [thread:$0]  %s47_s29, 81920, %s49_s9, [#allocation10], %s2645_s10, %s2645_s10, %s2646_s11  }
   0x8   :  { %s72_s14 = sshll.u32 %s2982_s5, 4  ;;  %s2647_s15 = smov [#allocation12]   ;;  %s73_s14 = int_to_ptr.hbm [resolvable:$true] %s72_s14 }
   0x9   :  { %s74_s16 = sshll.u32 %s2647_s15, 4  ;;  %s25_s19 = sshll.u32 %s2977_s0, 4  ;;  %s75_s16 = int_to_ptr.vmem [resolvable:$true] %s74_s16  ;;  %s26_s19 = int_to_ptr.hbm [resolvable:$true] %s25_s19 }
   0xa   :  { %s2648_s3 = smov 128   ;;  %s2649_s20 = smov 8  }
   0xb   :  { %80 = dma.hbm_to_vmem [thread:$0]  %s73_s14, 2048, %s75_s16, [#allocation13], %s2648_s3, %s2648_s3, %s2649_s20  }
   0xc   :  { %s33_s23 = sshll.u32 %s2979_s2, 4  ;;  %s2650_s5 = smov [#allocation4]   ;;  %s34_s23 = int_to_ptr.hbm [resolvable:$true] %s33_s23 }
   0xd   :  { %28 = dma.hbm_to_smem %s26_s19, 16, %s2650_s5, [#allocation7]  }
   0xe   :  { %s2651_s24 = smov [#allocation8]   ;;  %s59_s0 = sshll.u32 %s2981_s4, 4  ;;  %s60_s0 = int_to_ptr.hbm [resolvable:$true] %s59_s0 }
   0xf   :  { %s35_s25 = sshll.u32 %s2651_s24, 4  ;;  %s2652_s28 = smov [#allocation11]   ;;  %s36_s25 = int_to_ptr.vmem [resolvable:$true] %s35_s25 }
  0x10   :  { %41 = dma.hbm_to_vmem [thread:$0]  %s34_s23, 640, %s36_s25, [#allocation5], %s2648_s3, %s2648_s3, %s2649_s20  }
  0x11   :  { %s61_s29 = sshll.u32 %s2652_s28, 4  ;;  %s86_s9 = sshll.u32 %s2983_s6, 4  ;;  %s62_s29 = int_to_ptr.vmem [resolvable:$true] %s61_s29  ;;  %s87_s9 = int_to_ptr.hbm [resolvable:$true] %s86_s9 }
  0x12   :  { %s2653_s10 = smov 64   ;;  %s2654_s11 = smov 4  }
  0x13   :  { %67 = dma.hbm_to_vmem [thread:$0]  %s60_s0, 320, %s62_s29, [#allocation10], %s2653_s10, %s2653_s10, %s2654_s11  }
  0x14   :  { %s2655_s12 = smov [#allocation14]  }
  0x15   :  { %s88_s13 = sshll.u32 %s2655_s12, 4  ;;  %s89_s13 = int_to_ptr.vmem [resolvable:$true] %s88_s13 }
  0x16   :  { %91 = dma.hbm_to_vmem [thread:$0]  %s87_s9, 16, %s89_s13, [#allocation13]  }
  0x17   :  { %2616 = dma.done.wait [#allocation7], 16  }
  0x18   :  { %2617 = vsyncadd [#allocation7], 4294967280 }
  0x19   :  { %2618 = dma.done.wait [#allocation5], 640  }
  0x1a   :  { %2619 = vsyncadd [#allocation5], 4294966656 }
  0x1b   :  { %2620 = dma.done.wait [#allocation10], 82240  }
  0x1c   :  { %2621 = vsyncadd [#allocation10], 4294885056 }
  0x1d   :  { %2622 = dma.done.wait [#allocation13], 2064  }
  0x1e   :  { %2623 = vsyncadd [#allocation13], 4294965232 }
  0x1f   :  { %116 = sfence }
  0x20   :  { %s117_s4 = sld [smem:[#allocation4]]  ;;  %s2656_s14 = smov [#allocation2]  }
  0x21   :  { %s128_s6 = sshll.u32 %s2656_s14, 4  ;;  %s2146_s15 = sld [smem:[#allocation4 + $0x1]]  ;;  %s129_s6 = int_to_ptr.vmem [resolvable:$true] %s128_s6 }
  0x22   :  { %s2657_s16 = smov [#allocation2 + $0x1]   ;;  %s2737_s18 = sld [smem:[#allocation4 + $0x2]] }
  0x23   :  { %s2735_s17 = sshll.u32 %s2657_s16, 4  ;;  %s2658_s19 = smov [#allocation2 + $0x2]   ;;  %s146_s17 = int_to_ptr.vmem [resolvable:$true] %s2735_s17 }
  0x24   :  { %s2740_s21 = sshll.u32 %s2658_s19, 4  ;;  %s2742_s22 = sld [smem:[#allocation4 + $0x3]]  ;;  %s163_s21 = int_to_ptr.vmem [resolvable:$true] %s2740_s21 }
  0x25   :  { %s2754_s10 = scalar_lea.hbm %s2978_s1, 24 }
  0x26   :  { %s118_s24 = scalar_lea.hbm %s2978_s1, %s117_s4 }
  0x27   :  { %s126_s25 = sshll.u32 %s118_s24, 4  ;;  %s133_s0 = scalar_lea.hbm %s2978_s1, %s2146_s15  ;;  %s127_s25 = int_to_ptr.hbm [resolvable:$true] %s126_s25 }
  0x28   :  { %s143_s28 = sshll.u32 %s133_s0, 4  ;;  %s2376_s29 = sshra.s32 %s127_s25, 4  ;;  %s2377_s29 = int_to_ptr.hbm [resolvable:$true] %s2376_s29  ;;  %s144_s28 = int_to_ptr.hbm [resolvable:$true] %s143_s28 }
  0x29   :  { %s2378_s30 = scalar_lea.hbm %s2377_s29, 1  ;;  %p2381_p1 = scmp.lt.s32.totalorder %s2377_s29, %s2978_s1 }
  0x2a   :  { %p2379_p0 = scmp.ne.s32.totalorder %s2377_s29, %s2378_s30  ;;  %p2382_p2 = scmp.lt.s32.totalorder %s2754_s10, %s2378_s30 }
  0x2c   :  { %p2383_p3 = por %p2382_p2, %p2381_p1 }
  0x2e   :  { %p2384_p4 = pnand %p2383_p3, %p2379_p0 }
  0x30   :  { %2387 = shalt.err (!%p2384_p4)  }
  0x31   :  { %131 = dma.hbm_to_vmem [thread:$0]  %s127_s25, 16, %s129_s6, [#allocation3] }
  0x32   :  { %s150_s14 = scalar_lea.hbm %s2978_s1, %s2737_s18  ;;  %s2400_s15 = sshra.s32 %s144_s28, 4  ;;  %s2401_s15 = int_to_ptr.hbm [resolvable:$true] %s2400_s15 }
  0x33   :  { %s2402_s16 = scalar_lea.hbm %s2401_s15, 1  ;;  %p2405_p6 = scmp.lt.s32.totalorder %s2401_s15, %s2978_s1 }
  0x34   :  { %p2403_p5 = scmp.ne.s32.totalorder %s2401_s15, %s2402_s16  ;;  %p2406_p7 = scmp.lt.s32.totalorder %s2754_s10, %s2402_s16 }
  0x36   :  { %p2407_p8 = por %p2406_p7, %p2405_p6 }
  0x38   :  { %p2408_p9 = pnand %p2407_p8, %p2403_p5 }
  0x3a   :  { %2411 = shalt.err (!%p2408_p9)  }
  0x3b   :  { %148 = dma.hbm_to_vmem [thread:$0]  %s144_s28, 16, %s146_s17, [#allocation3 + $0x1] }
  0x3c   :  { %s160_s6 = sshll.u32 %s150_s14, 4  ;;  %s167_s24 = scalar_lea.hbm %s2978_s1, %s2742_s22  ;;  %s161_s6 = int_to_ptr.hbm [resolvable:$true] %s160_s6 }
  0x3d   :  { %s177_s25 = sshll.u32 %s167_s24, 4  ;;  %s2424_s26 = sshra.s32 %s161_s6, 4  ;;  %s2425_s26 = int_to_ptr.hbm [resolvable:$true] %s2424_s26  ;;  %s178_s25 = int_to_ptr.hbm [resolvable:$true] %s177_s25 }
  0x3e   :  { %s2426_s27 = scalar_lea.hbm %s2425_s26, 1  ;;  %p2429_p11 = scmp.lt.s32.totalorder %s2425_s26, %s2978_s1 }
  0x3f   :  { %p2427_p10 = scmp.ne.s32.totalorder %s2425_s26, %s2426_s27  ;;  %p2430_p12 = scmp.lt.s32.totalorder %s2754_s10, %s2426_s27 }
  0x41   :  { %p2431_p13 = por %p2430_p12, %p2429_p11 }
  0x43   :  { %p2432_p0 = pnand %p2431_p13, %p2427_p10 }
  0x45   :  { %2435 = shalt.err (!%p2432_p0)  }
  0x46   :  { %165 = dma.hbm_to_vmem [thread:$0]  %s161_s6, 16, %s163_s21, [#allocation3 + $0x2] }
  0x47   :  { %s2659_s17 = smov [#allocation2 + $0x3]   ;;  %s2149_s28 = sld [smem:[#allocation4 + $0x4]] }
  0x48   :  { %s179_s22 = sshll.u32 %s2659_s17, 4  ;;  %s2448_s30 = sshra.s32 %s178_s25, 4  ;;  %s180_s22 = int_to_ptr.vmem [resolvable:$true] %s179_s22  ;;  %s2449_s30 = int_to_ptr.hbm [resolvable:$true] %s2448_s30 }
  0x49   :  { %s2450_s2 = scalar_lea.hbm %s2449_s30, 1  ;;  %p2453_p2 = scmp.lt.s32.totalorder %s2449_s30, %s2978_s1 }
  0x4a   :  { %p2451_p1 = scmp.ne.s32.totalorder %s2449_s30, %s2450_s2  ;;  %p2454_p3 = scmp.lt.s32.totalorder %s2754_s10, %s2450_s2 }
  0x4c   :  { %p2455_p4 = por %p2454_p3, %p2453_p2 }
  0x4e   :  { %p2456_p5 = pnand %p2455_p4, %p2451_p1 }
  0x50   :  { %2459 = shalt.err (!%p2456_p5)  }
  0x51   :  { %182 = dma.hbm_to_vmem [thread:$0]  %s178_s25, 16, %s180_s22, [#allocation3 + $0x3] }
  0x52   :  { %s2660_s12 = smov [#allocation2 + $0x4]   ;;  %s2150_s13 = sld [smem:[#allocation4 + $0x5]] }
  0x53   :  { %s196_s21 = sshll.u32 %s2660_s12, 4  ;;  %s2661_s4 = smov [#allocation2 + $0x5]   ;;  %s197_s21 = int_to_ptr.vmem [resolvable:$true] %s196_s21 }
  0x54   :  { %s2784_s14 = sshll.u32 %s2661_s4, 4  ;;  %s2151_s15 = sld [smem:[#allocation4 + $0x6]]  ;;  %s214_s14 = int_to_ptr.vmem [resolvable:$true] %s2784_s14 }
  0x55   :  { %s184_s23 = scalar_lea.hbm %s2978_s1, %s2149_s28  ;;  %s2662_s5 = smov [#allocation2 + $0x6]  }
  0x56   :  { %s194_s6 = sshll.u32 %s184_s23, 4  ;;  %s2790_s18 = sshll.u32 %s2662_s5, 4  ;;  %s195_s6 = int_to_ptr.hbm [resolvable:$true] %s194_s6  ;;  %s231_s18 = int_to_ptr.vmem [resolvable:$true] %s2790_s18 }
  0x57   :  { %s2472_s24 = sshra.s32 %s195_s6, 4  ;;  %s2473_s24 = int_to_ptr.hbm [resolvable:$true] %s2472_s24 }
  0x58   :  { %s2474_s25 = scalar_lea.hbm %s2473_s24, 1  ;;  %p2477_p7 = scmp.lt.s32.totalorder %s2473_s24, %s2978_s1 }
  0x59   :  { %p2475_p6 = scmp.ne.s32.totalorder %s2473_s24, %s2474_s25  ;;  %p2478_p8 = scmp.lt.s32.totalorder %s2754_s10, %s2474_s25 }
  0x5b   :  { %p2479_p9 = por %p2478_p8, %p2477_p7 }
  0x5d   :  { %p2480_p10 = pnand %p2479_p9, %p2475_p6 }
  0x5f   :  { %2483 = shalt.err (!%p2480_p10)  }
  0x60   :  { %199 = dma.hbm_to_vmem [thread:$0]  %s195_s6, 16, %s197_s21, [#allocation3 + $0x4] }
  0x61   :  { %s201_s17 = scalar_lea.hbm %s2978_s1, %s2150_s13  ;;  %s218_s2 = scalar_lea.hbm %s2978_s1, %s2151_s15 }
  0x62   :  { %s211_s22 = sshll.u32 %s201_s17, 4  ;;  %s228_s9 = sshll.u32 %s218_s2, 4  ;;  %s212_s22 = int_to_ptr.hbm [resolvable:$true] %s211_s22  ;;  %s229_s9 = int_to_ptr.hbm [resolvable:$true] %s228_s9 }
  0x63   :  { %s2496_s11 = sshra.s32 %s212_s22, 4  ;;  %s2497_s11 = int_to_ptr.hbm [resolvable:$true] %s2496_s11 }
  0x64   :  { %s2498_s12 = scalar_lea.hbm %s2497_s11, 1  ;;  %p2501_p12 = scmp.lt.s32.totalorder %s2497_s11, %s2978_s1 }
  0x65   :  { %p2499_p11 = scmp.ne.s32.totalorder %s2497_s11, %s2498_s12  ;;  %p2502_p13 = scmp.lt.s32.totalorder %s2754_s10, %s2498_s12 }
  0x67   :  { %p2503_p0 = por %p2502_p13, %p2501_p12 }
  0x69   :  { %p2504_p1 = pnand %p2503_p0, %p2499_p11 }
  0x6b   :  { %2507 = shalt.err (!%p2504_p1)  }
  0x6c   :  { %216 = dma.hbm_to_vmem [thread:$0]  %s212_s22, 16, %s214_s14, [#allocation3 + $0x5] }
  0x6d   :  { %s2152_s13 = sld [smem:[#allocation4 + $0x7]]  ;;  %s2520_s15 = sshra.s32 %s229_s9, 4  ;;  %s2521_s15 = int_to_ptr.hbm [resolvable:$true] %s2520_s15 }
  0x6e   :  { %s2522_s16 = scalar_lea.hbm %s2521_s15, 1  ;;  %p2525_p3 = scmp.lt.s32.totalorder %s2521_s15, %s2978_s1 }
  0x6f   :  { %p2523_p2 = scmp.ne.s32.totalorder %s2521_s15, %s2522_s16  ;;  %p2526_p4 = scmp.lt.s32.totalorder %s2754_s10, %s2522_s16 }
  0x71   :  { %p2527_p5 = por %p2526_p4, %p2525_p3 }
  0x73   :  { %p2528_p6 = pnand %p2527_p5, %p2523_p2 }
  0x75   :  { %2531 = shalt.err (!%p2528_p6)  }
  0x76   :  { %233 = dma.hbm_to_vmem [thread:$0]  %s229_s9, 16, %s231_s18, [#allocation3 + $0x6] }
  0x77   :  { %s2663_s6 = smov [#allocation2 + $0x7]   ;;  %s235_s25 = scalar_lea.hbm %s2978_s1, %s2152_s13 }
  0x78   :  { %s247_s5 = sshll.u32 %s2663_s6, 4  ;;  %s245_s26 = sshll.u32 %s235_s25, 4  ;;  %s248_s5 = int_to_ptr.vmem [resolvable:$true] %s247_s5  ;;  %s246_s26 = int_to_ptr.hbm [resolvable:$true] %s245_s26 }
  0x79   :  { %s2544_s27 = sshra.s32 %s246_s26, 4  ;;  %s2545_s27 = int_to_ptr.hbm [resolvable:$true] %s2544_s27 }
  0x7a   :  { %s2546_s0 = scalar_lea.hbm %s2545_s27, 1  ;;  %p2549_p8 = scmp.lt.s32.totalorder %s2545_s27, %s2978_s1 }
  0x7b   :  { %p2547_p7 = scmp.ne.s32.totalorder %s2545_s27, %s2546_s0  ;;  %p2550_p9 = scmp.lt.s32.totalorder %s2754_s10, %s2546_s0 }
  0x7d   :  { %p2551_p10 = por %p2550_p9, %p2549_p8 }
  0x7f   :  { %p2552_p11 = pnand %p2551_p10, %p2547_p7 }
  0x81   :  { %2555 = shalt.err (!%p2552_p11)  }
  0x82   :  { %250 = dma.hbm_to_vmem [thread:$0]  %s246_s26, 16, %s248_s5, [#allocation3 + $0x7] }
  0x83   :  { %2624 = dma.done.wait [#allocation3], 16 }
  0x84   :  { %2625 = vsyncadd [#allocation3], 4294967280 }
  0x85   :  { %2626 = dma.done.wait [#allocation3 + $0x1], 16 }
  0x86   :  { %2627 = vsyncadd [#allocation3 + $0x1], 4294967280 }
  0x87   :  { %2628 = dma.done.wait [#allocation3 + $0x2], 16 }
  0x88   :  { %2629 = vsyncadd [#allocation3 + $0x2], 4294967280 }
  0x89   :  { %2630 = dma.done.wait [#allocation3 + $0x3], 16 }
  0x8a   :  { %2631 = vsyncadd [#allocation3 + $0x3], 4294967280 }
  0x8b   :  { %2632 = dma.done.wait [#allocation3 + $0x4], 16 }
  0x8c   :  { %2633 = vsyncadd [#allocation3 + $0x4], 4294967280 }
  0x8d   :  { %2634 = dma.done.wait [#allocation3 + $0x5], 16 }
  0x8e   :  { %2635 = vsyncadd [#allocation3 + $0x5], 4294967280 }
  0x8f   :  { %2636 = dma.done.wait [#allocation3 + $0x6], 16 }
  0x90   :  { %2637 = vsyncadd [#allocation3 + $0x6], 4294967280 }
  0x91   :  { %2638 = dma.done.wait [#allocation3 + $0x7], 16 }
  0x92   :  { %2639 = vsyncadd [#allocation3 + $0x7], 4294967280  ;;  %v329_v0 = vld [vmem:[#allocation9 + $0x1e0] sm:$0xff]  ;;  %v330_v1 = vld [vmem:[#allocation9 + $0x1e8] sm:$0xff]  ;;  %s2664_s1 = smov [#allocation16]   ;;  %s2062_s28 = sshll.u32 %s2985_s8, 4  ;;  %s2063_s28 = int_to_ptr.hbm [resolvable:$true] %s2062_s28 }
  0x93   :  { %v325_v2 = vld [vmem:[#allocation9 + $0x1c0] sm:$0xff]  ;;  %407 = vmatpush.msra.mxu0 %v329_v0  ;;  %447 = vmatpush.msra.mxu2 %v330_v1  ;;  %v326_v4 = vld [vmem:[#allocation9 + $0x1c8] sm:$0xff]  ;;  %v2820_v62 = vld [vmem:[#allocation2] sm:$0xff]  ;;  %s2060_s10 = sshll.u32 %s2664_s1, 4  ;;  %s2665_s30 = smov [#allocation15]   ;;  %s2061_s10 = int_to_ptr.vmem [resolvable:$true] %s2060_s10 }
  0x94   :  { %v393_v3 = vld [vmem:[#allocation9 + $0x3e0] sm:$0xff]  ;;  %v394_v5 = vld [vmem:[#allocation9 + $0x3e8] sm:$0xff]  ;;  %v332_v63 = vld [vmem:[#allocation9 + $0x1f8] sm:$0xff]  ;;  %s2050_s2 = sshll.u32 %s2665_s30, 4  ;;  %s2052_s12 = sshll.u32 %s2984_s7, 4  ;;  %s2051_s2 = int_to_ptr.vmem [resolvable:$true] %s2050_s2  ;;  %s2053_s12 = int_to_ptr.hbm [resolvable:$true] %s2052_s12 }
  0x95   :  { %427 = vmatpush.msra.mxu1 %v393_v3  ;;  %467 = vmatpush.msra.mxu3 %v394_v5  ;;  %v321_v6 = vld [vmem:[#allocation9 + $0x1a0] sm:$0xff]  ;;  %v322_v8 = vld [vmem:[#allocation9 + $0x1a8] sm:$0xff]  ;;  %v328_v3 = vld [vmem:[#allocation9 + $0x1d8] sm:$0xff] }
  0x96   :  { %v389_v7 = vld [vmem:[#allocation9 + $0x3c0] sm:$0xff]  ;;  %408 = vmatpush.msra.mxu0 %v325_v2  ;;  %448 = vmatpush.msra.mxu2 %v326_v4  ;;  %v390_v9 = vld [vmem:[#allocation9 + $0x3c8] sm:$0xff]  ;;  %v2822_v2 = vld [vmem:[#allocation8] sm:$0xff] }
  0x97   :  { %v385_v10 = vld [vmem:[#allocation9 + $0x3a0] sm:$0xff]  ;;  %428 = vmatpush.msra.mxu1 %v389_v7  ;;  %468 = vmatpush.msra.mxu3 %v390_v9  ;;  %v318_v12 = vld [vmem:[#allocation9 + $0x188] sm:$0xff]  ;;  %v396_v4 = vld [vmem:[#allocation9 + $0x3f8] sm:$0xff] }
  0x98   :  { %v317_v11 = vld [vmem:[#allocation9 + $0x180] sm:$0xff]  ;;  %v386_v13 = vld [vmem:[#allocation9 + $0x3a8] sm:$0xff]  ;;  %409 = vmatpush.msra.mxu0 %v321_v6  ;;  %449 = vmatpush.msra.mxu2 %v322_v8  ;;  %v324_v5 = vld [vmem:[#allocation9 + $0x1b8] sm:$0xff] }
  0x99   :  { %v381_v14 = vld [vmem:[#allocation9 + $0x380] sm:$0xff]  ;;  %v382_v15 = vld [vmem:[#allocation9 + $0x388] sm:$0xff]  ;;  %429 = vmatpush.msra.mxu1 %v385_v10  ;;  %469 = vmatpush.msra.mxu3 %v386_v13  ;;  %v392_v6 = vld [vmem:[#allocation9 + $0x3d8] sm:$0xff] }
  0x9a   :  { %v313_v16 = vld [vmem:[#allocation9 + $0x160] sm:$0xff]  ;;  %v314_v17 = vld [vmem:[#allocation9 + $0x168] sm:$0xff]  ;;  %410 = vmatpush.msra.mxu0 %v317_v11  ;;  %450 = vmatpush.msra.mxu2 %v318_v12  ;;  %v331_v7 = vld [vmem:[#allocation9 + $0x1f0] sm:$0xff] }
  0x9b   :  { %v377_v18 = vld [vmem:[#allocation9 + $0x360] sm:$0xff]  ;;  %v378_v19 = vld [vmem:[#allocation9 + $0x368] sm:$0xff]  ;;  %430 = vmatpush.msra.mxu1 %v381_v14  ;;  %470 = vmatpush.msra.mxu3 %v382_v15  ;;  %v320_v8 = vld [vmem:[#allocation9 + $0x198] sm:$0xff] }
  0x9c   :  { %v309_v20 = vld [vmem:[#allocation9 + $0x140] sm:$0xff]  ;;  %v310_v21 = vld [vmem:[#allocation9 + $0x148] sm:$0xff]  ;;  %411 = vmatpush.msra.mxu0 %v313_v16  ;;  %451 = vmatpush.msra.mxu2 %v314_v17  ;;  %v395_v9 = vld [vmem:[#allocation9 + $0x3f0] sm:$0xff] }
  0x9d   :  { %v373_v22 = vld [vmem:[#allocation9 + $0x340] sm:$0xff]  ;;  %v374_v23 = vld [vmem:[#allocation9 + $0x348] sm:$0xff]  ;;  %431 = vmatpush.msra.mxu1 %v377_v18  ;;  %471 = vmatpush.msra.mxu3 %v378_v19  ;;  %v388_v10 = vld [vmem:[#allocation9 + $0x3b8] sm:$0xff] }
  0x9e   :  { %v305_v24 = vld [vmem:[#allocation9 + $0x120] sm:$0xff]  ;;  %v306_v25 = vld [vmem:[#allocation9 + $0x128] sm:$0xff]  ;;  %412 = vmatpush.msra.mxu0 %v309_v20  ;;  %452 = vmatpush.msra.mxu2 %v310_v21  ;;  %v327_v11 = vld [vmem:[#allocation9 + $0x1d0] sm:$0xff] }
  0x9f   :  { %v369_v26 = vld [vmem:[#allocation9 + $0x320] sm:$0xff]  ;;  %v370_v27 = vld [vmem:[#allocation9 + $0x328] sm:$0xff]  ;;  %432 = vmatpush.msra.mxu1 %v373_v22  ;;  %472 = vmatpush.msra.mxu3 %v374_v23  ;;  %v316_v12 = vld [vmem:[#allocation9 + $0x178] sm:$0xff] }
  0xa0   :  { %v301_v28 = vld [vmem:[#allocation9 + $0x100] sm:$0xff]  ;;  %v302_v29 = vld [vmem:[#allocation9 + $0x108] sm:$0xff]  ;;  %413 = vmatpush.msra.mxu0 %v305_v24  ;;  %453 = vmatpush.msra.mxu2 %v306_v25  ;;  %v391_v13 = vld [vmem:[#allocation9 + $0x3d0] sm:$0xff] }
  0xa1   :  { %v365_v30 = vld [vmem:[#allocation9 + $0x300] sm:$0xff]  ;;  %v366_v31 = vld [vmem:[#allocation9 + $0x308] sm:$0xff]  ;;  %433 = vmatpush.msra.mxu1 %v369_v26  ;;  %473 = vmatpush.msra.mxu3 %v370_v27  ;;  %v384_v14 = vld [vmem:[#allocation9 + $0x398] sm:$0xff] }
  0xa2   :  { %v297_v32 = vld [vmem:[#allocation9 + $0xe0] sm:$0xff]  ;;  %v298_v33 = vld [vmem:[#allocation9 + $0xe8] sm:$0xff]  ;;  %414 = vmatpush.msra.mxu0 %v301_v28  ;;  %454 = vmatpush.msra.mxu2 %v302_v29  ;;  %v323_v15 = vld [vmem:[#allocation9 + $0x1b0] sm:$0xff] }
  0xa3   :  { %v361_v34 = vld [vmem:[#allocation9 + $0x2e0] sm:$0xff]  ;;  %v362_v35 = vld [vmem:[#allocation9 + $0x2e8] sm:$0xff]  ;;  %434 = vmatpush.msra.mxu1 %v365_v30  ;;  %474 = vmatpush.msra.mxu3 %v366_v31  ;;  %v312_v16 = vld [vmem:[#allocation9 + $0x158] sm:$0xff] }
  0xa4   :  { %v293_v36 = vld [vmem:[#allocation9 + $0xc0] sm:$0xff]  ;;  %v294_v37 = vld [vmem:[#allocation9 + $0xc8] sm:$0xff]  ;;  %415 = vmatpush.msra.mxu0 %v297_v32  ;;  %455 = vmatpush.msra.mxu2 %v298_v33  ;;  %v387_v17 = vld [vmem:[#allocation9 + $0x3b0] sm:$0xff] }
  0xa5   :  { %v357_v38 = vld [vmem:[#allocation9 + $0x2c0] sm:$0xff]  ;;  %v358_v39 = vld [vmem:[#allocation9 + $0x2c8] sm:$0xff]  ;;  %435 = vmatpush.msra.mxu1 %v361_v34  ;;  %475 = vmatpush.msra.mxu3 %v362_v35  ;;  %v380_v18 = vld [vmem:[#allocation9 + $0x378] sm:$0xff] }
  0xa6   :  { %v289_v40 = vld [vmem:[#allocation9 + $0xa0] sm:$0xff]  ;;  %v290_v41 = vld [vmem:[#allocation9 + $0xa8] sm:$0xff]  ;;  %416 = vmatpush.msra.mxu0 %v293_v36  ;;  %456 = vmatpush.msra.mxu2 %v294_v37  ;;  %v319_v19 = vld [vmem:[#allocation9 + $0x190] sm:$0xff] }
  0xa7   :  { %v353_v42 = vld [vmem:[#allocation9 + $0x2a0] sm:$0xff]  ;;  %v354_v43 = vld [vmem:[#allocation9 + $0x2a8] sm:$0xff]  ;;  %436 = vmatpush.msra.mxu1 %v357_v38  ;;  %476 = vmatpush.msra.mxu3 %v358_v39  ;;  %v308_v20 = vld [vmem:[#allocation9 + $0x138] sm:$0xff] }
  0xa8   :  { %v285_v44 = vld [vmem:[#allocation9 + $0x80] sm:$0xff]  ;;  %v286_v45 = vld [vmem:[#allocation9 + $0x88] sm:$0xff]  ;;  %417 = vmatpush.msra.mxu0 %v289_v40  ;;  %457 = vmatpush.msra.mxu2 %v290_v41  ;;  %v383_v21 = vld [vmem:[#allocation9 + $0x390] sm:$0xff] }
  0xa9   :  { %v349_v46 = vld [vmem:[#allocation9 + $0x280] sm:$0xff]  ;;  %v350_v47 = vld [vmem:[#allocation9 + $0x288] sm:$0xff]  ;;  %437 = vmatpush.msra.mxu1 %v353_v42  ;;  %477 = vmatpush.msra.mxu3 %v354_v43  ;;  %v376_v22 = vld [vmem:[#allocation9 + $0x358] sm:$0xff] }
  0xaa   :  { %v281_v48 = vld [vmem:[#allocation9 + $0x60] sm:$0xff]  ;;  %v282_v49 = vld [vmem:[#allocation9 + $0x68] sm:$0xff]  ;;  %418 = vmatpush.msra.mxu0 %v285_v44  ;;  %458 = vmatpush.msra.mxu2 %v286_v45  ;;  %v315_v23 = vld [vmem:[#allocation9 + $0x170] sm:$0xff] }
  0xab   :  { %v345_v50 = vld [vmem:[#allocation9 + $0x260] sm:$0xff]  ;;  %v346_v51 = vld [vmem:[#allocation9 + $0x268] sm:$0xff]  ;;  %438 = vmatpush.msra.mxu1 %v349_v46  ;;  %478 = vmatpush.msra.mxu3 %v350_v47  ;;  %v304_v24 = vld [vmem:[#allocation9 + $0x118] sm:$0xff] }
  0xac   :  { %v277_v52 = vld [vmem:[#allocation9 + $0x40] sm:$0xff]  ;;  %v278_v53 = vld [vmem:[#allocation9 + $0x48] sm:$0xff]  ;;  %419 = vmatpush.msra.mxu0 %v281_v48  ;;  %459 = vmatpush.msra.mxu2 %v282_v49  ;;  %v379_v25 = vld [vmem:[#allocation9 + $0x370] sm:$0xff] }
  0xad   :  { %v341_v54 = vld [vmem:[#allocation9 + $0x240] sm:$0xff]  ;;  %v342_v55 = vld [vmem:[#allocation9 + $0x248] sm:$0xff]  ;;  %439 = vmatpush.msra.mxu1 %v345_v50  ;;  %479 = vmatpush.msra.mxu3 %v346_v51  ;;  %v372_v26 = vld [vmem:[#allocation9 + $0x338] sm:$0xff] }
  0xae   :  { %v273_v56 = vld [vmem:[#allocation9 + $0x20] sm:$0xff]  ;;  %v274_v57 = vld [vmem:[#allocation9 + $0x28] sm:$0xff]  ;;  %420 = vmatpush.msra.mxu0 %v277_v52  ;;  %460 = vmatpush.msra.mxu2 %v278_v53  ;;  %v311_v27 = vld [vmem:[#allocation9 + $0x150] sm:$0xff] }
  0xaf   :  { %v337_v58 = vld [vmem:[#allocation9 + $0x220] sm:$0xff]  ;;  %v338_v59 = vld [vmem:[#allocation9 + $0x228] sm:$0xff]  ;;  %440 = vmatpush.msra.mxu1 %v341_v54  ;;  %480 = vmatpush.msra.mxu3 %v342_v55  ;;  %v300_v28 = vld [vmem:[#allocation9 + $0xf8] sm:$0xff] }
  0xb0   :  { %v269_v60 = vld [vmem:[#allocation9] sm:$0xff]  ;;  %v270_v61 = vld [vmem:[#allocation9 + $0x8] sm:$0xff]  ;;  %421 = vmatpush.msra.mxu0 %v273_v56  ;;  %461 = vmatpush.msra.mxu2 %v274_v57  ;;  %v375_v29 = vld [vmem:[#allocation9 + $0x350] sm:$0xff] }
  0xb1   :  { %441 = vmatpush.msra.mxu1 %v337_v58  ;;  %481 = vmatpush.msra.mxu3 %v338_v59  ;;  %v333_v0 = vld [vmem:[#allocation9 + $0x200] sm:$0xff]  ;;  %v334_v1 = vld [vmem:[#allocation9 + $0x208] sm:$0xff]  ;;  %v368_v30 = vld [vmem:[#allocation9 + $0x318] sm:$0xff] }
  0xb2   :  { %422 = vmatpush.msra.mxu0 %v269_v60  ;;  %462 = vmatpush.msra.mxu2 %v270_v61  ;;  %v307_v31 = vld [vmem:[#allocation9 + $0x130] sm:$0xff]  ;;  %v296_v32 = vld [vmem:[#allocation9 + $0xd8] sm:$0xff] }
  0xb3   :  { %423 = vmatmul.f32.vlgmr.msra.gmra.mxu0 %v2820_v62  ;;  %442 = vmatpush.msra.mxu1 %v333_v0  ;;  %v371_v33 = vld [vmem:[#allocation9 + $0x330] sm:$0xff]  ;;  %v364_v34 = vld [vmem:[#allocation9 + $0x2f8] sm:$0xff] }
  0xb4   :  { %527 = vmatpush.msrb.mxu2 %v332_v63  ;;  %482 = vmatpush.msra.mxu3 %v334_v1  ;;  %v303_v35 = vld [vmem:[#allocation9 + $0x110] sm:$0xff]  ;;  %v292_v36 = vld [vmem:[#allocation9 + $0xb8] sm:$0xff] }
  0xb5   :  { %443 = vmatmul.f32.vlgmr.msra.gmra.mxu1 %v2822_v2  ;;  %463 = vmatmul.f32.vlgmr.msra.gmra.mxu2 %v2820_v62  ;;  %v367_v37 = vld [vmem:[#allocation9 + $0x310] sm:$0xff]  ;;  %v360_v38 = vld [vmem:[#allocation9 + $0x2d8] sm:$0xff] }
  0xb6   :  { %528 = vmatpush.msrb.mxu2 %v328_v3  ;;  %547 = vmatpush.msrb.mxu3 %v396_v4  ;;  %v299_v39 = vld [vmem:[#allocation9 + $0xf0] sm:$0xff]  ;;  %v288_v40 = vld [vmem:[#allocation9 + $0x98] sm:$0xff]  ;;  %v675_v4 = vld [vmem:[#allocation9 + $0x5e0] sm:$0xff] }
  0xb7   :  { %483 = vmatmul.f32.vlgmr.msra.gmra.mxu3 %v2822_v2  ;;  %487 = vmatpush.msrb.mxu0 %v331_v7  ;;  %v363_v41 = vld [vmem:[#allocation9 + $0x2f0] sm:$0xff]  ;;  %v356_v42 = vld [vmem:[#allocation9 + $0x2b8] sm:$0xff]  ;;  %v739_v7 = vld [vmem:[#allocation9 + $0x7e0] sm:$0xff] }
  0xb8   :  { %529 = vmatpush.msrb.mxu2 %v324_v5  ;;  %548 = vmatpush.msrb.mxu3 %v392_v6  ;;  %v295_v43 = vld [vmem:[#allocation9 + $0xd0] sm:$0xff]  ;;  %v284_v44 = vld [vmem:[#allocation9 + $0x78] sm:$0xff]  ;;  %v676_v5 = vld [vmem:[#allocation9 + $0x5e8] sm:$0xff] }
  0xb9   :  { %507 = vmatpush.msrb.mxu1 %v395_v9  ;;  %488 = vmatpush.msrb.mxu0 %v327_v11  ;;  %v359_v45 = vld [vmem:[#allocation9 + $0x2d0] sm:$0xff]  ;;  %v352_v46 = vld [vmem:[#allocation9 + $0x298] sm:$0xff]  ;;  %v671_v6 = vld [vmem:[#allocation9 + $0x5c0] sm:$0xff] }
  0xba   :  { %530 = vmatpush.msrb.mxu2 %v320_v8  ;;  %549 = vmatpush.msrb.mxu3 %v388_v10  ;;  %v291_v47 = vld [vmem:[#allocation9 + $0xb0] sm:$0xff]  ;;  %v280_v48 = vld [vmem:[#allocation9 + $0x58] sm:$0xff]  ;;  %v672_v8 = vld [vmem:[#allocation9 + $0x5c8] sm:$0xff] }
  0xbb   :  { %508 = vmatpush.msrb.mxu1 %v391_v13  ;;  %489 = vmatpush.msrb.mxu0 %v323_v15  ;;  %v355_v49 = vld [vmem:[#allocation9 + $0x2b0] sm:$0xff]  ;;  %v348_v50 = vld [vmem:[#allocation9 + $0x278] sm:$0xff]  ;;  %v740_v9 = vld [vmem:[#allocation9 + $0x7e8] sm:$0xff] }
  0xbc   :  { %531 = vmatpush.msrb.mxu2 %v316_v12  ;;  %550 = vmatpush.msrb.mxu3 %v384_v14  ;;  %v287_v51 = vld [vmem:[#allocation9 + $0x90] sm:$0xff]  ;;  %v276_v52 = vld [vmem:[#allocation9 + $0x38] sm:$0xff]  ;;  %v667_v10 = vld [vmem:[#allocation9 + $0x5a0] sm:$0xff] }
  0xbd   :  { %509 = vmatpush.msrb.mxu1 %v387_v17  ;;  %490 = vmatpush.msrb.mxu0 %v319_v19  ;;  %v351_v53 = vld [vmem:[#allocation9 + $0x290] sm:$0xff]  ;;  %v344_v54 = vld [vmem:[#allocation9 + $0x258] sm:$0xff]  ;;  %v735_v11 = vld [vmem:[#allocation9 + $0x7c0] sm:$0xff] }
  0xbe   :  { %532 = vmatpush.msrb.mxu2 %v312_v16  ;;  %551 = vmatpush.msrb.mxu3 %v380_v18  ;;  %v283_v55 = vld [vmem:[#allocation9 + $0x70] sm:$0xff]  ;;  %v272_v56 = vld [vmem:[#allocation9 + $0x18] sm:$0xff]  ;;  %v668_v12 = vld [vmem:[#allocation9 + $0x5a8] sm:$0xff] }
  0xbf   :  { %510 = vmatpush.msrb.mxu1 %v383_v21  ;;  %491 = vmatpush.msrb.mxu0 %v315_v23  ;;  %v347_v57 = vld [vmem:[#allocation9 + $0x270] sm:$0xff]  ;;  %v340_v58 = vld [vmem:[#allocation9 + $0x238] sm:$0xff]  ;;  %v663_v13 = vld [vmem:[#allocation9 + $0x580] sm:$0xff] }
  0xc0   :  { %533 = vmatpush.msrb.mxu2 %v308_v20  ;;  %552 = vmatpush.msrb.mxu3 %v376_v22  ;;  %v279_v59 = vld [vmem:[#allocation9 + $0x50] sm:$0xff]  ;;  %v336_v61 = vld [vmem:[#allocation9 + $0x218] sm:$0xff]  ;;  %v731_v14 = vld [vmem:[#allocation9 + $0x7a0] sm:$0xff] }
  0xc1   :  { %511 = vmatpush.msrb.mxu1 %v379_v25  ;;  %492 = vmatpush.msrb.mxu0 %v311_v27  ;;  %v343_v60 = vld [vmem:[#allocation9 + $0x250] sm:$0xff]  ;;  %v664_v15 = vld [vmem:[#allocation9 + $0x588] sm:$0xff]  ;;  %v659_v17 = vld [vmem:[#allocation9 + $0x560] sm:$0xff] }
  0xc2   :  { %534 = vmatpush.msrb.mxu2 %v304_v24  ;;  %553 = vmatpush.msrb.mxu3 %v372_v26  ;;  %v275_v63 = vld [vmem:[#allocation9 + $0x30] sm:$0xff]  ;;  %v732_v16 = vld [vmem:[#allocation9 + $0x7a8] sm:$0xff]  ;;  %v727_v18 = vld [vmem:[#allocation9 + $0x780] sm:$0xff] }
  0xc3   :  { %512 = vmatpush.msrb.mxu1 %v375_v29  ;;  %493 = vmatpush.msrb.mxu0 %v307_v31  ;;  %v339_v0 = vld [vmem:[#allocation9 + $0x230] sm:$0xff]  ;;  %v660_v19 = vld [vmem:[#allocation9 + $0x568] sm:$0xff]  ;;  %v655_v21 = vld [vmem:[#allocation9 + $0x540] sm:$0xff] }
  0xc4   :  { %535 = vmatpush.msrb.mxu2 %v300_v28  ;;  %554 = vmatpush.msrb.mxu3 %v368_v30  ;;  %v271_v1 = vld [vmem:[#allocation9 + $0x10] sm:$0xff]  ;;  %v728_v20 = vld [vmem:[#allocation9 + $0x788] sm:$0xff]  ;;  %v723_v22 = vld [vmem:[#allocation9 + $0x760] sm:$0xff] }
  0xc5   :  { %513 = vmatpush.msrb.mxu1 %v371_v33  ;;  %494 = vmatpush.msrb.mxu0 %v303_v35  ;;  %v335_v3 = vld [vmem:[#allocation9 + $0x210] sm:$0xff]  ;;  %v656_v23 = vld [vmem:[#allocation9 + $0x548] sm:$0xff]  ;;  %v651_v25 = vld [vmem:[#allocation9 + $0x520] sm:$0xff] }
  0xc6   :  { %536 = vmatpush.msrb.mxu2 %v296_v32  ;;  %555 = vmatpush.msrb.mxu3 %v364_v34  ;;  %v724_v24 = vld [vmem:[#allocation9 + $0x768] sm:$0xff]  ;;  %v719_v26 = vld [vmem:[#allocation9 + $0x740] sm:$0xff] }
  0xc7   :  { %514 = vmatpush.msrb.mxu1 %v367_v37  ;;  %495 = vmatpush.msrb.mxu0 %v299_v39  ;;  %v652_v27 = vld [vmem:[#allocation9 + $0x528] sm:$0xff]  ;;  %v647_v29 = vld [vmem:[#allocation9 + $0x500] sm:$0xff] }
  0xc8   :  { %537 = vmatpush.msrb.mxu2 %v292_v36  ;;  %556 = vmatpush.msrb.mxu3 %v360_v38  ;;  %v720_v28 = vld [vmem:[#allocation9 + $0x748] sm:$0xff]  ;;  %v715_v30 = vld [vmem:[#allocation9 + $0x720] sm:$0xff] }
  0xc9   :  { %515 = vmatpush.msrb.mxu1 %v363_v41  ;;  %496 = vmatpush.msrb.mxu0 %v295_v43  ;;  %v648_v31 = vld [vmem:[#allocation9 + $0x508] sm:$0xff]  ;;  %v643_v33 = vld [vmem:[#allocation9 + $0x4e0] sm:$0xff] }
  0xca   :  { %538 = vmatpush.msrb.mxu2 %v288_v40  ;;  %557 = vmatpush.msrb.mxu3 %v356_v42  ;;  %v716_v32 = vld [vmem:[#allocation9 + $0x728] sm:$0xff]  ;;  %v711_v34 = vld [vmem:[#allocation9 + $0x700] sm:$0xff] }
  0xcb   :  { %516 = vmatpush.msrb.mxu1 %v359_v45  ;;  %497 = vmatpush.msrb.mxu0 %v291_v47  ;;  %v644_v35 = vld [vmem:[#allocation9 + $0x4e8] sm:$0xff]  ;;  %v639_v37 = vld [vmem:[#allocation9 + $0x4c0] sm:$0xff] }
  0xcc   :  { %539 = vmatpush.msrb.mxu2 %v284_v44  ;;  %558 = vmatpush.msrb.mxu3 %v352_v46  ;;  %v712_v36 = vld [vmem:[#allocation9 + $0x708] sm:$0xff]  ;;  %v707_v38 = vld [vmem:[#allocation9 + $0x6e0] sm:$0xff] }
  0xcd   :  { %517 = vmatpush.msrb.mxu1 %v355_v49  ;;  %498 = vmatpush.msrb.mxu0 %v287_v51  ;;  %v640_v39 = vld [vmem:[#allocation9 + $0x4c8] sm:$0xff]  ;;  %v635_v41 = vld [vmem:[#allocation9 + $0x4a0] sm:$0xff] }
  0xce   :  { %540 = vmatpush.msrb.mxu2 %v280_v48  ;;  %559 = vmatpush.msrb.mxu3 %v348_v50  ;;  %v708_v40 = vld [vmem:[#allocation9 + $0x6e8] sm:$0xff]  ;;  %v703_v42 = vld [vmem:[#allocation9 + $0x6c0] sm:$0xff] }
  0xcf   :  { %518 = vmatpush.msrb.mxu1 %v351_v53  ;;  %499 = vmatpush.msrb.mxu0 %v283_v55  ;;  %v636_v43 = vld [vmem:[#allocation9 + $0x4a8] sm:$0xff]  ;;  %v2832_v44 = vld [vmem:[#allocation11] sm:$0xf] }
  0xd0   :  { %541 = vmatpush.msrb.mxu2 %v276_v52  ;;  %560 = vmatpush.msrb.mxu3 %v344_v54  ;;  %v704_v45 = vld [vmem:[#allocation9 + $0x6c8] sm:$0xff]  ;;  %v631_v46 = vld [vmem:[#allocation9 + $0x480] sm:$0xff]  ;;  %v399_v50 = vperm.slane %v2832_v44, 0 }
  0xd1   :  { %519 = vmatpush.msrb.mxu1 %v347_v57  ;;  %500 = vmatpush.msrb.mxu0 %v279_v59  ;;  %v699_v47 = vld [vmem:[#allocation9 + $0x6a0] sm:$0xff]  ;;  %v632_v48 = vld [vmem:[#allocation9 + $0x488] sm:$0xff] }
  0xd2   :  { %542 = vmatpush.msrb.mxu2 %v272_v56  ;;  %561 = vmatpush.msrb.mxu3 %v340_v58  ;;  %v700_v49 = vld [vmem:[#allocation9 + $0x6a8] sm:$0xff]  ;;  %v627_v51 = vld [vmem:[#allocation9 + $0x460] sm:$0xff] }
  0xd3   :  { %543 = vmatmul.f32.vlgmr.msrb.gmra.mxu2 %v2820_v62  ;;  %520 = vmatpush.msrb.mxu1 %v343_v60  ;;  %v695_v52 = vld [vmem:[#allocation9 + $0x680] sm:$0xff]  ;;  %v628_v53 = vld [vmem:[#allocation9 + $0x468] sm:$0xff] }
  0xd4   :  { %562 = vmatpush.msrb.mxu3 %v336_v61  ;;  %501 = vmatpush.msrb.mxu0 %v275_v63  ;;  %v696_v54 = vld [vmem:[#allocation9 + $0x688] sm:$0xff]  ;;  %v623_v55 = vld [vmem:[#allocation9 + $0x440] sm:$0xff] }
  0xd5   :  { %563 = vmatmul.f32.vlgmr.msrb.gmra.mxu3 %v2822_v2  ;;  %521 = vmatpush.msrb.mxu1 %v339_v0  ;;  %v691_v56 = vld [vmem:[#allocation9 + $0x660] sm:$0xff]  ;;  %v624_v57 = vld [vmem:[#allocation9 + $0x448] sm:$0xff] }
  0xd6   :  { %502 = vmatpush.msrb.mxu0 %v271_v1  ;;  %794 = vmatpush.msra.mxu2 %v676_v5  ;;  %v692_v59 = vld [vmem:[#allocation9 + $0x668] sm:$0xff]  ;;  %v619_v61 = vld [vmem:[#allocation9 + $0x420] sm:$0xff] }
  0xd7   :  { %503 = vmatmul.f32.vlgmr.msrb.gmra.mxu0 %v2820_v62  ;;  %522 = vmatpush.msrb.mxu1 %v335_v3  ;;  %v736_v62 = vld [vmem:[#allocation9 + $0x7c8] sm:$0xff]  ;;  %v687_v63 = vld [vmem:[#allocation9 + $0x640] sm:$0xff] }
  0xd8   :  { %523 = vmatmul.f32.vlgmr.msrb.gmra.mxu1 %v2822_v2  ;;  %754 = vmatpush.msra.mxu0 %v675_v4  ;;  %v620_v0 = vld [vmem:[#allocation9 + $0x428] sm:$0xff]  ;;  %v615_v5 = vld [vmem:[#allocation9 + $0x400] sm:$0xff] }
  0xd9   :  { %774 = vmatpush.msra.mxu1 %v739_v7  ;;  %795 = vmatpush.msra.mxu2 %v672_v8  ;;  %v688_v3 = vld [vmem:[#allocation9 + $0x648] sm:$0xff] }
  0xda   :  { %755 = vmatpush.msra.mxu0 %v671_v6  ;;  %814 = vmatpush.msra.mxu3 %v740_v9  ;;  %v683_v6 = vld [vmem:[#allocation9 + $0x620] sm:$0xff]  ;;  %v616_v7 = vld [vmem:[#allocation9 + $0x408] sm:$0xff]  ;;  %v677_v9 = vld [vmem:[#allocation9 + $0x5f0] sm:$0xff] }
  0xdb   :  { %775 = vmatpush.msra.mxu1 %v735_v11  ;;  %796 = vmatpush.msra.mxu2 %v668_v12  ;;  %v684_v8 = vld [vmem:[#allocation9 + $0x628] sm:$0xff]  ;;  %v679_v12 = vld [vmem:[#allocation9 + $0x600] sm:$0xff] }
  0xdc   :  { %756 = vmatpush.msra.mxu0 %v667_v10  ;;  %815 = vmatpush.msra.mxu3 %v736_v62  ;;  %v678_v10 = vld [vmem:[#allocation9 + $0x5f8] sm:$0xff]  ;;  %v680_v62 = vld [vmem:[#allocation9 + $0x608] sm:$0xff] }
  0xdd   :  { %776 = vmatpush.msra.mxu1 %v731_v14  ;;  %797 = vmatpush.msra.mxu2 %v664_v15  ;;  %v673_v14 = vld [vmem:[#allocation9 + $0x5d0] sm:$0xff] }
  0xde   :  { %757 = vmatpush.msra.mxu0 %v663_v13  ;;  %816 = vmatpush.msra.mxu3 %v732_v16  ;;  %v400_v13 = vperm.slane %v2832_v44, 1  ;;  %v741_v15 = vld [vmem:[#allocation9 + $0x7f0] sm:$0xff]  ;;  %v674_v16 = vld [vmem:[#allocation9 + $0x5d8] sm:$0xff] }
  0xdf   :  { %777 = vmatpush.msra.mxu1 %v727_v18  ;;  %798 = vmatpush.msra.mxu2 %v660_v19  ;;  %v669_v18 = vld [vmem:[#allocation9 + $0x5b0] sm:$0xff] }
  0xe0   :  { %758 = vmatpush.msra.mxu0 %v659_v17  ;;  %817 = vmatpush.msra.mxu3 %v728_v20  ;;  %v742_v17 = vld [vmem:[#allocation9 + $0x7f8] sm:$0xff]  ;;  %v737_v19 = vld [vmem:[#allocation9 + $0x7d0] sm:$0xff] }
  0xe1   :  { %778 = vmatpush.msra.mxu1 %v723_v22  ;;  %799 = vmatpush.msra.mxu2 %v656_v23  ;;  %v670_v20 = vld [vmem:[#allocation9 + $0x5b8] sm:$0xff] }
  0xe2   :  { %759 = vmatpush.msra.mxu0 %v655_v21  ;;  %818 = vmatpush.msra.mxu3 %v724_v24  ;;  %v738_v22 = vld [vmem:[#allocation9 + $0x7d8] sm:$0xff] }
  0xe3   :  { %779 = vmatpush.msra.mxu1 %v719_v26  ;;  %800 = vmatpush.msra.mxu2 %v652_v27  ;;  %v733_v26 = vld [vmem:[#allocation9 + $0x7b0] sm:$0xff]  ;;  %v666_v27 = vld [vmem:[#allocation9 + $0x598] sm:$0xff] }
  0xe4   :  { %760 = vmatpush.msra.mxu0 %v651_v25  ;;  %819 = vmatpush.msra.mxu3 %v720_v28  ;;  %v665_v25 = vld [vmem:[#allocation9 + $0x590] sm:$0xff]  ;;  %v734_v28 = vld [vmem:[#allocation9 + $0x7b8] sm:$0xff] }
  0xe5   :  { %780 = vmatpush.msra.mxu1 %v715_v30  ;;  %801 = vmatpush.msra.mxu2 %v648_v31  ;;  %v661_v30 = vld [vmem:[#allocation9 + $0x570] sm:$0xff] }
  0xe6   :  { %761 = vmatpush.msra.mxu0 %v647_v29  ;;  %820 = vmatpush.msra.mxu3 %v716_v32  ;;  %v729_v31 = vld [vmem:[#allocation9 + $0x790] sm:$0xff]  ;;  %v662_v32 = vld [vmem:[#allocation9 + $0x578] sm:$0xff] }
  0xe7   :  { %781 = vmatpush.msra.mxu1 %v711_v34  ;;  %802 = vmatpush.msra.mxu2 %v644_v35  ;;  %v730_v34 = vld [vmem:[#allocation9 + $0x798] sm:$0xff] }
  0xe8   :  { %762 = vmatpush.msra.mxu0 %v643_v33  ;;  %821 = vmatpush.msra.mxu3 %v712_v36 }
  0xe9   :  { %782 = vmatpush.msra.mxu1 %v707_v38  ;;  %803 = vmatpush.msra.mxu2 %v640_v39  ;;  %v725_v38 = vld [vmem:[#allocation9 + $0x770] sm:$0xff]  ;;  %v658_v39 = vld [vmem:[#allocation9 + $0x558] sm:$0xff] }
  0xea   :  { %763 = vmatpush.msra.mxu0 %v639_v37  ;;  %822 = vmatpush.msra.mxu3 %v708_v40  ;;  %v657_v37 = vld [vmem:[#allocation9 + $0x550] sm:$0xff]  ;;  %v726_v40 = vld [vmem:[#allocation9 + $0x778] sm:$0xff] }
  0xeb   :  { %783 = vmatpush.msra.mxu1 %v703_v42  ;;  %804 = vmatpush.msra.mxu2 %v636_v43  ;;  %v721_v42 = vld [vmem:[#allocation9 + $0x750] sm:$0xff]  ;;  %v654_v43 = vld [vmem:[#allocation9 + $0x538] sm:$0xff] }
  0xec   :  { %764 = vmatpush.msra.mxu0 %v635_v41  ;;  %823 = vmatpush.msra.mxu3 %v704_v45  ;;  %v653_v41 = vld [vmem:[#allocation9 + $0x530] sm:$0xff]  ;;  %v722_v45 = vld [vmem:[#allocation9 + $0x758] sm:$0xff] }
  0xed   :  { %784 = vmatpush.msra.mxu1 %v699_v47  ;;  %805 = vmatpush.msra.mxu2 %v632_v48  ;;  %v717_v47 = vld [vmem:[#allocation9 + $0x730] sm:$0xff]  ;;  %v650_v48 = vld [vmem:[#allocation9 + $0x518] sm:$0xff] }
  0xee   :  { %765 = vmatpush.msra.mxu0 %v631_v46  ;;  %824 = vmatpush.msra.mxu3 %v700_v49  ;;  %v649_v46 = vld [vmem:[#allocation9 + $0x510] sm:$0xff]  ;;  %v718_v49 = vld [vmem:[#allocation9 + $0x738] sm:$0xff] }
  0xef   :  { %785 = vmatpush.msra.mxu1 %v695_v52  ;;  %806 = vmatpush.msra.mxu2 %v628_v53  ;;  %v646_v52 = vld [vmem:[#allocation9 + $0x4f8] sm:$0xff] }
  0xf0   :  { %766 = vmatpush.msra.mxu0 %v627_v51  ;;  %825 = vmatpush.msra.mxu3 %v696_v54  ;;  %v713_v51 = vld [vmem:[#allocation9 + $0x710] sm:$0xff]  ;;  %v714_v53 = vld [vmem:[#allocation9 + $0x718] sm:$0xff] }
  0xf1   :  { %786 = vmatpush.msra.mxu1 %v691_v56  ;;  %807 = vmatpush.msra.mxu2 %v624_v57  ;;  %v709_v56 = vld [vmem:[#allocation9 + $0x6f0] sm:$0xff]  ;;  %v642_v57 = vld [vmem:[#allocation9 + $0x4d8] sm:$0xff] }
  0xf2   :  { %767 = vmatpush.msra.mxu0 %v623_v55  ;;  %826 = vmatpush.msra.mxu3 %v692_v59  ;;  %v641_v55 = vld [vmem:[#allocation9 + $0x4d0] sm:$0xff] }
  0xf3   :  { %787 = vmatpush.msra.mxu1 %v687_v63  ;;  %808 = vmatpush.msra.mxu2 %v620_v0  ;;  %v637_v63 = vld [vmem:[#allocation9 + $0x4b0] sm:$0xff] }
  0xf4   :  { %768 = vmatpush.msra.mxu0 %v619_v61  ;;  %827 = vmatpush.msra.mxu3 %v688_v3  ;;  %v705_v0 = vld [vmem:[#allocation9 + $0x6d0] sm:$0xff]  ;;  %v706_v3 = vld [vmem:[#allocation9 + $0x6d8] sm:$0xff] }
  0xf5   :  { %788 = vmatpush.msra.mxu1 %v683_v6  ;;  %809 = vmatpush.msra.mxu2 %v616_v7  ;;  %v634_v6 = vld [vmem:[#allocation9 + $0x498] sm:$0xff] }
  0xf6   :  { %769 = vmatpush.msra.mxu0 %v615_v5  ;;  %828 = vmatpush.msra.mxu3 %v684_v8  ;;  %v701_v5 = vld [vmem:[#allocation9 + $0x6b0] sm:$0xff]  ;;  %v702_v8 = vld [vmem:[#allocation9 + $0x6b8] sm:$0xff] }
  0xf7   :  { %874 = vmatpush.msrb.mxu2 %v678_v10  ;;  %789 = vmatpush.msra.mxu1 %v679_v12  ;;  %v697_v10 = vld [vmem:[#allocation9 + $0x690] sm:$0xff]  ;;  %v698_v12 = vld [vmem:[#allocation9 + $0x698] sm:$0xff] }
  0xf8   :  { %834 = vmatpush.msrb.mxu0 %v677_v9  ;;  %829 = vmatpush.msra.mxu3 %v680_v62  ;;  %v629_v9 = vld [vmem:[#allocation9 + $0x470] sm:$0xff]  ;;  %v2846_v62 = vld [vmem:[#allocation8 + $0x8] sm:$0xff] }
  0xf9   :  { %854 = vmatpush.msrb.mxu1 %v741_v15  ;;  %875 = vmatpush.msrb.mxu2 %v674_v16  ;;  %v626_v16 = vld [vmem:[#allocation9 + $0x458] sm:$0xff] }
  0xfa   :  { %835 = vmatpush.msrb.mxu0 %v673_v14  ;;  %894 = vmatpush.msrb.mxu3 %v742_v17  ;;  %v693_v14 = vld [vmem:[#allocation9 + $0x670] sm:$0xff]  ;;  %v694_v17 = vld [vmem:[#allocation9 + $0x678] sm:$0xff] }
  0xfb   :  { %855 = vmatpush.msrb.mxu1 %v737_v19  ;;  %876 = vmatpush.msrb.mxu2 %v670_v20  ;;  %v689_v19 = vld [vmem:[#allocation9 + $0x650] sm:$0xff] }
  0xfc   :  { %836 = vmatpush.msrb.mxu0 %v669_v18  ;;  %895 = vmatpush.msrb.mxu3 %v738_v22  ;;  %v621_v18 = vld [vmem:[#allocation9 + $0x430] sm:$0xff]  ;;  %v690_v22 = vld [vmem:[#allocation9 + $0x658] sm:$0xff] }
  0xfd   :  { %856 = vmatpush.msrb.mxu1 %v733_v26  ;;  %877 = vmatpush.msrb.mxu2 %v666_v27  ;;  %v685_v26 = vld [vmem:[#allocation9 + $0x630] sm:$0xff] }
  0xfe   :  { %837 = vmatpush.msrb.mxu0 %v665_v25  ;;  %896 = vmatpush.msrb.mxu3 %v734_v28  ;;  %v617_v25 = vld [vmem:[#allocation9 + $0x410] sm:$0xff]  ;;  %v618_v28 = vld [vmem:[#allocation9 + $0x418] sm:$0xff] }
  0xff   :  { %857 = vmatpush.msrb.mxu1 %v729_v31  ;;  %878 = vmatpush.msrb.mxu2 %v662_v32 }
 0x100   :  { %838 = vmatpush.msrb.mxu0 %v661_v30  ;;  %897 = vmatpush.msrb.mxu3 %v730_v34 }
 0x101   :  { %858 = vmatpush.msrb.mxu1 %v725_v38  ;;  %879 = vmatpush.msrb.mxu2 %v658_v39  ;;  %v1052_v39 = vld [vmem:[#allocation9 + $0xac8] sm:$0xff] }
 0x102   :  { %839 = vmatpush.msrb.mxu0 %v657_v37  ;;  %898 = vmatpush.msrb.mxu3 %v726_v40 }
 0x103   :  { %859 = vmatpush.msrb.mxu1 %v721_v42  ;;  %880 = vmatpush.msrb.mxu2 %v654_v43  ;;  %v1088_v43 = vld [vmem:[#allocation9 + $0xbe8] sm:$0xff] }
 0x104   :  { %840 = vmatpush.msrb.mxu0 %v653_v41  ;;  %899 = vmatpush.msrb.mxu3 %v722_v45  ;;  %v1087_v41 = vld [vmem:[#allocation9 + $0xbe0] sm:$0xff] }
 0x105   :  { %860 = vmatpush.msrb.mxu1 %v717_v47  ;;  %881 = vmatpush.msrb.mxu2 %v650_v48 }
 0x106   :  { %841 = vmatpush.msrb.mxu0 %v649_v46  ;;  %900 = vmatpush.msrb.mxu3 %v718_v49 }
 0x107   :  { %861 = vmatpush.msrb.mxu1 %v713_v51  ;;  %882 = vmatpush.msrb.mxu2 %v646_v52 }
 0x108   :  { %901 = vmatpush.msrb.mxu3 %v714_v53  ;;  %790 = vmatmul.f32.vlgmr.msra.gmra.mxu1 %v2846_v62 }
 0x109   :  { %862 = vmatpush.msrb.mxu1 %v709_v56  ;;  %883 = vmatpush.msrb.mxu2 %v642_v57 }
 0x10a   :  { %830 = vmatmul.f32.vlgmr.msra.gmra.mxu3 %v2846_v62 }
 0x10b   :  { %863 = vmatpush.msrb.mxu1 %v705_v0 }
 0x10d   :  { %864 = vmatpush.msrb.mxu1 %v701_v5  ;;  %v1020_v5 = vld [vmem:[#allocation9 + $0x9c8] sm:$0xff] }
 0x10f   :  { %865 = vmatpush.msrb.mxu1 %v697_v10  ;;  %v1012_v10 = vld [vmem:[#allocation9 + $0x988] sm:$0xff] }
 0x111   :  { %866 = vmatpush.msrb.mxu1 %v693_v14  ;;  %v1008_v14 = vld [vmem:[#allocation9 + $0x968] sm:$0xff] }
 0x113   :  { %867 = vmatpush.msrb.mxu1 %v689_v19  ;;  %v1072_v19 = vld [vmem:[#allocation9 + $0xb68] sm:$0xff] }
 0x115   :  { %868 = vmatpush.msrb.mxu1 %v685_v26  ;;  %v996_v26 = vld [vmem:[#allocation9 + $0x908] sm:$0xff] }
 0x130   :  { %v424_v58 = vpop.f32.mrf.mxu0 }
 0x131   :  { %v425_v60 = vadd.f32 %v424_v58, %v399_v50  ;;  %v645_v50 = vld [vmem:[#allocation9 + $0x4f0] sm:$0xff] }
 0x132   :  { %v444_v1 = vpop.f32.mrf.mxu1  ;;  %842 = vmatpush.msrb.mxu0 %v645_v50 }
 0x133   :  { %v445_v4 = vadd.f32 %v444_v1, %v425_v60  ;;  %v710_v60 = vld [vmem:[#allocation9 + $0x6f8] sm:$0xff] }
 0x134   :  { %843 = vmatpush.msrb.mxu0 %v641_v55  ;;  %902 = vmatpush.msrb.mxu3 %v710_v60  ;;  %v638_v1 = vld [vmem:[#allocation9 + $0x4b8] sm:$0xff] }
 0x135   :  { %v2153_v11 = vmul.f32 -1.442695, %v445_v4  ;;  %v633_v4 = vld [vmem:[#allocation9 + $0x490] sm:$0xff]  ;;  %884 = vmatpush.msrb.mxu2 %v638_v1  ;;  %v1023_v1 = vld [vmem:[#allocation9 + $0x9e0] sm:$0xff] }
 0x136   :  { %844 = vmatpush.msrb.mxu0 %v637_v63  ;;  %903 = vmatpush.msrb.mxu3 %v706_v3  ;;  %v1024_v3 = vld [vmem:[#allocation9 + $0x9e8] sm:$0xff] }
 0x137   :  { %2194 = vpow2.f32 %v2153_v11  ;;  %v630_v11 = vld [vmem:[#allocation9 + $0x478] sm:$0xff]  ;;  %885 = vmatpush.msrb.mxu2 %v634_v6  ;;  %v1083_v6 = vld [vmem:[#allocation9 + $0xbc0] sm:$0xff] }
 0x138   :  { %v464_v21 = vpop.f32.mrf.mxu2  ;;  %845 = vmatpush.msrb.mxu0 %v633_v4  ;;  %904 = vmatpush.msrb.mxu3 %v702_v8  ;;  %v1019_v4 = vld [vmem:[#allocation9 + $0x9c0] sm:$0xff] }
 0x139   :  { %v465_v23 = vadd.f32 %v464_v21, %v400_v13  ;;  %v625_v13 = vld [vmem:[#allocation9 + $0x450] sm:$0xff]  ;;  %886 = vmatpush.msrb.mxu2 %v630_v11  ;;  %v622_v21 = vld [vmem:[#allocation9 + $0x438] sm:$0xff]  ;;  %v1011_v8 = vld [vmem:[#allocation9 + $0x980] sm:$0xff] }
 0x13a   :  { %v484_v24 = vpop.f32.mrf.mxu3  ;;  %846 = vmatpush.msrb.mxu0 %v629_v9  ;;  %905 = vmatpush.msrb.mxu3 %v698_v12  ;;  %v1079_v9 = vld [vmem:[#allocation9 + $0xba0] sm:$0xff]  ;;  %v1080_v11 = vld [vmem:[#allocation9 + $0xba8] sm:$0xff] }
 0x13b   :  { %v485_v29 = vadd.f32 %v484_v24, %v465_v23  ;;  %v402_v23 = vperm.slane %v2832_v44, 3  ;;  %v401_v24 = vperm.slane %v2832_v44, 2  ;;  %887 = vmatpush.msrb.mxu2 %v626_v16  ;;  %v681_v44 = vld [vmem:[#allocation9 + $0x610] sm:$0xff]  ;;  %v1007_v12 = vld [vmem:[#allocation9 + $0x960] sm:$0xff] }
 0x13c   :  { %847 = vmatpush.msrb.mxu0 %v625_v13  ;;  %906 = vmatpush.msrb.mxu3 %v694_v17  ;;  %v1075_v13 = vld [vmem:[#allocation9 + $0xb80] sm:$0xff] }
 0x13d   :  { %v2195_v33 = vpop.eup %2194  ;;  %v2154_v36 = vmul.f32 -1.442695, %v485_v29  ;;  %v686_v29 = vld [vmem:[#allocation9 + $0x638] sm:$0xff]  ;;  %888 = vmatpush.msrb.mxu2 %v622_v21  ;;  %869 = vmatpush.msrb.mxu1 %v681_v44  ;;  %v1003_v16 = vld [vmem:[#allocation9 + $0x940] sm:$0xff] }
 0x13e   :  { %v2836_v35 = vadd.f32 1.0, %v2195_v33  ;;  %848 = vmatpush.msrb.mxu0 %v621_v18  ;;  %907 = vmatpush.msrb.mxu3 %v690_v22  ;;  %v1071_v17 = vld [vmem:[#allocation9 + $0xb60] sm:$0xff]  ;;  %v1004_v18 = vld [vmem:[#allocation9 + $0x948] sm:$0xff] }
 0x13f   :  { %889 = vmatpush.msrb.mxu2 %v618_v28  ;;  %870 = vmatmul.f32.vlgmr.msrb.gmra.mxu1 %v2846_v62  ;;  %v1067_v21 = vld [vmem:[#allocation9 + $0xb40] sm:$0xff]  ;;  %v1000_v22 = vld [vmem:[#allocation9 + $0x928] sm:$0xff] }
 0x140   :  { %2196 = vrcp.f32 %v2836_v35  ;;  %vm580_vm0 = vweird.f32 %v2836_v35  ;;  %v586_v31 = vand.u32 2147483648, %v2836_v35  ;;  %v584_v34 = vand.u32 2147483647, %v2836_v35  ;;  %849 = vmatpush.msrb.mxu0 %v617_v25  ;;  %908 = vmatpush.msrb.mxu3 %v686_v29  ;;  %v1063_v25 = vld [vmem:[#allocation9 + $0xb20] sm:$0xff] }
 0x141   :  { %2198 = vpow2.f32 %v2154_v36  ;;  %v682_v36 = vld [vmem:[#allocation9 + $0x618] sm:$0xff]  ;;  %1122 = vmatpush.msra.mxu1 %v1087_v41  ;;  %v991_v28 = vld [vmem:[#allocation9 + $0x8e0] sm:$0xff] }
 0x142   :  { %v587_v47 = vor.u32 1.1754944e-38, %v586_v31  ;;  %909 = vmatpush.msrb.mxu3 %v682_v36  ;;  %vm585_vm3 = vcmp.eq.f32.partialorder %v584_v34, 8.507059e+37  ;;  %v1059_v29 = vld [vmem:[#allocation9 + $0xb00] sm:$0xff]  ;;  %v1060_v31 = vld [vmem:[#allocation9 + $0xb08] sm:$0xff] }
 0x143   :  { %910 = vmatmul.f32.vlgmr.msrb.gmra.mxu3 %v2846_v62  ;;  %1123 = vmatpush.msra.mxu1 %v1083_v6  ;;  %v987_v44 = vld [vmem:[#allocation9 + $0x8c0] sm:$0xff]  ;;  %v1056_v34 = vld [vmem:[#allocation9 + $0xae8] sm:$0xff] }
 0x144   :  { %1162 = vmatpush.msra.mxu3 %v1088_v43  ;;  %v983_v36 = vld [vmem:[#allocation9 + $0x8a0] sm:$0xff]  ;;  %v1048_v43 = vld [vmem:[#allocation9 + $0xaa8] sm:$0xff] }
 0x145   :  { %1124 = vmatpush.msra.mxu1 %v1079_v9  ;;  %v1047_v41 = vld [vmem:[#allocation9 + $0xaa0] sm:$0xff]  ;;  %v1018_v9 = vld [vmem:[#allocation9 + $0x9b8] sm:$0xff] }
 0x146   :  { %v2839_v54 = vpop.eup %2196 }
 0x147   :  { %v2199_v58 = vpop.eup %2198  ;;  %v576_v59 = vmul.f32 %v2839_v54, %v2836_v35  ;;  %vm581_vm1 = vweird.f32 %v2839_v54  ;;  %1125 = vmatpush.msra.mxu1 %v1075_v13  ;;  %v1013_v13 = vld [vmem:[#allocation9 + $0x990] sm:$0xff] }
 0x148   :  { %v2843_v61 = vadd.f32 1.0, %v2199_v58  ;;  %vm2866_vm2 = vmor %vm580_vm0, %vm581_vm1 }
 0x149   :  { %v577_v7 = vsub.f32 1.0, %v576_v59  ;;  %1126 = vmatpush.msra.mxu1 %v1071_v17  ;;  %v1082_v17 = vld [vmem:[#allocation9 + $0xbb8] sm:$0xff] }
 0x14a   :  { %2200 = vrcp.f32 %v2843_v61  ;;  %vm595_vm4 = vweird.f32 %v2843_v61  ;;  %v601_v53 = vand.u32 2147483648, %v2843_v61  ;;  %v599_v55 = vand.u32 2147483647, %v2843_v61 }
 0x14b   :  { %v578_v15 = vmul.f32 %v2839_v54, %v577_v7  ;;  %v1016_v7 = vld [vmem:[#allocation9 + $0x9a8] sm:$0xff]  ;;  %1127 = vmatpush.msra.mxu1 %v1067_v21 }
 0x14c   :  { %v602_v56 = vor.u32 1.1754944e-38, %v601_v53  ;;  %vm600_vm7 = vcmp.eq.f32.partialorder %v599_v55, 8.507059e+37  ;;  %v1035_v53 = vld [vmem:[#allocation9 + $0xa40] sm:$0xff] }
 0x14d   :  { %v579_v27 = vadd.f32 %v2839_v54, %v578_v15  ;;  %v1076_v15 = vld [vmem:[#allocation9 + $0xb88] sm:$0xff]  ;;  %1128 = vmatpush.msra.mxu1 %v1063_v25  ;;  %v2883_v55 = vld [vmem:[#allocation11 + $0x4] sm:$0xf]  ;;  %v1073_v25 = vld [vmem:[#allocation9 + $0xb70] sm:$0xff] }
 0x14e   :  { %v746_v6 = vperm.slane %v2883_v55, 0 }
 0x14f   :  { %v583_v42 = vsel %vm2866_vm2, %v2839_v54, %v579_v27  ;;  %v1064_v27 = vld [vmem:[#allocation9 + $0xb28] sm:$0xff]  ;;  %1129 = vmatpush.msra.mxu1 %v1059_v29 }
 0x150   :  { %v2851_v20 = vpop.eup %2200  ;;  %v588_v49 = vsel %vm585_vm3, %v587_v47, %v583_v42  ;;  %v980_v42 = vld [vmem:[#allocation9 + $0x888] sm:$0xff] }
 0x151   :  { %v591_v30 = vmul.f32 %v2851_v20, %v2843_v61  ;;  %vm596_vm5 = vweird.f32 %v2851_v20  ;;  %v1015_v61 = vld [vmem:[#allocation9 + $0x9a0] sm:$0xff]  ;;  %v976_v47 = vld [vmem:[#allocation9 + $0x868] sm:$0xff] }
 0x152   :  { %vm597_vm6 = vmor %vm595_vm4, %vm596_vm5 }
 0x153   :  { %v592_v45 = vsub.f32 1.0, %v591_v30  ;;  %v992_v30 = vld [vmem:[#allocation9 + $0x8e8] sm:$0xff] }
 0x154   :  { %v504_v33 = vpop.f32.mrf.mxu0 }
 0x155   :  { %v505_v38 = vadd.f32 %v504_v33, %v401_v24  ;;  %v524_v40 = vpop.f32.mrf.mxu1  ;;  %v593_v51 = vmul.f32 %v2851_v20, %v592_v45  ;;  %v995_v24 = vld [vmem:[#allocation9 + $0x900] sm:$0xff]  ;;  %v988_v33 = vld [vmem:[#allocation9 + $0x8c8] sm:$0xff] }
 0x156   :  { %v544_v32 = vpop.f32.mrf.mxu2  ;;  %v975_v45 = vld [vmem:[#allocation9 + $0x860] sm:$0xff] }
 0x157   :  { %v545_v37 = vadd.f32 %v544_v32, %v402_v23  ;;  %v525_v48 = vadd.f32 %v524_v40, %v505_v38  ;;  %v594_v54 = vadd.f32 %v2851_v20, %v593_v51  ;;  %v1068_v23 = vld [vmem:[#allocation9 + $0xb48] sm:$0xff]  ;;  %v1055_v32 = vld [vmem:[#allocation9 + $0xae0] sm:$0xff] }
 0x158   :  { %v564_v46 = vpop.f32.mrf.mxu3  ;;  %1130 = vmatpush.msra.mxu1 %v1055_v32  ;;  %v984_v38 = vld [vmem:[#allocation9 + $0x8a8] sm:$0xff]  ;;  %v979_v40 = vld [vmem:[#allocation9 + $0x880] sm:$0xff]  ;;  %v1002_v32 = vld [vmem:[#allocation9 + $0x938] sm:$0xff] }
 0x159   :  { %v565_v35 = vadd.f32 %v564_v46, %v545_v37  ;;  %v598_v57 = vsel %vm597_vm6, %v2851_v20, %v594_v54  ;;  %v999_v20 = vld [vmem:[#allocation9 + $0x920] sm:$0xff]  ;;  %v1040_v51 = vld [vmem:[#allocation9 + $0xa68] sm:$0xff] }
 0x15a   :  { %v603_v60 = vsel %vm600_vm7, %v602_v56, %v598_v57  ;;  %v1051_v37 = vld [vmem:[#allocation9 + $0xac0] sm:$0xff]  ;;  %v968_v54 = vld [vmem:[#allocation9 + $0x828] sm:$0xff] }
 0x15b   :  { %v605_v50 = vmul.f32 %v588_v49, %v565_v35  ;;  %1131 = vmatpush.msra.mxu1 %v1051_v37  ;;  %v1043_v46 = vld [vmem:[#allocation9 + $0xa80] sm:$0xff]  ;;  %v1044_v35 = vld [vmem:[#allocation9 + $0xa88] sm:$0xff]  ;;  %v1065_v37 = vld [vmem:[#allocation9 + $0xb30] sm:$0xff] }
 0x15c   :  { %v1039_v49 = vld [vmem:[#allocation9 + $0xa60] sm:$0xff]  ;;  %v1036_v56 = vld [vmem:[#allocation9 + $0xa48] sm:$0xff] }
 0x15d   :  { %v606_v52 = vadd.f32 %v605_v50, %v525_v48  ;;  %1132 = vmatpush.msra.mxu1 %v1047_v41  ;;  %v971_v48 = vld [vmem:[#allocation9 + $0x840] sm:$0xff]  ;;  %v972_v50 = vld [vmem:[#allocation9 + $0x848] sm:$0xff]  ;;  %v993_v41 = vld [vmem:[#allocation9 + $0x8f0] sm:$0xff] }
 0x15e   :  { %v963_v57 = vld [vmem:[#allocation9 + $0x800] sm:$0xff] }
 0x15f   :  { %2202 = vtanh.f32 %v606_v52  ;;  %1133 = vmatpush.msra.mxu1 %v1043_v46  ;;  %v967_v52 = vld [vmem:[#allocation9 + $0x820] sm:$0xff]  ;;  %v1062_v46 = vld [vmem:[#allocation9 + $0xb18] sm:$0xff] }
 0x161   :  { %1134 = vmatpush.msra.mxu1 %v1039_v49 }
 0x163   :  { %1135 = vmatpush.msra.mxu1 %v1035_v53 }
 0x165   :  { %v2203_v58 = vpop.eup %2202 }
 0x166   :  { %v608_v59 = vsub.f32 %v2822_v2, %v2203_v58  ;;  %v1084_v2 = vld [vmem:[#allocation9 + $0xbc8] sm:$0xff] }
 0x167   :  { %1163 = vmatpush.msra.mxu3 %v1084_v2  ;;  %v1017_v2 = vld [vmem:[#allocation9 + $0x9b0] sm:$0xff] }
 0x168   :  { %v609_v63 = vmul.f32 %v608_v59, %v603_v60  ;;  %v964_v59 = vld [vmem:[#allocation9 + $0x808] sm:$0xff] }
 0x169   :  { %1164 = vmatpush.msra.mxu3 %v1080_v11  ;;  %v1032_v60 = vld [vmem:[#allocation9 + $0xa28] sm:$0xff] }
 0x16a   :  { %v610_v0 = vadd.f32 %v2203_v58, %v609_v63  ;;  %v1031_v58 = vld [vmem:[#allocation9 + $0xa20] sm:$0xff]  ;;  %v1025_v63 = vld [vmem:[#allocation9 + $0x9f0] sm:$0xff] }
 0x16b   :  { %1165 = vmatpush.msra.mxu3 %v1076_v15  ;;  %1136 = vmatpush.msra.mxu1 %v1031_v58  ;;  %v1014_v15 = vld [vmem:[#allocation9 + $0x998] sm:$0xff]  ;;  %v1049_v58 = vld [vmem:[#allocation9 + $0xab0] sm:$0xff] }
 0x16c   :  { %611 = vst [vmem:[#allocation16] sm:$0xff] %v610_v0  ;;  %770 = vmatmul.f32.vlgmr.msra.gmra.mxu0 %v610_v0  ;;  %810 = vmatmul.f32.vlgmr.msra.gmra.mxu2 %v610_v0 }
 0x16d   :  { %1102 = vmatpush.msra.mxu0 %v1023_v1  ;;  %1142 = vmatpush.msra.mxu2 %v1024_v3  ;;  %v1027_v1 = vld [vmem:[#allocation9 + $0xa00] sm:$0xff]  ;;  %v1028_v3 = vld [vmem:[#allocation9 + $0xa08] sm:$0xff] }
 0x16e   :  { %1166 = vmatpush.msra.mxu3 %v1072_v19  ;;  %1137 = vmatpush.msra.mxu1 %v1027_v1  ;;  %v1077_v19 = vld [vmem:[#allocation9 + $0xb90] sm:$0xff]  ;;  %v978_v1 = vld [vmem:[#allocation9 + $0x878] sm:$0xff] }
 0x16f   :  { %1103 = vmatpush.msra.mxu0 %v1019_v4  ;;  %1143 = vmatpush.msra.mxu2 %v1020_v5  ;;  %v1021_v4 = vld [vmem:[#allocation9 + $0x9d0] sm:$0xff] }
 0x170   :  { %1167 = vmatpush.msra.mxu3 %v1068_v23  ;;  %v1089_v5 = vld [vmem:[#allocation9 + $0xbf0] sm:$0xff]  ;;  %v1078_v23 = vld [vmem:[#allocation9 + $0xb98] sm:$0xff] }
 0x171   :  { %1104 = vmatpush.msra.mxu0 %v1015_v61  ;;  %1144 = vmatpush.msra.mxu2 %v1016_v7  ;;  %v1022_v61 = vld [vmem:[#allocation9 + $0x9d8] sm:$0xff] }
 0x172   :  { %1168 = vmatpush.msra.mxu3 %v1064_v27  ;;  %v1090_v7 = vld [vmem:[#allocation9 + $0xbf8] sm:$0xff]  ;;  %1202 = vmatpush.msrb.mxu1 %v1089_v5  ;;  %v2890_v5 = vld [vmem:[#allocation8 + $0x10] sm:$0xff] }
 0x173   :  { %1105 = vmatpush.msra.mxu0 %v1011_v8  ;;  %1145 = vmatpush.msra.mxu2 %v1012_v10  ;;  %v1085_v8 = vld [vmem:[#allocation9 + $0xbd0] sm:$0xff]  ;;  %v1086_v10 = vld [vmem:[#allocation9 + $0xbd8] sm:$0xff] }
 0x174   :  { %850 = vmatmul.f32.vlgmr.msrb.gmra.mxu0 %v610_v0  ;;  %890 = vmatmul.f32.vlgmr.msrb.gmra.mxu2 %v610_v0  ;;  %v1026_v0 = vld [vmem:[#allocation9 + $0x9f8] sm:$0xff] }
 0x175   :  { %1106 = vmatpush.msra.mxu0 %v1007_v12  ;;  %1146 = vmatpush.msra.mxu2 %v1008_v14  ;;  %v1081_v14 = vld [vmem:[#allocation9 + $0xbb0] sm:$0xff] }
 0x176   :  { %1169 = vmatpush.msra.mxu3 %v1060_v31  ;;  %1203 = vmatpush.msrb.mxu1 %v1085_v8  ;;  %v1001_v31 = vld [vmem:[#allocation9 + $0x930] sm:$0xff]  ;;  %v1042_v8 = vld [vmem:[#allocation9 + $0xa78] sm:$0xff] }
 0x177   :  { %1107 = vmatpush.msra.mxu0 %v1003_v16  ;;  %1147 = vmatpush.msra.mxu2 %v1004_v18  ;;  %v1009_v18 = vld [vmem:[#allocation9 + $0x970] sm:$0xff] }
 0x178   :  { %1170 = vmatpush.msra.mxu3 %v1056_v34  ;;  %1204 = vmatpush.msrb.mxu1 %v1081_v14  ;;  %v1070_v34 = vld [vmem:[#allocation9 + $0xb58] sm:$0xff] }
 0x179   :  { %1108 = vmatpush.msra.mxu0 %v999_v20  ;;  %1148 = vmatpush.msra.mxu2 %v1000_v22  ;;  %v1010_v20 = vld [vmem:[#allocation9 + $0x978] sm:$0xff]  ;;  %v747_v22 = vperm.slane %v2883_v55, 1 }
 0x17a   :  { %1171 = vmatpush.msra.mxu3 %v1052_v39  ;;  %1205 = vmatpush.msrb.mxu1 %v1077_v19  ;;  %v970_v14 = vld [vmem:[#allocation9 + $0x838] sm:$0xff]  ;;  %v748_v19 = vperm.slane %v2883_v55, 2 }
 0x17b   :  { %1109 = vmatpush.msra.mxu0 %v995_v24  ;;  %1149 = vmatpush.msra.mxu2 %v996_v26  ;;  %v1005_v24 = vld [vmem:[#allocation9 + $0x950] sm:$0xff]  ;;  %v1006_v26 = vld [vmem:[#allocation9 + $0x958] sm:$0xff] }
 0x17c   :  { %1172 = vmatpush.msra.mxu3 %v1048_v43  ;;  %1206 = vmatpush.msrb.mxu1 %v1073_v25  ;;  %v994_v43 = vld [vmem:[#allocation9 + $0x8f8] sm:$0xff]  ;;  %v1029_v25 = vld [vmem:[#allocation9 + $0xa10] sm:$0xff] }
 0x17d   :  { %1110 = vmatpush.msra.mxu0 %v991_v28  ;;  %1150 = vmatpush.msra.mxu2 %v992_v30  ;;  %v1074_v28 = vld [vmem:[#allocation9 + $0xb78] sm:$0xff] }
 0x17e   :  { %1173 = vmatpush.msra.mxu3 %v1044_v35  ;;  %v1057_v35 = vld [vmem:[#allocation9 + $0xaf0] sm:$0xff]  ;;  %1138 = vmatmul.f32.vlgmr.msra.gmra.mxu1 %v2890_v5 }
 0x17f   :  { %1111 = vmatpush.msra.mxu0 %v987_v44  ;;  %1151 = vmatpush.msra.mxu2 %v988_v33  ;;  %v1069_v44 = vld [vmem:[#allocation9 + $0xb50] sm:$0xff] }
 0x180   :  { %1174 = vmatpush.msra.mxu3 %v1040_v51  ;;  %1207 = vmatpush.msrb.mxu1 %v1069_v44  ;;  %v985_v51 = vld [vmem:[#allocation9 + $0x8b0] sm:$0xff] }
 0x181   :  { %1112 = vmatpush.msra.mxu0 %v983_v36  ;;  %1152 = vmatpush.msra.mxu2 %v984_v38  ;;  %v997_v36 = vld [vmem:[#allocation9 + $0x910] sm:$0xff]  ;;  %v998_v38 = vld [vmem:[#allocation9 + $0x918] sm:$0xff] }
 0x182   :  { %1175 = vmatpush.msra.mxu3 %v1036_v56  ;;  %1208 = vmatpush.msrb.mxu1 %v1065_v37  ;;  %v1054_v56 = vld [vmem:[#allocation9 + $0xad8] sm:$0xff] }
 0x183   :  { %1113 = vmatpush.msra.mxu0 %v979_v40  ;;  %1153 = vmatpush.msra.mxu2 %v980_v42  ;;  %v1066_v40 = vld [vmem:[#allocation9 + $0xb38] sm:$0xff]  ;;  %v1061_v42 = vld [vmem:[#allocation9 + $0xb10] sm:$0xff] }
 0x184   :  { %1176 = vmatpush.msra.mxu3 %v1032_v60  ;;  %1209 = vmatpush.msrb.mxu1 %v1061_v42  ;;  %v1050_v60 = vld [vmem:[#allocation9 + $0xab8] sm:$0xff] }
 0x185   :  { %1114 = vmatpush.msra.mxu0 %v975_v45  ;;  %1154 = vmatpush.msra.mxu2 %v976_v47  ;;  %v791_v12 = vpop.f32.mrf.mxu1  ;;  %v989_v47 = vld [vmem:[#allocation9 + $0x8d0] sm:$0xff] }
 0x186   :  { %1177 = vmatpush.msra.mxu3 %v1028_v3  ;;  %1210 = vmatpush.msrb.mxu1 %v1057_v35 }
 0x187   :  { %1115 = vmatpush.msra.mxu0 %v971_v48  ;;  %1155 = vmatpush.msra.mxu2 %v972_v50  ;;  %v990_v48 = vld [vmem:[#allocation9 + $0x8d8] sm:$0xff] }
 0x188   :  { %1242 = vmatpush.msrb.mxu3 %v1090_v7  ;;  %v1058_v50 = vld [vmem:[#allocation9 + $0xaf8] sm:$0xff]  ;;  %v1041_v7 = vld [vmem:[#allocation9 + $0xa70] sm:$0xff] }
 0x189   :  { %1116 = vmatpush.msra.mxu0 %v967_v52  ;;  %1156 = vmatpush.msra.mxu2 %v968_v54  ;;  %v1053_v52 = vld [vmem:[#allocation9 + $0xad0] sm:$0xff]  ;;  %v986_v54 = vld [vmem:[#allocation9 + $0x8b8] sm:$0xff] }
 0x18a   :  { %1243 = vmatpush.msrb.mxu3 %v1086_v10  ;;  %1211 = vmatpush.msrb.mxu1 %v1053_v52  ;;  %v969_v10 = vld [vmem:[#allocation9 + $0x830] sm:$0xff] }
 0x18b   :  { %1117 = vmatpush.msra.mxu0 %v963_v57  ;;  %1157 = vmatpush.msra.mxu2 %v964_v59  ;;  %v981_v57 = vld [vmem:[#allocation9 + $0x890] sm:$0xff]  ;;  %v982_v59 = vld [vmem:[#allocation9 + $0x898] sm:$0xff] }
 0x18c   :  { %1244 = vmatpush.msrb.mxu3 %v1082_v17  ;;  %1212 = vmatpush.msrb.mxu1 %v1049_v58  ;;  %v965_v17 = vld [vmem:[#allocation9 + $0x810] sm:$0xff]  ;;  %v1372_v58 = vld [vmem:[#allocation9 + $0xde8] sm:$0xff] }
 0x18d   :  { %1182 = vmatpush.msrb.mxu0 %v1025_v63  ;;  %1222 = vmatpush.msrb.mxu2 %v1026_v0  ;;  %v831_v30 = vpop.f32.mrf.mxu3  ;;  %v977_v63 = vld [vmem:[#allocation9 + $0x870] sm:$0xff] }
 0x18e   :  { %1245 = vmatpush.msrb.mxu3 %v1078_v23  ;;  %v1045_v0 = vld [vmem:[#allocation9 + $0xa90] sm:$0xff] }
 0x18f   :  { %1183 = vmatpush.msrb.mxu0 %v1021_v4  ;;  %1223 = vmatpush.msrb.mxu2 %v1022_v61  ;;  %v1046_v4 = vld [vmem:[#allocation9 + $0xa98] sm:$0xff] }
 0x190   :  { %1246 = vmatpush.msrb.mxu3 %v1074_v28  ;;  %1213 = vmatpush.msrb.mxu1 %v1045_v0  ;;  %v1431_v0 = vld [vmem:[#allocation9 + $0xfc0] sm:$0xff] }
 0x191   :  { %1184 = vmatpush.msrb.mxu0 %v1017_v2  ;;  %1224 = vmatpush.msrb.mxu2 %v1018_v9  ;;  %v974_v2 = vld [vmem:[#allocation9 + $0x858] sm:$0xff] }
 0x192   :  { %1247 = vmatpush.msrb.mxu3 %v1070_v34  ;;  %1214 = vmatpush.msrb.mxu1 %v1041_v7  ;;  %v1436_v34 = vld [vmem:[#allocation9 + $0xfe8] sm:$0xff]  ;;  %v1355_v7 = vld [vmem:[#allocation9 + $0xd60] sm:$0xff] }
 0x193   :  { %1185 = vmatpush.msrb.mxu0 %v1013_v13  ;;  %1225 = vmatpush.msrb.mxu2 %v1014_v15  ;;  %v1038_v15 = vld [vmem:[#allocation9 + $0xa58] sm:$0xff] }
 0x194   :  { %1248 = vmatpush.msrb.mxu3 %v1066_v40 }
 0x195   :  { %1186 = vmatpush.msrb.mxu0 %v1009_v18  ;;  %1226 = vmatpush.msrb.mxu2 %v1010_v20  ;;  %v1033_v18 = vld [vmem:[#allocation9 + $0xa30] sm:$0xff] }
 0x196   :  { %1249 = vmatpush.msrb.mxu3 %v1062_v46 }
 0x197   :  { %1187 = vmatpush.msrb.mxu0 %v1005_v24  ;;  %1227 = vmatpush.msrb.mxu2 %v1006_v26 }
 0x198   :  { %1250 = vmatpush.msrb.mxu3 %v1058_v50 }
 0x199   :  { %1188 = vmatpush.msrb.mxu0 %v1001_v31  ;;  %1228 = vmatpush.msrb.mxu2 %v1002_v32  ;;  %v1435_v31 = vld [vmem:[#allocation9 + $0xfe0] sm:$0xff] }
 0x19a   :  { %1251 = vmatpush.msrb.mxu3 %v1054_v56 }
 0x19b   :  { %1189 = vmatpush.msrb.mxu0 %v997_v36  ;;  %1229 = vmatpush.msrb.mxu2 %v998_v38 }
 0x19c   :  { %1252 = vmatpush.msrb.mxu3 %v1050_v60  ;;  %v1368_v60 = vld [vmem:[#allocation9 + $0xdc8] sm:$0xff] }
 0x19d   :  { %1190 = vmatpush.msrb.mxu0 %v993_v41  ;;  %1230 = vmatpush.msrb.mxu2 %v994_v43 }
 0x19e   :  { %1253 = vmatpush.msrb.mxu3 %v1046_v4  ;;  %v1427_v4 = vld [vmem:[#allocation9 + $0xfa0] sm:$0xff] }
 0x19f   :  { %1191 = vmatpush.msrb.mxu0 %v989_v47  ;;  %1231 = vmatpush.msrb.mxu2 %v990_v48 }
 0x1a0   :  { %1178 = vmatmul.f32.vlgmr.msra.gmra.mxu3 %v2890_v5 }
 0x1a1   :  { %1192 = vmatpush.msrb.mxu0 %v985_v51  ;;  %1232 = vmatpush.msrb.mxu2 %v986_v54 }
 0x1a2   :  { %1254 = vmatpush.msrb.mxu3 %v1042_v8  ;;  %v1356_v8 = vld [vmem:[#allocation9 + $0xd68] sm:$0xff] }
 0x1a3   :  { %1193 = vmatpush.msrb.mxu0 %v981_v57  ;;  %1233 = vmatpush.msrb.mxu2 %v982_v59  ;;  %v1371_v57 = vld [vmem:[#allocation9 + $0xde0] sm:$0xff] }
 0x1a4   :  { %1255 = vmatpush.msrb.mxu3 %v1038_v15  ;;  %v1367_v59 = vld [vmem:[#allocation9 + $0xdc0] sm:$0xff] }
 0x1a5   :  { %1194 = vmatpush.msrb.mxu0 %v977_v63  ;;  %1234 = vmatpush.msrb.mxu2 %v978_v1  ;;  %v1363_v63 = vld [vmem:[#allocation9 + $0xda0] sm:$0xff]  ;;  %v1364_v1 = vld [vmem:[#allocation9 + $0xda8] sm:$0xff] }
 0x1a6   :  { %v1415_v15 = vld [vmem:[#allocation9 + $0xf40] sm:$0xff] }
 0x1a7   :  { %1235 = vmatpush.msrb.mxu2 %v974_v2  ;;  %v1423_v2 = vld [vmem:[#allocation9 + $0xf80] sm:$0xff] }
 0x1a9   :  { %1236 = vmatpush.msrb.mxu2 %v970_v14  ;;  %v1347_v14 = vld [vmem:[#allocation9 + $0xd20] sm:$0xff] }
 0x1bc   :  { %v871_v36 = vpop.f32.mrf.mxu1 }
 0x1e9   :  { %v771_v11 = vpop.f32.mrf.mxu0 }
 0x1ea   :  { %v772_v16 = vadd.f32 %v771_v11, %v746_v6  ;;  %v973_v6 = vld [vmem:[#allocation9 + $0x850] sm:$0xff] }
 0x1eb   :  { %v1037_v11 = vld [vmem:[#allocation9 + $0xa50] sm:$0xff]  ;;  %1195 = vmatpush.msrb.mxu0 %v973_v6  ;;  %v1428_v6 = vld [vmem:[#allocation9 + $0xfa8] sm:$0xff] }
 0x1ec   :  { %v792_v21 = vadd.f32 %v791_v12, %v772_v16  ;;  %v749_v12 = vperm.slane %v2883_v55, 3  ;;  %1215 = vmatpush.msrb.mxu1 %v1037_v11  ;;  %v1419_v11 = vld [vmem:[#allocation9 + $0xf60] sm:$0xff] }
 0x1ed   :  { %1196 = vmatpush.msrb.mxu0 %v969_v10  ;;  %v1351_v10 = vld [vmem:[#allocation9 + $0xd40] sm:$0xff] }
 0x1ee   :  { %v2155_v27 = vmul.f32 -1.442695, %v792_v21  ;;  %v966_v21 = vld [vmem:[#allocation9 + $0x818] sm:$0xff]  ;;  %1216 = vmatpush.msrb.mxu1 %v1033_v18  ;;  %v1343_v18 = vld [vmem:[#allocation9 + $0xd00] sm:$0xff] }
 0x1ef   :  { %v811_v29 = vpop.f32.mrf.mxu2  ;;  %1197 = vmatpush.msrb.mxu0 %v965_v17  ;;  %1237 = vmatpush.msrb.mxu2 %v966_v21  ;;  %v1416_v17 = vld [vmem:[#allocation9 + $0xf48] sm:$0xff] }
 0x1f0   :  { %2204 = vpow2.f32 %v2155_v27  ;;  %v812_v33 = vadd.f32 %v811_v29, %v747_v22  ;;  %v1034_v22 = vld [vmem:[#allocation9 + $0xa38] sm:$0xff]  ;;  %1217 = vmatpush.msrb.mxu1 %v1029_v25  ;;  %v1412_v21 = vld [vmem:[#allocation9 + $0xf28] sm:$0xff] }
 0x1f1   :  { %v851_v23 = vpop.f32.mrf.mxu0  ;;  %v1030_v29 = vld [vmem:[#allocation9 + $0xa18] sm:$0xff]  ;;  %1256 = vmatpush.msrb.mxu3 %v1034_v22  ;;  %1218 = vmatmul.f32.vlgmr.msrb.gmra.mxu1 %v2890_v5  ;;  %v1339_v22 = vld [vmem:[#allocation9 + $0xce0] sm:$0xff]  ;;  %v1408_v25 = vld [vmem:[#allocation9 + $0xf08] sm:$0xff] }
 0x1f2   :  { %v832_v39 = vadd.f32 %v831_v30, %v812_v33  ;;  %v911_v30 = vpop.f32.mrf.mxu3  ;;  %v852_v32 = vadd.f32 %v851_v23, %v748_v19  ;;  %1470 = vmatpush.msra.mxu1 %v1435_v31  ;;  %v1411_v19 = vld [vmem:[#allocation9 + $0xf20] sm:$0xff]  ;;  %v1332_v31 = vld [vmem:[#allocation9 + $0xca8] sm:$0xff] }
 0x1f3   :  { %1257 = vmatpush.msrb.mxu3 %v1030_v29  ;;  %v1407_v23 = vld [vmem:[#allocation9 + $0xf00] sm:$0xff]  ;;  %v1404_v29 = vld [vmem:[#allocation9 + $0xee8] sm:$0xff] }
 0x1f4   :  { %v2156_v45 = vmul.f32 -1.442695, %v832_v39  ;;  %1258 = vmatmul.f32.vlgmr.msrb.gmra.mxu3 %v2890_v5  ;;  %v872_v42 = vadd.f32 %v871_v36, %v852_v32  ;;  %1471 = vmatpush.msra.mxu1 %v1431_v0  ;;  %v1327_v32 = vld [vmem:[#allocation9 + $0xc80] sm:$0xff]  ;;  %v1396_v36 = vld [vmem:[#allocation9 + $0xea8] sm:$0xff] }
 0x1f5   :  { %1510 = vmatpush.msra.mxu3 %v1436_v34  ;;  %v1328_v34 = vld [vmem:[#allocation9 + $0xc88] sm:$0xff] }
 0x1f6   :  { %v2205_v49 = vpop.eup %2204  ;;  %2206 = vpow2.f32 %v2156_v45  ;;  %1472 = vmatpush.msra.mxu1 %v1427_v4  ;;  %v1366_v4 = vld [vmem:[#allocation9 + $0xdb8] sm:$0xff] }
 0x1f7   :  { %v2887_v53 = vadd.f32 1.0, %v2205_v49  ;;  %v891_v16 = vpop.f32.mrf.mxu2 }
 0x1f8   :  { %v892_v26 = vadd.f32 %v891_v16, %v749_v12  ;;  %1473 = vmatpush.msra.mxu1 %v1423_v2  ;;  %v1352_v12 = vld [vmem:[#allocation9 + $0xd48] sm:$0xff]  ;;  %v1361_v2 = vld [vmem:[#allocation9 + $0xd90] sm:$0xff] }
 0x1f9   :  { %2208 = vrcp.f32 %v2887_v53  ;;  %v933_v24 = vand.u32 2147483648, %v2887_v53  ;;  %v931_v28 = vand.u32 2147483647, %v2887_v53  ;;  %vm927_vm9 = vweird.f32 %v2887_v53  ;;  %v1348_v16 = vld [vmem:[#allocation9 + $0xd28] sm:$0xff] }
 0x1fa   :  { %v912_v39 = vadd.f32 %v911_v30, %v892_v26  ;;  %1474 = vmatpush.msra.mxu1 %v1419_v11  ;;  %v1335_v26 = vld [vmem:[#allocation9 + $0xcc0] sm:$0xff]  ;;  %v1430_v11 = vld [vmem:[#allocation9 + $0xfb8] sm:$0xff] }
 0x1fb   :  { %v934_v37 = vor.u32 1.1754944e-38, %v933_v24  ;;  %vm932_vm11 = vcmp.eq.f32.partialorder %v931_v28, 8.507059e+37  ;;  %v1340_v24 = vld [vmem:[#allocation9 + $0xce8] sm:$0xff]  ;;  %v1399_v30 = vld [vmem:[#allocation9 + $0xec0] sm:$0xff] }
 0x1fc   :  { %v2207_v3 = vpop.eup %2206  ;;  %1475 = vmatpush.msra.mxu1 %v1415_v15  ;;  %v1336_v28 = vld [vmem:[#allocation9 + $0xcc8] sm:$0xff] }
 0x1fd   :  { %v2892_v61 = vadd.f32 1.0, %v2207_v3  ;;  %v1359_v3 = vld [vmem:[#allocation9 + $0xd80] sm:$0xff] }
 0x1fe   :  { %1476 = vmatpush.msra.mxu1 %v1411_v19  ;;  %v1421_v19 = vld [vmem:[#allocation9 + $0xf70] sm:$0xff] }
 0x1ff   :  { %v2209_v9 = vpop.eup %2208  ;;  %2210 = vrcp.f32 %v2892_v61  ;;  %v948_v35 = vand.u32 2147483648, %v2892_v61  ;;  %vm942_vm13 = vweird.f32 %v2892_v61  ;;  %v946_v48 = vand.u32 2147483647, %v2892_v61 }
 0x200   :  { %v923_v13 = vmul.f32 %v2209_v9, %v2887_v53  ;;  %vm928_vm8 = vweird.f32 %v2209_v9  ;;  %1477 = vmatpush.msra.mxu1 %v1407_v23 }
 0x201   :  { %vm929_vm10 = vmor %vm927_vm9, %vm928_vm8  ;;  %v949_v51 = vor.u32 1.1754944e-38, %v948_v35  ;;  %vm947_vm15 = vcmp.eq.f32.partialorder %v946_v48, 8.507059e+37  ;;  %v1316_v35 = vld [vmem:[#allocation9 + $0xc28] sm:$0xff] }
 0x202   :  { %v924_v20 = vsub.f32 1.0, %v923_v13  ;;  %v1420_v13 = vld [vmem:[#allocation9 + $0xf68] sm:$0xff] }
 0x203   :  { %v2911_v48 = vld [vmem:[#allocation11 + $0x8] sm:$0xf] }
 0x204   :  { %v925_v27 = vmul.f32 %v2209_v9, %v924_v20  ;;  %v1344_v20 = vld [vmem:[#allocation9 + $0xd08] sm:$0xff]  ;;  %v1094_v0 = vperm.slane %v2911_v48, 0 }
 0x205   :  { %v2211_v55 = vpop.eup %2210 }
 0x206   :  { %v938_v44 = vmul.f32 %v2211_v55, %v2892_v61  ;;  %v926_v33 = vadd.f32 %v2209_v9, %v925_v27  ;;  %vm943_vm12 = vweird.f32 %v2211_v55  ;;  %v1360_v61 = vld [vmem:[#allocation9 + $0xd88] sm:$0xff]  ;;  %v1403_v27 = vld [vmem:[#allocation9 + $0xee0] sm:$0xff] }
 0x207   :  { %vm944_vm14 = vmor %vm942_vm13, %vm943_vm12  ;;  %1478 = vmatpush.msra.mxu1 %v1403_v27  ;;  %v1350_v27 = vld [vmem:[#allocation9 + $0xd38] sm:$0xff] }
 0x208   :  { %v939_v38 = vsub.f32 1.0, %v938_v44  ;;  %v930_v40 = vsel %vm929_vm10, %v2209_v9, %v926_v33  ;;  %v1424_v9 = vld [vmem:[#allocation9 + $0xf88] sm:$0xff]  ;;  %v1395_v33 = vld [vmem:[#allocation9 + $0xea0] sm:$0xff] }
 0x209   :  { %v935_v41 = vsel %vm932_vm11, %v934_v37, %v930_v40  ;;  %1479 = vmatpush.msra.mxu1 %v1399_v30  ;;  %v1400_v44 = vld [vmem:[#allocation9 + $0xec8] sm:$0xff]  ;;  %v1323_v37 = vld [vmem:[#allocation9 + $0xc60] sm:$0xff]  ;;  %v1413_v30 = vld [vmem:[#allocation9 + $0xf30] sm:$0xff] }
 0x20a   :  { %v952_v43 = vmul.f32 %v935_v41, %v912_v39  ;;  %v940_v45 = vmul.f32 %v2211_v55, %v939_v38  ;;  %v1391_v38 = vld [vmem:[#allocation9 + $0xe80] sm:$0xff]  ;;  %v1324_v39 = vld [vmem:[#allocation9 + $0xc68] sm:$0xff] }
 0x20b   :  { %1480 = vmatpush.msra.mxu1 %v1395_v33  ;;  %v1392_v40 = vld [vmem:[#allocation9 + $0xe88] sm:$0xff]  ;;  %v1319_v41 = vld [vmem:[#allocation9 + $0xc40] sm:$0xff]  ;;  %v1341_v33 = vld [vmem:[#allocation9 + $0xcf0] sm:$0xff] }
 0x20c   :  { %v953_v46 = vadd.f32 %v952_v43, %v872_v42  ;;  %v941_v47 = vadd.f32 %v2211_v55, %v940_v45  ;;  %v1387_v42 = vld [vmem:[#allocation9 + $0xe60] sm:$0xff]  ;;  %v1320_v43 = vld [vmem:[#allocation9 + $0xc48] sm:$0xff] }
 0x20d   :  { %1481 = vmatpush.msra.mxu1 %v1391_v38  ;;  %v1388_v45 = vld [vmem:[#allocation9 + $0xe68] sm:$0xff]  ;;  %v1410_v38 = vld [vmem:[#allocation9 + $0xf18] sm:$0xff] }
 0x20e   :  { %2212 = vtanh.f32 %v953_v46  ;;  %v945_v49 = vsel %vm944_vm14, %v2211_v55, %v941_v47  ;;  %v1331_v55 = vld [vmem:[#allocation9 + $0xca0] sm:$0xff] }
 0x20f   :  { %v950_v53 = vsel %vm947_vm15, %v949_v51, %v945_v49  ;;  %1482 = vmatpush.msra.mxu1 %v1387_v42  ;;  %v1315_v46 = vld [vmem:[#allocation9 + $0xc20] sm:$0xff]  ;;  %v1384_v49 = vld [vmem:[#allocation9 + $0xe48] sm:$0xff] }
 0x210   :  { %v1383_v47 = vld [vmem:[#allocation9 + $0xe40] sm:$0xff] }
 0x211   :  { %1483 = vmatpush.msra.mxu1 %v1383_v47  ;;  %v1379_v51 = vld [vmem:[#allocation9 + $0xe20] sm:$0xff] }
 0x213   :  { %1484 = vmatpush.msra.mxu1 %v1379_v51  ;;  %v1397_v51 = vld [vmem:[#allocation9 + $0xeb0] sm:$0xff] }
 0x214   :  { %v2213_v50 = vpop.eup %2212 }
 0x215   :  { %v955_v52 = vsub.f32 %v2846_v62, %v2213_v50  ;;  %v1432_v62 = vld [vmem:[#allocation9 + $0xfc8] sm:$0xff] }
 0x216   :  { %1511 = vmatpush.msra.mxu3 %v1432_v62  ;;  %v1365_v62 = vld [vmem:[#allocation9 + $0xdb0] sm:$0xff] }
 0x217   :  { %v956_v54 = vmul.f32 %v955_v52, %v950_v53  ;;  %v1312_v52 = vld [vmem:[#allocation9 + $0xc08] sm:$0xff] }
 0x218   :  { %1512 = vmatpush.msra.mxu3 %v1428_v6  ;;  %v1380_v53 = vld [vmem:[#allocation9 + $0xe28] sm:$0xff] }
 0x219   :  { %v957_v56 = vadd.f32 %v2213_v50, %v956_v54  ;;  %v1311_v50 = vld [vmem:[#allocation9 + $0xc00] sm:$0xff]  ;;  %v1373_v54 = vld [vmem:[#allocation9 + $0xdf0] sm:$0xff] }
 0x21a   :  { %1513 = vmatpush.msra.mxu3 %v1424_v9  ;;  %v1362_v9 = vld [vmem:[#allocation9 + $0xd98] sm:$0xff] }
 0x21b   :  { %1118 = vmatmul.f32.vlgmr.msra.gmra.mxu0 %v957_v56  ;;  %959 = vst [vmem:[#allocation16 + $0x8] sm:$0xff] %v957_v56  ;;  %1158 = vmatmul.f32.vlgmr.msra.gmra.mxu2 %v957_v56 }
 0x21c   :  { %1450 = vmatpush.msra.mxu0 %v1371_v57  ;;  %1490 = vmatpush.msra.mxu2 %v1372_v58  ;;  %v1375_v57 = vld [vmem:[#allocation9 + $0xe00] sm:$0xff]  ;;  %v1376_v58 = vld [vmem:[#allocation9 + $0xe08] sm:$0xff] }
 0x21d   :  { %1514 = vmatpush.msra.mxu3 %v1420_v13  ;;  %1485 = vmatpush.msra.mxu1 %v1375_v57  ;;  %v1425_v13 = vld [vmem:[#allocation9 + $0xf90] sm:$0xff]  ;;  %v1326_v57 = vld [vmem:[#allocation9 + $0xc78] sm:$0xff] }
 0x21e   :  { %1451 = vmatpush.msra.mxu0 %v1367_v59  ;;  %1491 = vmatpush.msra.mxu2 %v1368_v60  ;;  %v1369_v59 = vld [vmem:[#allocation9 + $0xdd0] sm:$0xff] }
 0x21f   :  { %1515 = vmatpush.msra.mxu3 %v1416_v17  ;;  %v1437_v60 = vld [vmem:[#allocation9 + $0xff0] sm:$0xff]  ;;  %v1426_v17 = vld [vmem:[#allocation9 + $0xf98] sm:$0xff] }
 0x220   :  { %1452 = vmatpush.msra.mxu0 %v1363_v63  ;;  %1492 = vmatpush.msra.mxu2 %v1364_v1  ;;  %v1370_v63 = vld [vmem:[#allocation9 + $0xdd8] sm:$0xff] }
 0x221   :  { %1516 = vmatpush.msra.mxu3 %v1412_v21  ;;  %v1438_v1 = vld [vmem:[#allocation9 + $0xff8] sm:$0xff]  ;;  %1550 = vmatpush.msrb.mxu1 %v1437_v60  ;;  %v2918_v60 = vld [vmem:[#allocation8 + $0x18] sm:$0xff] }
 0x222   :  { %1453 = vmatpush.msra.mxu0 %v1359_v3  ;;  %1493 = vmatpush.msra.mxu2 %v1360_v61  ;;  %v1433_v3 = vld [vmem:[#allocation9 + $0xfd0] sm:$0xff]  ;;  %v1434_v61 = vld [vmem:[#allocation9 + $0xfd8] sm:$0xff] }
 0x223   :  { %1198 = vmatmul.f32.vlgmr.msrb.gmra.mxu0 %v957_v56  ;;  %1238 = vmatmul.f32.vlgmr.msrb.gmra.mxu2 %v957_v56  ;;  %v1374_v56 = vld [vmem:[#allocation9 + $0xdf8] sm:$0xff] }
 0x224   :  { %1454 = vmatpush.msra.mxu0 %v1355_v7  ;;  %1494 = vmatpush.msra.mxu2 %v1356_v8  ;;  %v1139_v7 = vpop.f32.mrf.mxu1  ;;  %v1429_v8 = vld [vmem:[#allocation9 + $0xfb0] sm:$0xff] }
 0x225   :  { %1517 = vmatpush.msra.mxu3 %v1408_v25  ;;  %1551 = vmatpush.msrb.mxu1 %v1433_v3  ;;  %v1349_v25 = vld [vmem:[#allocation9 + $0xd30] sm:$0xff]  ;;  %v1390_v3 = vld [vmem:[#allocation9 + $0xe78] sm:$0xff] }
 0x226   :  { %1455 = vmatpush.msra.mxu0 %v1351_v10  ;;  %1495 = vmatpush.msra.mxu2 %v1352_v12  ;;  %v1357_v12 = vld [vmem:[#allocation9 + $0xd70] sm:$0xff] }
 0x227   :  { %1518 = vmatpush.msra.mxu3 %v1404_v29  ;;  %1552 = vmatpush.msrb.mxu1 %v1429_v8  ;;  %v1418_v29 = vld [vmem:[#allocation9 + $0xf58] sm:$0xff] }
 0x228   :  { %1456 = vmatpush.msra.mxu0 %v1347_v14  ;;  %1496 = vmatpush.msra.mxu2 %v1348_v16  ;;  %v1358_v14 = vld [vmem:[#allocation9 + $0xd78] sm:$0xff]  ;;  %v1095_v16 = vperm.slane %v2911_v48, 1 }
 0x229   :  { %1519 = vmatpush.msra.mxu3 %v1400_v44  ;;  %1553 = vmatpush.msrb.mxu1 %v1425_v13  ;;  %v1318_v8 = vld [vmem:[#allocation9 + $0xc38] sm:$0xff]  ;;  %v1096_v13 = vperm.slane %v2911_v48, 2 }
 0x22a   :  { %1457 = vmatpush.msra.mxu0 %v1343_v18  ;;  %1497 = vmatpush.msra.mxu2 %v1344_v20  ;;  %v1353_v18 = vld [vmem:[#allocation9 + $0xd50] sm:$0xff]  ;;  %v1354_v20 = vld [vmem:[#allocation9 + $0xd58] sm:$0xff] }
 0x22b   :  { %1520 = vmatpush.msra.mxu3 %v1396_v36  ;;  %1554 = vmatpush.msrb.mxu1 %v1421_v19  ;;  %v1342_v36 = vld [vmem:[#allocation9 + $0xcf8] sm:$0xff]  ;;  %v1377_v19 = vld [vmem:[#allocation9 + $0xe10] sm:$0xff] }
 0x22c   :  { %1458 = vmatpush.msra.mxu0 %v1339_v22  ;;  %1498 = vmatpush.msra.mxu2 %v1340_v24  ;;  %v1422_v22 = vld [vmem:[#allocation9 + $0xf78] sm:$0xff]  ;;  %v1179_v24 = vpop.f32.mrf.mxu3 }
 0x22d   :  { %1521 = vmatpush.msra.mxu3 %v1392_v40  ;;  %v1405_v40 = vld [vmem:[#allocation9 + $0xef0] sm:$0xff]  ;;  %1486 = vmatmul.f32.vlgmr.msra.gmra.mxu1 %v2918_v60 }
 0x22e   :  { %1459 = vmatpush.msra.mxu0 %v1335_v26  ;;  %1499 = vmatpush.msra.mxu2 %v1336_v28  ;;  %v1417_v26 = vld [vmem:[#allocation9 + $0xf50] sm:$0xff] }
 0x22f   :  { %1522 = vmatpush.msra.mxu3 %v1388_v45  ;;  %1555 = vmatpush.msrb.mxu1 %v1417_v26  ;;  %v1333_v45 = vld [vmem:[#allocation9 + $0xcb0] sm:$0xff] }
 0x230   :  { %1460 = vmatpush.msra.mxu0 %v1331_v55  ;;  %1500 = vmatpush.msra.mxu2 %v1332_v31  ;;  %v1345_v55 = vld [vmem:[#allocation9 + $0xd10] sm:$0xff]  ;;  %v1346_v31 = vld [vmem:[#allocation9 + $0xd18] sm:$0xff] }
 0x231   :  { %1523 = vmatpush.msra.mxu3 %v1384_v49  ;;  %1556 = vmatpush.msrb.mxu1 %v1413_v30  ;;  %v1402_v49 = vld [vmem:[#allocation9 + $0xed8] sm:$0xff] }
 0x232   :  { %1461 = vmatpush.msra.mxu0 %v1327_v32  ;;  %1501 = vmatpush.msra.mxu2 %v1328_v34  ;;  %v1414_v32 = vld [vmem:[#allocation9 + $0xf38] sm:$0xff]  ;;  %v1409_v34 = vld [vmem:[#allocation9 + $0xf10] sm:$0xff] }
 0x233   :  { %1524 = vmatpush.msra.mxu3 %v1380_v53  ;;  %1557 = vmatpush.msrb.mxu1 %v1409_v34  ;;  %v1398_v53 = vld [vmem:[#allocation9 + $0xeb8] sm:$0xff] }
 0x234   :  { %1462 = vmatpush.msra.mxu0 %v1323_v37  ;;  %1502 = vmatpush.msra.mxu2 %v1324_v39  ;;  %v1337_v39 = vld [vmem:[#allocation9 + $0xcd0] sm:$0xff] }
 0x235   :  { %1525 = vmatpush.msra.mxu3 %v1376_v58  ;;  %1558 = vmatpush.msrb.mxu1 %v1405_v40 }
 0x236   :  { %1463 = vmatpush.msra.mxu0 %v1319_v41  ;;  %1503 = vmatpush.msra.mxu2 %v1320_v43  ;;  %v1338_v41 = vld [vmem:[#allocation9 + $0xcd8] sm:$0xff] }
 0x237   :  { %1590 = vmatpush.msrb.mxu3 %v1438_v1  ;;  %v1406_v43 = vld [vmem:[#allocation9 + $0xef8] sm:$0xff]  ;;  %v1389_v1 = vld [vmem:[#allocation9 + $0xe70] sm:$0xff] }
 0x238   :  { %1464 = vmatpush.msra.mxu0 %v1315_v46  ;;  %1504 = vmatpush.msra.mxu2 %v1316_v35  ;;  %v1401_v46 = vld [vmem:[#allocation9 + $0xed0] sm:$0xff]  ;;  %v1334_v35 = vld [vmem:[#allocation9 + $0xcb8] sm:$0xff] }
 0x239   :  { %1591 = vmatpush.msrb.mxu3 %v1434_v61  ;;  %1559 = vmatpush.msrb.mxu1 %v1401_v46  ;;  %v1317_v61 = vld [vmem:[#allocation9 + $0xc30] sm:$0xff] }
 0x23a   :  { %1465 = vmatpush.msra.mxu0 %v1311_v50  ;;  %1505 = vmatpush.msra.mxu2 %v1312_v52  ;;  %v1329_v50 = vld [vmem:[#allocation9 + $0xc90] sm:$0xff]  ;;  %v1330_v52 = vld [vmem:[#allocation9 + $0xc98] sm:$0xff] }
 0x23b   :  { %1592 = vmatpush.msrb.mxu3 %v1430_v11  ;;  %1560 = vmatpush.msrb.mxu1 %v1397_v51  ;;  %v1313_v11 = vld [vmem:[#allocation9 + $0xc10] sm:$0xff]  ;;  %v1720_v51 = vld [vmem:[#allocation9 + $0x11e8] sm:$0xff] }
 0x23c   :  { %1530 = vmatpush.msrb.mxu0 %v1373_v54  ;;  %1570 = vmatpush.msrb.mxu2 %v1374_v56  ;;  %v1325_v54 = vld [vmem:[#allocation9 + $0xc70] sm:$0xff] }
 0x23d   :  { %1593 = vmatpush.msrb.mxu3 %v1426_v17  ;;  %v1393_v56 = vld [vmem:[#allocation9 + $0xe90] sm:$0xff] }
 0x23e   :  { %1531 = vmatpush.msrb.mxu0 %v1369_v59  ;;  %1571 = vmatpush.msrb.mxu2 %v1370_v63  ;;  %v1394_v59 = vld [vmem:[#allocation9 + $0xe98] sm:$0xff] }
 0x23f   :  { %1594 = vmatpush.msrb.mxu3 %v1422_v22  ;;  %1561 = vmatpush.msrb.mxu1 %v1393_v56  ;;  %v1779_v56 = vld [vmem:[#allocation9 + $0x13c0] sm:$0xff] }
 0x240   :  { %1532 = vmatpush.msrb.mxu0 %v1365_v62  ;;  %1572 = vmatpush.msrb.mxu2 %v1366_v4  ;;  %v1322_v62 = vld [vmem:[#allocation9 + $0xc58] sm:$0xff] }
 0x241   :  { %1595 = vmatpush.msrb.mxu3 %v1418_v29  ;;  %1562 = vmatpush.msrb.mxu1 %v1389_v1  ;;  %v1784_v29 = vld [vmem:[#allocation9 + $0x13e8] sm:$0xff]  ;;  %v1703_v1 = vld [vmem:[#allocation9 + $0x1160] sm:$0xff] }
 0x242   :  { %1533 = vmatpush.msrb.mxu0 %v1361_v2  ;;  %1573 = vmatpush.msrb.mxu2 %v1362_v9  ;;  %v1386_v9 = vld [vmem:[#allocation9 + $0xe58] sm:$0xff] }
 0x243   :  { %1596 = vmatpush.msrb.mxu3 %v1414_v32 }
 0x244   :  { %1534 = vmatpush.msrb.mxu0 %v1357_v12  ;;  %1574 = vmatpush.msrb.mxu2 %v1358_v14  ;;  %v1381_v12 = vld [vmem:[#allocation9 + $0xe30] sm:$0xff] }
 0x245   :  { %1597 = vmatpush.msrb.mxu3 %v1410_v38 }
 0x246   :  { %1535 = vmatpush.msrb.mxu0 %v1353_v18  ;;  %1575 = vmatpush.msrb.mxu2 %v1354_v20 }
 0x247   :  { %1598 = vmatpush.msrb.mxu3 %v1406_v43 }
 0x248   :  { %1536 = vmatpush.msrb.mxu0 %v1349_v25  ;;  %1576 = vmatpush.msrb.mxu2 %v1350_v27  ;;  %v1783_v25 = vld [vmem:[#allocation9 + $0x13e0] sm:$0xff] }
 0x249   :  { %1599 = vmatpush.msrb.mxu3 %v1402_v49 }
 0x24a   :  { %1537 = vmatpush.msrb.mxu0 %v1345_v55  ;;  %1577 = vmatpush.msrb.mxu2 %v1346_v31 }
 0x24b   :  { %1600 = vmatpush.msrb.mxu3 %v1398_v53  ;;  %v1716_v53 = vld [vmem:[#allocation9 + $0x11c8] sm:$0xff] }
 0x24c   :  { %1538 = vmatpush.msrb.mxu0 %v1341_v33  ;;  %1578 = vmatpush.msrb.mxu2 %v1342_v36 }
 0x24d   :  { %1601 = vmatpush.msrb.mxu3 %v1394_v59  ;;  %v1775_v59 = vld [vmem:[#allocation9 + $0x13a0] sm:$0xff] }
 0x24e   :  { %1539 = vmatpush.msrb.mxu0 %v1337_v39  ;;  %1579 = vmatpush.msrb.mxu2 %v1338_v41 }
 0x24f   :  { %1526 = vmatmul.f32.vlgmr.msra.gmra.mxu3 %v2918_v60 }
 0x250   :  { %1540 = vmatpush.msrb.mxu0 %v1333_v45  ;;  %1580 = vmatpush.msrb.mxu2 %v1334_v35 }
 0x251   :  { %1602 = vmatpush.msrb.mxu3 %v1390_v3  ;;  %v1704_v3 = vld [vmem:[#allocation9 + $0x1168] sm:$0xff] }
 0x252   :  { %1541 = vmatpush.msrb.mxu0 %v1329_v50  ;;  %1581 = vmatpush.msrb.mxu2 %v1330_v52  ;;  %v1719_v50 = vld [vmem:[#allocation9 + $0x11e0] sm:$0xff] }
 0x253   :  { %1603 = vmatpush.msrb.mxu3 %v1386_v9  ;;  %v1715_v52 = vld [vmem:[#allocation9 + $0x11c0] sm:$0xff] }
 0x254   :  { %1542 = vmatpush.msrb.mxu0 %v1325_v54  ;;  %1582 = vmatpush.msrb.mxu2 %v1326_v57  ;;  %v1711_v54 = vld [vmem:[#allocation9 + $0x11a0] sm:$0xff]  ;;  %v1712_v57 = vld [vmem:[#allocation9 + $0x11a8] sm:$0xff] }
 0x255   :  { %v1763_v9 = vld [vmem:[#allocation9 + $0x1340] sm:$0xff] }
 0x256   :  { %1583 = vmatpush.msrb.mxu2 %v1322_v62  ;;  %v1771_v62 = vld [vmem:[#allocation9 + $0x1380] sm:$0xff] }
 0x258   :  { %1584 = vmatpush.msrb.mxu2 %v1318_v8  ;;  %v1695_v8 = vld [vmem:[#allocation9 + $0x1120] sm:$0xff] }
 0x26e   :  { %v1219_v55 = vpop.f32.mrf.mxu1 }
 0x298   :  { %v1119_v6 = vpop.f32.mrf.mxu0 }
 0x299   :  { %v1120_v10 = vadd.f32 %v1119_v6, %v1094_v0  ;;  %v1321_v0 = vld [vmem:[#allocation9 + $0xc50] sm:$0xff] }
 0x29a   :  { %v1385_v6 = vld [vmem:[#allocation9 + $0xe50] sm:$0xff]  ;;  %1543 = vmatpush.msrb.mxu0 %v1321_v0  ;;  %v1776_v0 = vld [vmem:[#allocation9 + $0x13a8] sm:$0xff] }
 0x29b   :  { %v1140_v15 = vadd.f32 %v1139_v7, %v1120_v10  ;;  %v1097_v7 = vperm.slane %v2911_v48, 3  ;;  %1563 = vmatpush.msrb.mxu1 %v1385_v6  ;;  %v1767_v6 = vld [vmem:[#allocation9 + $0x1360] sm:$0xff] }
 0x29c   :  { %1544 = vmatpush.msrb.mxu0 %v1317_v61  ;;  %v1699_v61 = vld [vmem:[#allocation9 + $0x1140] sm:$0xff] }
 0x29d   :  { %v2157_v21 = vmul.f32 -1.442695, %v1140_v15  ;;  %v1314_v15 = vld [vmem:[#allocation9 + $0xc18] sm:$0xff]  ;;  %1564 = vmatpush.msrb.mxu1 %v1381_v12  ;;  %v1691_v12 = vld [vmem:[#allocation9 + $0x1100] sm:$0xff] }
 0x29e   :  { %v1159_v23 = vpop.f32.mrf.mxu2  ;;  %1545 = vmatpush.msrb.mxu0 %v1313_v11  ;;  %1585 = vmatpush.msrb.mxu2 %v1314_v15  ;;  %v1764_v11 = vld [vmem:[#allocation9 + $0x1348] sm:$0xff] }
 0x29f   :  { %2214 = vpow2.f32 %v2157_v21  ;;  %v1160_v28 = vadd.f32 %v1159_v23, %v1095_v16  ;;  %v1382_v16 = vld [vmem:[#allocation9 + $0xe38] sm:$0xff]  ;;  %1565 = vmatpush.msrb.mxu1 %v1377_v19  ;;  %v1760_v15 = vld [vmem:[#allocation9 + $0x1328] sm:$0xff] }
 0x2a0   :  { %v1199_v17 = vpop.f32.mrf.mxu0  ;;  %v1378_v23 = vld [vmem:[#allocation9 + $0xe18] sm:$0xff]  ;;  %1604 = vmatpush.msrb.mxu3 %v1382_v16  ;;  %1566 = vmatmul.f32.vlgmr.msrb.gmra.mxu1 %v2918_v60  ;;  %v1687_v16 = vld [vmem:[#allocation9 + $0x10e0] sm:$0xff]  ;;  %v1756_v19 = vld [vmem:[#allocation9 + $0x1308] sm:$0xff] }
 0x2a1   :  { %v1180_v44 = vadd.f32 %v1179_v24, %v1160_v28  ;;  %v1259_v24 = vpop.f32.mrf.mxu3  ;;  %v1200_v27 = vadd.f32 %v1199_v17, %v1096_v13  ;;  %1818 = vmatpush.msra.mxu1 %v1783_v25  ;;  %v1759_v13 = vld [vmem:[#allocation9 + $0x1320] sm:$0xff]  ;;  %v1680_v25 = vld [vmem:[#allocation9 + $0x10a8] sm:$0xff] }
 0x2a2   :  { %1605 = vmatpush.msrb.mxu3 %v1378_v23  ;;  %v1755_v17 = vld [vmem:[#allocation9 + $0x1300] sm:$0xff]  ;;  %v1752_v23 = vld [vmem:[#allocation9 + $0x12e8] sm:$0xff] }
 0x2a3   :  { %v2158_v37 = vmul.f32 -1.442695, %v1180_v44  ;;  %1606 = vmatmul.f32.vlgmr.msrb.gmra.mxu3 %v2918_v60  ;;  %v1220_v34 = vadd.f32 %v1219_v55, %v1200_v27  ;;  %1819 = vmatpush.msra.mxu1 %v1779_v56  ;;  %v1675_v27 = vld [vmem:[#allocation9 + $0x1080] sm:$0xff]  ;;  %v1744_v55 = vld [vmem:[#allocation9 + $0x12a8] sm:$0xff] }
 0x2a4   :  { %1858 = vmatpush.msra.mxu3 %v1784_v29  ;;  %v1676_v29 = vld [vmem:[#allocation9 + $0x1088] sm:$0xff] }
 0x2a5   :  { %v2215_v42 = vpop.eup %2214  ;;  %2216 = vpow2.f32 %v2158_v37  ;;  %1820 = vmatpush.msra.mxu1 %v1775_v59  ;;  %v1714_v59 = vld [vmem:[#allocation9 + $0x11b8] sm:$0xff] }
 0x2a6   :  { %v2915_v47 = vadd.f32 1.0, %v2215_v42  ;;  %v1239_v10 = vpop.f32.mrf.mxu2 }
 0x2a7   :  { %v1240_v20 = vadd.f32 %v1239_v10, %v1097_v7  ;;  %1821 = vmatpush.msra.mxu1 %v1771_v62  ;;  %v1700_v7 = vld [vmem:[#allocation9 + $0x1148] sm:$0xff]  ;;  %v1709_v62 = vld [vmem:[#allocation9 + $0x1190] sm:$0xff] }
 0x2a8   :  { %2218 = vrcp.f32 %v2915_v47  ;;  %v1281_v18 = vand.u32 2147483648, %v2915_v47  ;;  %v1279_v22 = vand.u32 2147483647, %v2915_v47  ;;  %vm1275_vm1 = vweird.f32 %v2915_v47  ;;  %v1696_v10 = vld [vmem:[#allocation9 + $0x1128] sm:$0xff] }
 0x2a9   :  { %v1260_v44 = vadd.f32 %v1259_v24, %v1240_v20  ;;  %1822 = vmatpush.msra.mxu1 %v1767_v6  ;;  %v1683_v20 = vld [vmem:[#allocation9 + $0x10c0] sm:$0xff]  ;;  %v1778_v6 = vld [vmem:[#allocation9 + $0x13b8] sm:$0xff] }
 0x2aa   :  { %v1282_v30 = vor.u32 1.1754944e-38, %v1281_v18  ;;  %vm1280_vm3 = vcmp.eq.f32.partialorder %v1279_v22, 8.507059e+37  ;;  %v1688_v18 = vld [vmem:[#allocation9 + $0x10e8] sm:$0xff]  ;;  %v1747_v24 = vld [vmem:[#allocation9 + $0x12c0] sm:$0xff] }
 0x2ab   :  { %v2217_v58 = vpop.eup %2216  ;;  %1823 = vmatpush.msra.mxu1 %v1763_v9  ;;  %v1684_v22 = vld [vmem:[#allocation9 + $0x10c8] sm:$0xff] }
 0x2ac   :  { %v2920_v63 = vadd.f32 1.0, %v2217_v58  ;;  %v1707_v58 = vld [vmem:[#allocation9 + $0x1180] sm:$0xff] }
 0x2ad   :  { %1824 = vmatpush.msra.mxu1 %v1759_v13  ;;  %v1769_v13 = vld [vmem:[#allocation9 + $0x1370] sm:$0xff] }
 0x2ae   :  { %v2219_v4 = vpop.eup %2218  ;;  %2220 = vrcp.f32 %v2920_v63  ;;  %v1296_v40 = vand.u32 2147483648, %v2920_v63  ;;  %vm1290_vm5 = vweird.f32 %v2920_v63  ;;  %v1294_v41 = vand.u32 2147483647, %v2920_v63 }
 0x2af   :  { %v1271_v2 = vmul.f32 %v2219_v4, %v2915_v47  ;;  %vm1276_vm0 = vweird.f32 %v2219_v4  ;;  %1825 = vmatpush.msra.mxu1 %v1755_v17 }
 0x2b0   :  { %vm1277_vm2 = vmor %vm1275_vm1, %vm1276_vm0  ;;  %v1297_v45 = vor.u32 1.1754944e-38, %v1296_v40  ;;  %vm1295_vm7 = vcmp.eq.f32.partialorder %v1294_v41, 8.507059e+37  ;;  %v1664_v40 = vld [vmem:[#allocation9 + $0x1028] sm:$0xff] }
 0x2b1   :  { %v1272_v14 = vsub.f32 1.0, %v1271_v2  ;;  %v1768_v2 = vld [vmem:[#allocation9 + $0x1368] sm:$0xff] }
 0x2b2   :  { %v2939_v41 = vld [vmem:[#allocation11 + $0xc] sm:$0xf] }
 0x2b3   :  { %v1273_v21 = vmul.f32 %v2219_v4, %v1272_v14  ;;  %v1692_v14 = vld [vmem:[#allocation9 + $0x1108] sm:$0xff]  ;;  %v1442_v56 = vperm.slane %v2939_v41, 0 }
 0x2b4   :  { %v2221_v48 = vpop.eup %2220 }
 0x2b5   :  { %v1286_v26 = vmul.f32 %v2221_v48, %v2920_v63  ;;  %v1274_v28 = vadd.f32 %v2219_v4, %v1273_v21  ;;  %vm1291_vm4 = vweird.f32 %v2221_v48  ;;  %v1708_v63 = vld [vmem:[#allocation9 + $0x1188] sm:$0xff]  ;;  %v1751_v21 = vld [vmem:[#allocation9 + $0x12e0] sm:$0xff] }
 0x2b6   :  { %vm1292_vm6 = vmor %vm1290_vm5, %vm1291_vm4  ;;  %1826 = vmatpush.msra.mxu1 %v1751_v21  ;;  %v1698_v21 = vld [vmem:[#allocation9 + $0x1138] sm:$0xff] }
 0x2b7   :  { %v1287_v31 = vsub.f32 1.0, %v1286_v26  ;;  %v1278_v32 = vsel %vm1277_vm2, %v2219_v4, %v1274_v28  ;;  %v1772_v4 = vld [vmem:[#allocation9 + $0x1388] sm:$0xff]  ;;  %v1743_v28 = vld [vmem:[#allocation9 + $0x12a0] sm:$0xff] }
 0x2b8   :  { %v1283_v33 = vsel %vm1280_vm3, %v1282_v30, %v1278_v32  ;;  %1827 = vmatpush.msra.mxu1 %v1747_v24  ;;  %v1748_v26 = vld [vmem:[#allocation9 + $0x12c8] sm:$0xff]  ;;  %v1671_v30 = vld [vmem:[#allocation9 + $0x1060] sm:$0xff]  ;;  %v1761_v24 = vld [vmem:[#allocation9 + $0x1330] sm:$0xff] }
 0x2b9   :  { %v1300_v36 = vmul.f32 %v1283_v33, %v1260_v44  ;;  %v1288_v37 = vmul.f32 %v2221_v48, %v1287_v31  ;;  %v1739_v31 = vld [vmem:[#allocation9 + $0x1280] sm:$0xff]  ;;  %v1672_v44 = vld [vmem:[#allocation9 + $0x1068] sm:$0xff] }
 0x2ba   :  { %1828 = vmatpush.msra.mxu1 %v1743_v28  ;;  %v1740_v32 = vld [vmem:[#allocation9 + $0x1288] sm:$0xff]  ;;  %v1667_v33 = vld [vmem:[#allocation9 + $0x1040] sm:$0xff]  ;;  %v1689_v28 = vld [vmem:[#allocation9 + $0x10f0] sm:$0xff] }
 0x2bb   :  { %v1301_v38 = vadd.f32 %v1300_v36, %v1220_v34  ;;  %v1289_v39 = vadd.f32 %v2221_v48, %v1288_v37  ;;  %v1735_v34 = vld [vmem:[#allocation9 + $0x1260] sm:$0xff]  ;;  %v1668_v36 = vld [vmem:[#allocation9 + $0x1048] sm:$0xff] }
 0x2bc   :  { %1829 = vmatpush.msra.mxu1 %v1739_v31  ;;  %v1736_v37 = vld [vmem:[#allocation9 + $0x1268] sm:$0xff]  ;;  %v1758_v31 = vld [vmem:[#allocation9 + $0x1318] sm:$0xff] }
 0x2bd   :  { %2222 = vtanh.f32 %v1301_v38  ;;  %v1293_v42 = vsel %vm1292_vm6, %v2221_v48, %v1289_v39  ;;  %v1679_v48 = vld [vmem:[#allocation9 + $0x10a0] sm:$0xff] }
 0x2be   :  { %v1298_v47 = vsel %vm1295_vm7, %v1297_v45, %v1293_v42  ;;  %1830 = vmatpush.msra.mxu1 %v1735_v34  ;;  %v1663_v38 = vld [vmem:[#allocation9 + $0x1020] sm:$0xff]  ;;  %v1732_v42 = vld [vmem:[#allocation9 + $0x1248] sm:$0xff] }
 0x2bf   :  { %v1731_v39 = vld [vmem:[#allocation9 + $0x1240] sm:$0xff] }
 0x2c0   :  { %1831 = vmatpush.msra.mxu1 %v1731_v39  ;;  %v1727_v45 = vld [vmem:[#allocation9 + $0x1220] sm:$0xff] }
 0x2c2   :  { %1832 = vmatpush.msra.mxu1 %v1727_v45  ;;  %v1745_v45 = vld [vmem:[#allocation9 + $0x12b0] sm:$0xff] }
 0x2c3   :  { %v2223_v43 = vpop.eup %2222 }
 0x2c4   :  { %v1303_v46 = vsub.f32 %v2890_v5, %v2223_v43  ;;  %v1780_v5 = vld [vmem:[#allocation9 + $0x13c8] sm:$0xff] }
 0x2c5   :  { %1859 = vmatpush.msra.mxu3 %v1780_v5  ;;  %v1713_v5 = vld [vmem:[#allocation9 + $0x11b0] sm:$0xff] }
 0x2c6   :  { %v1304_v35 = vmul.f32 %v1303_v46, %v1298_v47  ;;  %v1660_v46 = vld [vmem:[#allocation9 + $0x1008] sm:$0xff] }
 0x2c7   :  { %1860 = vmatpush.msra.mxu3 %v1776_v0  ;;  %v1728_v47 = vld [vmem:[#allocation9 + $0x1228] sm:$0xff] }
 0x2c8   :  { %v1305_v49 = vadd.f32 %v2223_v43, %v1304_v35  ;;  %v1659_v43 = vld [vmem:[#allocation9 + $0x1000] sm:$0xff]  ;;  %v1721_v35 = vld [vmem:[#allocation9 + $0x11f0] sm:$0xff] }
 0x2c9   :  { %1861 = vmatpush.msra.mxu3 %v1772_v4  ;;  %v1710_v4 = vld [vmem:[#allocation9 + $0x1198] sm:$0xff] }
 0x2ca   :  { %1466 = vmatmul.f32.vlgmr.msra.gmra.mxu0 %v1305_v49  ;;  %1307 = vst [vmem:[#allocation16 + $0x10] sm:$0xff] %v1305_v49  ;;  %1506 = vmatmul.f32.vlgmr.msra.gmra.mxu2 %v1305_v49 }
 0x2cb   :  { %1798 = vmatpush.msra.mxu0 %v1719_v50  ;;  %1838 = vmatpush.msra.mxu2 %v1720_v51  ;;  %v1723_v50 = vld [vmem:[#allocation9 + $0x1200] sm:$0xff]  ;;  %v1724_v51 = vld [vmem:[#allocation9 + $0x1208] sm:$0xff] }
 0x2cc   :  { %1862 = vmatpush.msra.mxu3 %v1768_v2  ;;  %1833 = vmatpush.msra.mxu1 %v1723_v50  ;;  %v1773_v2 = vld [vmem:[#allocation9 + $0x1390] sm:$0xff]  ;;  %v1674_v50 = vld [vmem:[#allocation9 + $0x1078] sm:$0xff] }
 0x2cd   :  { %1799 = vmatpush.msra.mxu0 %v1715_v52  ;;  %1839 = vmatpush.msra.mxu2 %v1716_v53  ;;  %v1717_v52 = vld [vmem:[#allocation9 + $0x11d0] sm:$0xff] }
 0x2ce   :  { %1863 = vmatpush.msra.mxu3 %v1764_v11  ;;  %v1785_v53 = vld [vmem:[#allocation9 + $0x13f0] sm:$0xff]  ;;  %v1774_v11 = vld [vmem:[#allocation9 + $0x1398] sm:$0xff] }
 0x2cf   :  { %1800 = vmatpush.msra.mxu0 %v1711_v54  ;;  %1840 = vmatpush.msra.mxu2 %v1712_v57  ;;  %v1718_v54 = vld [vmem:[#allocation9 + $0x11d8] sm:$0xff] }
 0x2d0   :  { %1864 = vmatpush.msra.mxu3 %v1760_v15  ;;  %v1786_v57 = vld [vmem:[#allocation9 + $0x13f8] sm:$0xff]  ;;  %1898 = vmatpush.msrb.mxu1 %v1785_v53 }
 0x2d1   :  { %1801 = vmatpush.msra.mxu0 %v1707_v58  ;;  %1841 = vmatpush.msra.mxu2 %v1708_v63  ;;  %v1781_v58 = vld [vmem:[#allocation9 + $0x13d0] sm:$0xff]  ;;  %v1782_v63 = vld [vmem:[#allocation9 + $0x13d8] sm:$0xff] }
 0x2d2   :  { %1546 = vmatmul.f32.vlgmr.msrb.gmra.mxu0 %v1305_v49  ;;  %1586 = vmatmul.f32.vlgmr.msrb.gmra.mxu2 %v1305_v49  ;;  %v1722_v49 = vld [vmem:[#allocation9 + $0x11f8] sm:$0xff] }
 0x2d3   :  { %1802 = vmatpush.msra.mxu0 %v1703_v1  ;;  %1842 = vmatpush.msra.mxu2 %v1704_v3  ;;  %v1487_v1 = vpop.f32.mrf.mxu1  ;;  %v1777_v3 = vld [vmem:[#allocation9 + $0x13b0] sm:$0xff]  ;;  %v2946_v53 = vld [vmem:[#allocation8 + $0x20] sm:$0xff] }
 0x2d4   :  { %1865 = vmatpush.msra.mxu3 %v1756_v19  ;;  %1899 = vmatpush.msrb.mxu1 %v1781_v58  ;;  %v1697_v19 = vld [vmem:[#allocation9 + $0x1130] sm:$0xff]  ;;  %v1738_v58 = vld [vmem:[#allocation9 + $0x1278] sm:$0xff] }
 0x2d5   :  { %1803 = vmatpush.msra.mxu0 %v1699_v61  ;;  %1843 = vmatpush.msra.mxu2 %v1700_v7  ;;  %v1705_v7 = vld [vmem:[#allocation9 + $0x1170] sm:$0xff] }
 0x2d6   :  { %1866 = vmatpush.msra.mxu3 %v1752_v23  ;;  %1900 = vmatpush.msrb.mxu1 %v1777_v3  ;;  %v1766_v23 = vld [vmem:[#allocation9 + $0x1358] sm:$0xff] }
 0x2d7   :  { %1804 = vmatpush.msra.mxu0 %v1695_v8  ;;  %1844 = vmatpush.msra.mxu2 %v1696_v10  ;;  %v1706_v8 = vld [vmem:[#allocation9 + $0x1178] sm:$0xff]  ;;  %v1443_v10 = vperm.slane %v2939_v41, 1 }
 0x2d8   :  { %1867 = vmatpush.msra.mxu3 %v1748_v26  ;;  %1901 = vmatpush.msrb.mxu1 %v1773_v2  ;;  %v1666_v3 = vld [vmem:[#allocation9 + $0x1038] sm:$0xff]  ;;  %v1444_v2 = vperm.slane %v2939_v41, 2 }
 0x2d9   :  { %1805 = vmatpush.msra.mxu0 %v1691_v12  ;;  %1845 = vmatpush.msra.mxu2 %v1692_v14  ;;  %v1701_v12 = vld [vmem:[#allocation9 + $0x1150] sm:$0xff]  ;;  %v1702_v14 = vld [vmem:[#allocation9 + $0x1158] sm:$0xff] }
 0x2da   :  { %1868 = vmatpush.msra.mxu3 %v1744_v55  ;;  %1902 = vmatpush.msrb.mxu1 %v1769_v13  ;;  %v1690_v55 = vld [vmem:[#allocation9 + $0x10f8] sm:$0xff]  ;;  %v1725_v13 = vld [vmem:[#allocation9 + $0x1210] sm:$0xff] }
 0x2db   :  { %1806 = vmatpush.msra.mxu0 %v1687_v16  ;;  %1846 = vmatpush.msra.mxu2 %v1688_v18  ;;  %v1770_v16 = vld [vmem:[#allocation9 + $0x1378] sm:$0xff]  ;;  %v1527_v18 = vpop.f32.mrf.mxu3 }
 0x2dc   :  { %1869 = vmatpush.msra.mxu3 %v1740_v32  ;;  %v1753_v32 = vld [vmem:[#allocation9 + $0x12f0] sm:$0xff]  ;;  %1834 = vmatmul.f32.vlgmr.msra.gmra.mxu1 %v2946_v53 }
 0x2dd   :  { %1807 = vmatpush.msra.mxu0 %v1683_v20  ;;  %1847 = vmatpush.msra.mxu2 %v1684_v22  ;;  %v1765_v20 = vld [vmem:[#allocation9 + $0x1350] sm:$0xff] }
 0x2de   :  { %1870 = vmatpush.msra.mxu3 %v1736_v37  ;;  %1903 = vmatpush.msrb.mxu1 %v1765_v20  ;;  %v1681_v37 = vld [vmem:[#allocation9 + $0x10b0] sm:$0xff] }
 0x2df   :  { %1808 = vmatpush.msra.mxu0 %v1679_v48  ;;  %1848 = vmatpush.msra.mxu2 %v1680_v25  ;;  %v1693_v48 = vld [vmem:[#allocation9 + $0x1110] sm:$0xff]  ;;  %v1694_v25 = vld [vmem:[#allocation9 + $0x1118] sm:$0xff] }
 0x2e0   :  { %1871 = vmatpush.msra.mxu3 %v1732_v42  ;;  %1904 = vmatpush.msrb.mxu1 %v1761_v24  ;;  %v1750_v42 = vld [vmem:[#allocation9 + $0x12d8] sm:$0xff] }
 0x2e1   :  { %1809 = vmatpush.msra.mxu0 %v1675_v27  ;;  %1849 = vmatpush.msra.mxu2 %v1676_v29  ;;  %v1762_v27 = vld [vmem:[#allocation9 + $0x1338] sm:$0xff]  ;;  %v1757_v29 = vld [vmem:[#allocation9 + $0x1310] sm:$0xff] }
 0x2e2   :  { %1872 = vmatpush.msra.mxu3 %v1728_v47  ;;  %1905 = vmatpush.msrb.mxu1 %v1757_v29  ;;  %v1746_v47 = vld [vmem:[#allocation9 + $0x12b8] sm:$0xff] }
 0x2e3   :  { %1810 = vmatpush.msra.mxu0 %v1671_v30  ;;  %1850 = vmatpush.msra.mxu2 %v1672_v44  ;;  %v1685_v44 = vld [vmem:[#allocation9 + $0x10d0] sm:$0xff] }
 0x2e4   :  { %1873 = vmatpush.msra.mxu3 %v1724_v51  ;;  %1906 = vmatpush.msrb.mxu1 %v1753_v32 }
 0x2e5   :  { %1811 = vmatpush.msra.mxu0 %v1667_v33  ;;  %1851 = vmatpush.msra.mxu2 %v1668_v36  ;;  %v1686_v33 = vld [vmem:[#allocation9 + $0x10d8] sm:$0xff] }
 0x2e6   :  { %1938 = vmatpush.msrb.mxu3 %v1786_v57  ;;  %v1754_v36 = vld [vmem:[#allocation9 + $0x12f8] sm:$0xff]  ;;  %v1737_v57 = vld [vmem:[#allocation9 + $0x1270] sm:$0xff] }
 0x2e7   :  { %1812 = vmatpush.msra.mxu0 %v1663_v38  ;;  %1852 = vmatpush.msra.mxu2 %v1664_v40  ;;  %v1749_v38 = vld [vmem:[#allocation9 + $0x12d0] sm:$0xff]  ;;  %v1682_v40 = vld [vmem:[#allocation9 + $0x10b8] sm:$0xff] }
 0x2e8   :  { %1939 = vmatpush.msrb.mxu3 %v1782_v63  ;;  %1907 = vmatpush.msrb.mxu1 %v1749_v38  ;;  %v1665_v63 = vld [vmem:[#allocation9 + $0x1030] sm:$0xff] }
 0x2e9   :  { %1813 = vmatpush.msra.mxu0 %v1659_v43  ;;  %1853 = vmatpush.msra.mxu2 %v1660_v46  ;;  %v1677_v43 = vld [vmem:[#allocation9 + $0x1090] sm:$0xff]  ;;  %v1678_v46 = vld [vmem:[#allocation9 + $0x1098] sm:$0xff] }
 0x2ea   :  { %1940 = vmatpush.msrb.mxu3 %v1778_v6  ;;  %1908 = vmatpush.msrb.mxu1 %v1745_v45  ;;  %v1661_v6 = vld [vmem:[#allocation9 + $0x1010] sm:$0xff] }
 0x2eb   :  { %1878 = vmatpush.msrb.mxu0 %v1721_v35  ;;  %1918 = vmatpush.msrb.mxu2 %v1722_v49  ;;  %v1673_v35 = vld [vmem:[#allocation9 + $0x1070] sm:$0xff] }
 0x2ec   :  { %1941 = vmatpush.msrb.mxu3 %v1774_v11  ;;  %v1741_v49 = vld [vmem:[#allocation9 + $0x1290] sm:$0xff] }
 0x2ed   :  { %1879 = vmatpush.msrb.mxu0 %v1717_v52  ;;  %1919 = vmatpush.msrb.mxu2 %v1718_v54  ;;  %v1742_v52 = vld [vmem:[#allocation9 + $0x1298] sm:$0xff] }
 0x2ee   :  { %1942 = vmatpush.msrb.mxu3 %v1770_v16  ;;  %1909 = vmatpush.msrb.mxu1 %v1741_v49  ;;  %v2016_v45 = vld [vmem:[#allocation12 + $0x60] sm:$0xff]  ;;  %v2013_v49 = vld [vmem:[#allocation12 + $0x48] sm:$0xff] }
 0x2ef   :  { %1880 = vmatpush.msrb.mxu0 %v1713_v5  ;;  %1920 = vmatpush.msrb.mxu2 %v1714_v59  ;;  %v1670_v5 = vld [vmem:[#allocation9 + $0x1058] sm:$0xff] }
 0x2f0   :  { %1943 = vmatpush.msrb.mxu3 %v1766_v23  ;;  %1910 = vmatpush.msrb.mxu1 %v1737_v57 }
 0x2f1   :  { %1881 = vmatpush.msrb.mxu0 %v1709_v62  ;;  %1921 = vmatpush.msrb.mxu2 %v1710_v4  ;;  %v1734_v4 = vld [vmem:[#allocation9 + $0x1258] sm:$0xff] }
 0x2f2   :  { %1944 = vmatpush.msrb.mxu3 %v1762_v27 }
 0x2f3   :  { %1882 = vmatpush.msrb.mxu0 %v1705_v7  ;;  %1922 = vmatpush.msrb.mxu2 %v1706_v8  ;;  %v1729_v7 = vld [vmem:[#allocation9 + $0x1230] sm:$0xff] }
 0x2f4   :  { %1945 = vmatpush.msrb.mxu3 %v1758_v31 }
 0x2f5   :  { %1883 = vmatpush.msrb.mxu0 %v1701_v12  ;;  %1923 = vmatpush.msrb.mxu2 %v1702_v14 }
 0x2f6   :  { %1946 = vmatpush.msrb.mxu3 %v1754_v36 }
 0x2f7   :  { %1884 = vmatpush.msrb.mxu0 %v1697_v19  ;;  %1924 = vmatpush.msrb.mxu2 %v1698_v21 }
 0x2f8   :  { %1947 = vmatpush.msrb.mxu3 %v1750_v42  ;;  %v2018_v42 = vld [vmem:[#allocation12 + $0x70] sm:$0xff] }
 0x2f9   :  { %1885 = vmatpush.msrb.mxu0 %v1693_v48  ;;  %1925 = vmatpush.msrb.mxu2 %v1694_v25 }
 0x2fa   :  { %1948 = vmatpush.msrb.mxu3 %v1746_v47  ;;  %v2015_v47 = vld [vmem:[#allocation12 + $0x58] sm:$0xff] }
 0x2fb   :  { %1886 = vmatpush.msrb.mxu0 %v1689_v28  ;;  %1926 = vmatpush.msrb.mxu2 %v1690_v55 }
 0x2fc   :  { %1949 = vmatpush.msrb.mxu3 %v1742_v52  ;;  %v2012_v52 = vld [vmem:[#allocation12 + $0x40] sm:$0xff] }
 0x2fd   :  { %1887 = vmatpush.msrb.mxu0 %v1685_v44  ;;  %1927 = vmatpush.msrb.mxu2 %v1686_v33 }
 0x2fe   :  { %1874 = vmatmul.f32.vlgmr.msra.gmra.mxu3 %v2946_v53 }
 0x2ff   :  { %1888 = vmatpush.msrb.mxu0 %v1681_v37  ;;  %1928 = vmatpush.msrb.mxu2 %v1682_v40  ;;  %v2019_v40 = vld [vmem:[#allocation12 + $0x78] sm:$0xff] }
 0x300   :  { %1950 = vmatpush.msrb.mxu3 %v1738_v58  ;;  %v2010_v58 = vld [vmem:[#allocation12 + $0x30] sm:$0xff] }
 0x301   :  { %1889 = vmatpush.msrb.mxu0 %v1677_v43  ;;  %1929 = vmatpush.msrb.mxu2 %v1678_v46  ;;  %v2017_v43 = vld [vmem:[#allocation12 + $0x68] sm:$0xff]  ;;  %v1788_v46 = vld [vmem:[#allocation11 + $0x10] sm:$0xf] }
 0x302   :  { %1951 = vmatpush.msrb.mxu3 %v1734_v4  ;;  %v2007_v4 = vld [vmem:[#allocation12 + $0x18] sm:$0xff] }
 0x303   :  { %1890 = vmatpush.msrb.mxu0 %v1673_v35  ;;  %1930 = vmatpush.msrb.mxu2 %v1674_v50  ;;  %v1790_v35 = vperm.slane %v1788_v46, 0 }
 0x305   :  { %1931 = vmatpush.msrb.mxu2 %v1670_v5  ;;  %v1791_v5 = vperm.slane %v1788_v46, 1 }
 0x307   :  { %1932 = vmatpush.msrb.mxu2 %v1666_v3 }
 0x347   :  { %v1467_v0 = vpop.f32.mrf.mxu0 }
 0x348   :  { %v1468_v61 = vadd.f32 %v1467_v0, %v1442_v56  ;;  %v1669_v56 = vld [vmem:[#allocation9 + $0x1050] sm:$0xff] }
 0x349   :  { %v1733_v0 = vld [vmem:[#allocation9 + $0x1250] sm:$0xff]  ;;  %1891 = vmatpush.msrb.mxu0 %v1669_v56 }
 0x34a   :  { %v1488_v9 = vadd.f32 %v1487_v1, %v1468_v61  ;;  %v1445_v1 = vperm.slane %v2939_v41, 3  ;;  %1911 = vmatpush.msrb.mxu1 %v1733_v0  ;;  %v2011_v56 = vld [vmem:[#allocation12 + $0x38] sm:$0xff] }
 0x34b   :  { %1892 = vmatpush.msrb.mxu0 %v1665_v63  ;;  %v2009_v63 = vld [vmem:[#allocation12 + $0x28] sm:$0xff] }
 0x34c   :  { %v2159_v15 = vmul.f32 -1.442695, %v1488_v9  ;;  %v1662_v9 = vld [vmem:[#allocation9 + $0x1018] sm:$0xff]  ;;  %1912 = vmatpush.msrb.mxu1 %v1729_v7 }
 0x34d   :  { %v1507_v17 = vpop.f32.mrf.mxu2  ;;  %1893 = vmatpush.msrb.mxu0 %v1661_v6  ;;  %1933 = vmatpush.msrb.mxu2 %v1662_v9  ;;  %v2006_v6 = vld [vmem:[#allocation12 + $0x10] sm:$0xff] }
 0x34e   :  { %2224 = vpow2.f32 %v2159_v15  ;;  %v1508_v22 = vadd.f32 %v1507_v17, %v1443_v10  ;;  %v1730_v10 = vld [vmem:[#allocation9 + $0x1238] sm:$0xff]  ;;  %1913 = vmatpush.msrb.mxu1 %v1725_v13 }
 0x34f   :  { %v1547_v11 = vpop.f32.mrf.mxu0  ;;  %v1726_v17 = vld [vmem:[#allocation9 + $0x1218] sm:$0xff]  ;;  %1952 = vmatpush.msrb.mxu3 %v1730_v10  ;;  %1914 = vmatmul.f32.vlgmr.msrb.gmra.mxu1 %v2946_v53 }
 0x350   :  { %v1528_v26 = vadd.f32 %v1527_v18, %v1508_v22  ;;  %v1607_v18 = vpop.f32.mrf.mxu3  ;;  %v1548_v20 = vadd.f32 %v1547_v11, %v1444_v2  ;;  %v1567_v22 = vpop.f32.mrf.mxu1  ;;  %v2005_v2 = vld [vmem:[#allocation12 + $0x8] sm:$0xff]  ;;  %v2004_v10 = vld [vmem:[#allocation12] sm:$0xff] }
 0x351   :  { %1953 = vmatpush.msrb.mxu3 %v1726_v17  ;;  %v1792_v17 = vperm.slane %v1788_v46, 2 }
 0x352   :  { %v2160_v30 = vmul.f32 -1.442695, %v1528_v26  ;;  %1954 = vmatmul.f32.vlgmr.msrb.gmra.mxu3 %v2946_v53  ;;  %v1568_v27 = vadd.f32 %v1567_v22, %v1548_v20 }
 0x354   :  { %v2225_v34 = vpop.eup %2224  ;;  %2226 = vpow2.f32 %v2160_v30 }
 0x355   :  { %v2943_v39 = vadd.f32 1.0, %v2225_v34  ;;  %v1587_v61 = vpop.f32.mrf.mxu2 }
 0x356   :  { %v1588_v14 = vadd.f32 %v1587_v61, %v1445_v1 }
 0x357   :  { %2228 = vrcp.f32 %v2943_v39  ;;  %v1629_v12 = vand.u32 2147483648, %v2943_v39  ;;  %v1627_v16 = vand.u32 2147483647, %v2943_v39  ;;  %vm1623_vm9 = vweird.f32 %v2943_v39 }
 0x358   :  { %v1608_v24 = vadd.f32 %v1607_v18, %v1588_v14  ;;  %v1793_v14 = vperm.slane %v1788_v46, 3 }
 0x359   :  { %v1630_v23 = vor.u32 1.1754944e-38, %v1629_v12  ;;  %vm1628_vm11 = vcmp.eq.f32.partialorder %v1627_v16, 8.507059e+37 }
 0x35a   :  { %v2227_v51 = vpop.eup %2226 }
 0x35b   :  { %v2948_v54 = vadd.f32 1.0, %v2227_v51  ;;  %v1835_v51 = vpop.f32.mrf.mxu1 }
 0x35d   :  { %v2229_v59 = vpop.eup %2228  ;;  %2230 = vrcp.f32 %v2948_v54  ;;  %v1644_v31 = vand.u32 2147483648, %v2948_v54  ;;  %vm1638_vm13 = vweird.f32 %v2948_v54  ;;  %v1642_v44 = vand.u32 2147483647, %v2948_v54 }
 0x35e   :  { %v1619_v62 = vmul.f32 %v2229_v59, %v2943_v39  ;;  %vm1624_vm8 = vweird.f32 %v2229_v59 }
 0x35f   :  { %vm1625_vm10 = vmor %vm1623_vm9, %vm1624_vm8  ;;  %v1645_v34 = vor.u32 1.1754944e-38, %v1644_v31  ;;  %vm1643_vm15 = vcmp.eq.f32.partialorder %v1642_v44, 8.507059e+37 }
 0x360   :  { %v1620_v8 = vsub.f32 1.0, %v1619_v62  ;;  %v2008_v62 = vld [vmem:[#allocation12 + $0x20] sm:$0xff] }
 0x362   :  { %v1621_v15 = vmul.f32 %v2229_v59, %v1620_v8 }
 0x363   :  { %v2231_v41 = vpop.eup %2230 }
 0x364   :  { %v1634_v19 = vmul.f32 %v2231_v41, %v2948_v54  ;;  %v1622_v21 = vadd.f32 %v2229_v59, %v1621_v15  ;;  %vm1639_vm12 = vweird.f32 %v2231_v41 }
 0x365   :  { %vm1640_vm14 = vmor %vm1638_vm13, %vm1639_vm12 }
 0x366   :  { %v1635_v48 = vsub.f32 1.0, %v1634_v19  ;;  %v1626_v25 = vsel %vm1625_vm10, %v2229_v59, %v1622_v21 }
 0x367   :  { %v1631_v26 = vsel %vm1628_vm11, %v1630_v23, %v1626_v25 }
 0x368   :  { %v1648_v28 = vmul.f32 %v1631_v26, %v1608_v24  ;;  %v1636_v29 = vmul.f32 %v2231_v41, %v1635_v48 }
 0x36a   :  { %v1649_v55 = vadd.f32 %v1648_v28, %v1568_v27  ;;  %v1637_v30 = vadd.f32 %v2231_v41, %v1636_v29 }
 0x36c   :  { %2232 = vtanh.f32 %v1649_v55  ;;  %v1641_v32 = vsel %vm1640_vm14, %v2231_v41, %v1637_v30 }
 0x36d   :  { %v1646_v37 = vsel %vm1643_vm15, %v1645_v34, %v1641_v32 }
 0x372   :  { %v2233_v33 = vpop.eup %2232 }
 0x373   :  { %v1651_v36 = vsub.f32 %v2918_v60, %v2233_v33  ;;  %v2014_v60 = vld [vmem:[#allocation12 + $0x50] sm:$0xff] }
 0x375   :  { %v1652_v38 = vmul.f32 %v1651_v36, %v1646_v37 }
 0x377   :  { %v1653_v39 = vadd.f32 %v2233_v33, %v1652_v38 }
 0x379   :  { %1814 = vmatmul.f32.vlgmr.msra.gmra.mxu0 %v1653_v39  ;;  %1655 = vst [vmem:[#allocation16 + $0x18] sm:$0xff] %v1653_v39  ;;  %1854 = vmatmul.f32.vlgmr.msra.gmra.mxu2 %v1653_v39 }
 0x37a   :  { %2024 = vmatpush.msra.mxu0 %v2019_v40 }
 0x37c   :  { %2025 = vmatpush.msra.mxu0 %v2018_v42 }
 0x37e   :  { %2026 = vmatpush.msra.mxu0 %v2017_v43 }
 0x380   :  { %2027 = vmatpush.msra.mxu0 %v2016_v45 }
 0x381   :  { %1894 = vmatmul.f32.vlgmr.msrb.gmra.mxu0 %v1653_v39  ;;  %1934 = vmatmul.f32.vlgmr.msrb.gmra.mxu2 %v1653_v39  ;;  %v1875_v1 = vpop.f32.mrf.mxu3 }
 0x382   :  { %2028 = vmatpush.msra.mxu0 %v2015_v47 }
 0x384   :  { %2029 = vmatpush.msra.mxu0 %v2014_v60  ;;  %v2193_v60 = vld [vmem:[#allocation14] ss:$0 sm:$0xff] }
 0x386   :  { %2030 = vmatpush.msra.mxu0 %v2013_v49 }
 0x388   :  { %2031 = vmatpush.msra.mxu0 %v2012_v52 }
 0x38a   :  { %2032 = vmatpush.msra.mxu0 %v2011_v56 }
 0x38c   :  { %2033 = vmatpush.msra.mxu0 %v2010_v58 }
 0x38e   :  { %2034 = vmatpush.msra.mxu0 %v2009_v63 }
 0x390   :  { %2035 = vmatpush.msra.mxu0 %v2008_v62 }
 0x392   :  { %2036 = vmatpush.msra.mxu0 %v2007_v4 }
 0x394   :  { %2037 = vmatpush.msra.mxu0 %v2006_v6 }
 0x396   :  { %2038 = vmatpush.msra.mxu0 %v2005_v2 }
 0x398   :  { %2039 = vmatpush.msra.mxu0 %v2004_v10 }
 0x3cc   :  { %v1915_v27 = vpop.f32.mrf.mxu1 }
 0x3d5   :  { %v1955_v48 = vpop.f32.mrf.mxu3 }
 0x3f6   :  { %v1815_v50 = vpop.f32.mrf.mxu0 }
 0x3f7   :  { %v1816_v54 = vadd.f32 %v1815_v50, %v1790_v35 }
 0x3f9   :  { %v1836_v57 = vadd.f32 %v1835_v51, %v1816_v54 }
 0x3fb   :  { %v2161_v59 = vmul.f32 -1.442695, %v1836_v57 }
 0x3fc   :  { %v1855_v0 = vpop.f32.mrf.mxu2 }
 0x3fd   :  { %2234 = vpow2.f32 %v2161_v59  ;;  %v1856_v3 = vadd.f32 %v1855_v0, %v1791_v5 }
 0x3fe   :  { %v1895_v18 = vpop.f32.mrf.mxu0 }
 0x3ff   :  { %v1876_v61 = vadd.f32 %v1875_v1, %v1856_v3  ;;  %v1896_v25 = vadd.f32 %v1895_v18, %v1792_v17 }
 0x401   :  { %v2162_v7 = vmul.f32 -1.442695, %v1876_v61  ;;  %v1916_v44 = vadd.f32 %v1915_v27, %v1896_v25 }
 0x403   :  { %v2235_v8 = vpop.eup %2234  ;;  %2236 = vpow2.f32 %v2162_v7 }
 0x404   :  { %v1964_v9 = vadd.f32 1.0, %v2235_v8  ;;  %v1935_v16 = vpop.f32.mrf.mxu2 }
 0x405   :  { %v1936_v20 = vadd.f32 %v1935_v16, %v1793_v14 }
 0x406   :  { %2238 = vrcp.f32 %v1964_v9  ;;  %v1977_v19 = vand.u32 2147483648, %v1964_v9  ;;  %v1975_v22 = vand.u32 2147483647, %v1964_v9  ;;  %vm1971_vm1 = vweird.f32 %v1964_v9 }
 0x407   :  { %v1956_v55 = vadd.f32 %v1955_v48, %v1936_v20 }
 0x408   :  { %v1978_v28 = vor.u32 1.1754944e-38, %v1977_v19  ;;  %vm1976_vm3 = vcmp.eq.f32.partialorder %v1975_v22, 8.507059e+37 }
 0x409   :  { %v2237_v11 = vpop.eup %2236 }
 0x40a   :  { %v1965_v12 = vadd.f32 1.0, %v2237_v11 }
 0x40c   :  { %v2239_v13 = vpop.eup %2238  ;;  %2240 = vrcp.f32 %v1965_v12  ;;  %v1992_v37 = vand.u32 2147483648, %v1965_v12  ;;  %vm1986_vm5 = vweird.f32 %v1965_v12  ;;  %v1990_v38 = vand.u32 2147483647, %v1965_v12 }
 0x40d   :  { %v1967_v15 = vmul.f32 %v2239_v13, %v1964_v9  ;;  %vm1972_vm0 = vweird.f32 %v2239_v13 }
 0x40e   :  { %vm1973_vm2 = vmor %vm1971_vm1, %vm1972_vm0  ;;  %v1993_v42 = vor.u32 1.1754944e-38, %v1992_v37  ;;  %vm1991_vm7 = vcmp.eq.f32.partialorder %v1990_v38, 8.507059e+37 }
 0x40f   :  { %v1968_v41 = vsub.f32 1.0, %v1967_v15 }
 0x411   :  { %v1969_v21 = vmul.f32 %v2239_v13, %v1968_v41 }
 0x412   :  { %v2241_v23 = vpop.eup %2240 }
 0x413   :  { %v1982_v24 = vmul.f32 %v2241_v23, %v1965_v12  ;;  %v1970_v26 = vadd.f32 %v2239_v13, %v1969_v21  ;;  %vm1987_vm4 = vweird.f32 %v2241_v23 }
 0x414   :  { %vm1988_vm6 = vmor %vm1986_vm5, %vm1987_vm4 }
 0x415   :  { %v1983_v29 = vsub.f32 1.0, %v1982_v24  ;;  %v1974_v30 = vsel %vm1973_vm2, %v2239_v13, %v1970_v26 }
 0x416   :  { %v1979_v31 = vsel %vm1976_vm3, %v1978_v28, %v1974_v30 }
 0x417   :  { %v1996_v32 = vmul.f32 %v1979_v31, %v1956_v55  ;;  %v1984_v33 = vmul.f32 %v2241_v23, %v1983_v29 }
 0x419   :  { %v1997_v34 = vadd.f32 %v1996_v32, %v1916_v44  ;;  %v1985_v36 = vadd.f32 %v2241_v23, %v1984_v33 }
 0x41b   :  { %2242 = vtanh.f32 %v1997_v34  ;;  %v1989_v39 = vsel %vm1988_vm6, %v2241_v23, %v1985_v36 }
 0x41c   :  { %v1994_v45 = vsel %vm1991_vm7, %v1993_v42, %v1989_v39 }
 0x421   :  { %v2243_v40 = vpop.eup %2242 }
 0x422   :  { %v1999_v43 = vsub.f32 %v2946_v53, %v2243_v40 }
 0x424   :  { %v2000_v46 = vmul.f32 %v1999_v43, %v1994_v45 }
 0x426   :  { %v2001_v47 = vadd.f32 %v2243_v40, %v2000_v46 }
 0x428   :  { %2003 = vst [vmem:[#allocation16 + $0x20] sm:$0xff] %v2001_v47  ;;  %2040 = vmatmul.f32.vlgmr.msra.gmra.mxu0 %v2001_v47 }
 0x429   :  { %2068 = dma.vmem_to_hbm [thread:$0]  %s2061_s10, 640, %s2063_s28, [#allocation17], %s2648_s3, %s2648_s3, %s2649_s20  }
 0x4a5   :  { %v2041_v53 = vpop.f32.mrf.mxu0 }
 0x4a6   :  { %v2042_v35 = vadd.f32 %v2193_v60, %v2041_v53 }
 0x4a8   :  { %2044 = vst [vmem:[#allocation15] sm:$0xff] %v2042_v35 }
 0x4a9   :  { %2055 = dma.vmem_to_hbm [thread:$0]  %s2051_s2, 128, %s2053_s12, [#allocation6]  }
 0x4aa   :  { %2640 = dma.done.wait [#allocation6], 128  }
 0x4ab   :  { %2641 = vsyncadd [#allocation6], 4294967168 }
 0x4ac   :  { %2642 = dma.done.wait [#allocation17], 640  }
 0x4ad   :  { %2643 = vsyncadd [#allocation17], 4294966656 }
 0x4ae   :  { %2077 = vsyncpa [#allocation5], 1 }
 0x4af   :  { %2078 = vsyncpa [#allocation10], 1 }
 0x4b0   :  { %2079 = vsyncpa [#allocation13], 1 }
 0x4b1   :  { %2080 = vsyncpa [#allocation6], 1 }
 0x4b2   :  { %2081 = vsyncpa [#allocation17], 1 }
 0x4b3   :  { %2082 = vsyncpa [#allocation7], 1 }
 0x4b4   :  { %2083 = vsyncmov [#allocation3] }
 0x4b7   :  { %s2084_s8 = vpop.sfrf %2083 }
 0x4b8   :  { %p2163_p12 = scmp.ne.s32.totalorder %s2084_s8, 0 }
 0x4ba   :  { %2088 = shalt.err (%p2163_p12)  }
 0x4bb   :  { %2090 = vsyncmov [#allocation3 + $0x1] }
 0x4be   :  { %s2091_s7 = vpop.sfrf %2090 }
 0x4bf   :  { %p2164_p13 = scmp.ne.s32.totalorder %s2091_s7, 0 }
 0x4c1   :  { %2095 = shalt.err (%p2164_p13)  }
 0x4c2   :  { %2097 = vsyncmov [#allocation3 + $0x2] }
 0x4c5   :  { %s2098_s3 = vpop.sfrf %2097 }
 0x4c6   :  { %p2165_p0 = scmp.ne.s32.totalorder %s2098_s3, 0 }
 0x4c8   :  { %2102 = shalt.err (%p2165_p0)  }
 0x4c9   :  { %2104 = vsyncmov [#allocation3 + $0x3] }
 0x4cc   :  { %s2105_s20 = vpop.sfrf %2104 }
 0x4cd   :  { %p2166_p1 = scmp.ne.s32.totalorder %s2105_s20, 0 }
 0x4cf   :  { %2109 = shalt.err (%p2166_p1)  }
 0x4d0   :  { %2111 = vsyncmov [#allocation3 + $0x4] }
 0x4d3   :  { %s2112_s4 = vpop.sfrf %2111 }
 0x4d4   :  { %p2167_p2 = scmp.ne.s32.totalorder %s2112_s4, 0 }
 0x4d6   :  { %2116 = shalt.err (%p2167_p2)  }
 0x4d7   :  { %2118 = vsyncmov [#allocation3 + $0x5] }
 0x4da   :  { %s2119_s21 = vpop.sfrf %2118 }
 0x4db   :  { %p2168_p3 = scmp.ne.s32.totalorder %s2119_s21, 0 }
 0x4dd   :  { %2123 = shalt.err (%p2168_p3)  }
 0x4de   :  { %2125 = vsyncmov [#allocation3 + $0x6] }
 0x4e1   :  { %s2126_s13 = vpop.sfrf %2125 }
 0x4e2   :  { %p2169_p4 = scmp.ne.s32.totalorder %s2126_s13, 0 }
 0x4e4   :  { %2130 = shalt.err (%p2169_p4)  }
 0x4e5   :  { %2132 = vsyncmov [#allocation3 + $0x7] }
 0x4e8   :  { %s2133_s15 = vpop.sfrf %2132 }
 0x4e9   :  { %p2170_p5 = scmp.ne.s32.totalorder %s2133_s15, 0 }
 0x4eb   :  { %2137 = shalt.err (%p2170_p5)  }

</bundles_post_ra>
